<compile_context>
chip_gen: v5e
topology: v5e:2x2
jax: 0.10.0
libtpu: 0.0.40
codegen_flags: <defaults>
</compile_context>

<pallas_src>
import math
from functools import partial

import jax
import jax.numpy as jnp
import numpy as np
from jax import lax
from jax.experimental import pallas as pl
from jax.experimental.pallas import tpu as pltpu


IGNORE = -1000000.0


# ------------------------------ config --------------------------------------
class Config:
    d_model = 32
    n_heads = 2
    d_head = 8
    nt_heads = 2
    dt_head = 8
    n_ctx = 8
    window_size = 4
    look_backward = 1
    use_rotary = True
    dropout = 0.0          # eval mode -> dropout_p = 0
    pad_value = 0
    autopad = True


# --------------------------- plain-JAX helpers -------------------------------
def find_multiple(n, k):
    return n if n % k == 0 else n + k - (n % k)


def look_around(x, backward=1, forward=0, pad_value=0, dim=2):
    """Mirror of lucidrains' look_around (used by the pure-JAX reference)."""
    n = x.shape[1]
    pad_width = [(0, 0)] * x.ndim
    pad_width[1] = (backward, forward)
    padded = jnp.pad(x, pad_width, constant_values=pad_value)
    tensors = [padded[:, i:i + n] for i in range(forward + backward + 1)]
    return jnp.concatenate(tensors, axis=dim)


def pad_to_multiple(x, multiple, dim=-2, value=0.0):
    length = x.shape[dim]
    remainder = length % multiple
    if remainder == 0:
        return 0, x
    pad = multiple - remainder
    pad_width = [(0, 0)] * x.ndim
    pad_width[dim] = (0, pad)
    return pad, jnp.pad(x, pad_width, constant_values=value)


def get_causal_mask(ts, window_size, look_backward, pad_value):
    # (reference-path only; the fused kernel regenerates this in-kernel)
    ts = find_multiple(ts, window_size)
    seq = jnp.arange(ts, dtype=jnp.int32)
    windows = ts // window_size
    b_t = seq.reshape(1, windows, window_size)
    bb_t = look_around(b_t, backward=look_backward, forward=0, pad_value=pad_value)
    ba_t = look_around(b_t, backward=look_backward, forward=0, pad_value=pad_value)
    mask = (b_t[..., :, None, None] < bb_t[..., None, None, :]) | \
           (bb_t[..., None, None, :] < ba_t[..., None, :, None])
    return mask  # bool, (1, windows, W, M, M)


def precompute_freqs_cis(dim, end, theta=10000.0):
    freqs = 1.0 / (theta ** (jnp.arange(0, dim, 2)[: dim // 2].astype(jnp.float32) / dim))
    t = jnp.arange(end, dtype=jnp.float32)
    angles = jnp.outer(t, freqs)                 # (end, dim//2)
    return jnp.cos(angles), jnp.sin(angles)


def _rotate_pairs(x, c, s):
    x_r = x[..., 0::2]
    x_i = x[..., 1::2]
    out_r = x_r * c - x_i * s
    out_i = x_r * s + x_i * c
    return jnp.stack([out_r, out_i], axis=-1).reshape(x.shape)


def apply_rotary_bhtd(x, cos, sin):
    """x: (B, H, T, D); llama-style interleaved rotation (reference path)."""
    T = x.shape[2]
    return _rotate_pairs(x, cos[:T][None, None, :, :], sin[:T][None, None, :, :])


def pair_swap_perm(width):
    """(width,width) f32 permutation swapping adjacent element pairs (2i <-> 2i+1)."""
    p = np.zeros((width, width), dtype=np.float32)
    idx = np.arange(0, width, 2)
    p[idx, idx + 1] = 1.0
    p[idx + 1, idx] = 1.0
    return jnp.asarray(p)


# ------------------------- the fused forward kernel ---------------------------
def fused_forward_kernel(x_ref, wp_ref, bp_ref, wo_ref, bo_ref,
                         cosq_ref, sinq_ref, cost_ref, sint_ref,
                         permq_ref, permt_ref, o_ref, *,
                         T, H, D, nt, dt, W, lb, T_pad, nw, M,
                         pad_value, use_rotary):
    HD = H * D
    NTD = nt * dt
    G = nt * nw
    f32 = jnp.float32
    bf16 = jnp.bfloat16

    # ---------------- fused qkv + abcde projection (bf16 MXU, f32 accum) -----
    x = x_ref[0]                                               # (T, d_model)
    proj = jnp.dot(x.astype(bf16), wp_ref[...],
                   preferred_element_type=f32) + bp_ref[...]   # (T, 3HD + 5NTD)

    # ---------------- rotary embedding, in-kernel -----------------------------
    # out[2i]   = x[2i]*cos[i] - x[2i+1]*sin[i]
    # out[2i+1] = x[2i]*sin[i] + x[2i+1]*cos[i]
    # pair swap is a tiny f32 permutation matmul; cos/sin arrive pre-expanded
    # (interleaved, sign folded into sin, tiled across heads).
    def rope(slab, cos_v, sin_v, perm):
        swapped = jnp.dot(slab, perm, preferred_element_type=f32)
        return slab * cos_v + swapped * sin_v

    q = proj[:, 0:HD]
    k = proj[:, HD:2 * HD]
    v = proj[:, 2 * HD:3 * HD]
    if use_rotary:
        q = rope(q, cosq_ref[...], sinq_ref[...], permq_ref[...])
        k = rope(k, cosq_ref[...], sinq_ref[...], permq_ref[...])

    # ---------------- causal attention: all heads batched on the MXU ----------
    # TODO(synk): for long n_ctx switch to a flash-style KV-tiled online-softmax
    # kernel instead of materializing the (H, T, T) score tensor.
    q = q * (1.0 / math.sqrt(D))                               # fold softmax scale
    split_heads = lambda slab: jnp.stack(
        [slab[:, h * D:(h + 1) * D] for h in range(H)], axis=0)    # (H, T, D)
    q3 = split_heads(q).astype(bf16)
    k3 = split_heads(k).astype(bf16)
    v3 = split_heads(v).astype(bf16)
    s = lax.dot_general(q3, k3, (((2,), (2,)), ((0,), (0,))),
                        preferred_element_type=f32)            # (H, T, T)
    row = lax.broadcasted_iota(jnp.int32, (T, T), 0)
    col = lax.broadcasted_iota(jnp.int32, (T, T), 1)
    s = jnp.where((row >= col)[None, :, :], s, -1e30)
    s = s - jnp.max(s, axis=-1, keepdims=True)
    p = jnp.exp(s)
    p = p / jnp.sum(p, axis=-1, keepdims=True)                 # exact normalization
    z3 = lax.dot_general(p.astype(bf16), v3,
                         (((2,), (1,)), ((0,), (0,))),
                         preferred_element_type=f32)           # (H, T, D)
    z_attn = jnp.concatenate([z3[h] for h in range(H)], axis=-1)   # (T, H*D)

    # ---------------- triangular local ("tri") attention ----------------------
    off = 3 * HD
    a_s = proj[:, off + 0 * NTD: off + 1 * NTD]
    b_s = proj[:, off + 1 * NTD: off + 2 * NTD]
    c_s = proj[:, off + 2 * NTD: off + 3 * NTD]
    d_s = proj[:, off + 3 * NTD: off + 4 * NTD]
    e_s = proj[:, off + 4 * NTD: off + 5 * NTD]
    if use_rotary:
        a_s = rope(a_s, cost_ref[...], sint_ref[...], permt_ref[...])
        b_s = rope(b_s, cost_ref[...], sint_ref[...], permt_ref[...])
        c_s = rope(c_s, cost_ref[...], sint_ref[...], permt_ref[...])

    inv_dt = 1.0 / float(dt)
    c_s = c_s * inv_dt              # fold the 1/dt_head logit scale into c
    pad_f = float(pad_value)
    pad_cmp = pad_f * inv_dt        # "== pad_value" quirk check (exact for pad_value=0)

    def head_windows(slab, h):      # (T, NTD) -> (nw, W, dt) for head h
        xh = slab[:, h * dt:(h + 1) * dt]
        if T_pad != T:              # in-kernel autopad of the tail window
            xh = jnp.concatenate(
                [xh, jnp.full((T_pad - T, dt), pad_f, dtype=xh.dtype)], axis=0)
        return xh.reshape(nw, W, dt)

    def look_around_w(w3):          # (nw, W, dt) -> (nw, M, dt), assembled in VMEM
        segs = []
        for i in range(lb + 1):
            shift = lb - i
            if shift == 0:
                segs.append(w3)
            else:
                padw = jnp.full((shift, W, dt), pad_f, dtype=w3.dtype)
                segs.append(jnp.concatenate([padw, w3[:nw - shift]], axis=0))
        return jnp.concatenate(segs, axis=1)

    c_l, a_l, b_l, d_l, e_l = [], [], [], [], []
    for h in range(nt):
        c_l.append(head_windows(c_s, h))
        a_l.append(look_around_w(head_windows(a_s, h)))
        b_l.append(look_around_w(head_windows(b_s, h)))
        d_l.append(look_around_w(head_windows(d_s, h)))
        e_l.append(look_around_w(head_windows(e_s, h)))
    c_w = jnp.concatenate(c_l, axis=0)        # (G, W, dt),  G = nt*nw (head-major)
    laa = jnp.concatenate(a_l, axis=0)        # (G, M, dt)
    lab = jnp.concatenate(b_l, axis=0)
    lad = jnp.concatenate(d_l, axis=0)
    lae = jnp.concatenate(e_l, axis=0)

    # 3-way contraction on the MXU: attn[g,n,m,l] = sum_d c[g,n,d] a[g,m,d] b[g,l,d]
    ca = (c_w[:, :, None, :] * laa[:, None, :, :]).reshape(G, W * M, dt)
    attn = lax.dot_general(ca.astype(bf16), lab.astype(bf16),
                           (((2,), (2,)), ((0,), (0,))),
                           preferred_element_type=f32).reshape(G, W, M, M)

    # causal / look-around mask regenerated from iotas (no mask DMA)
    win2 = lax.broadcasted_iota(jnp.int32, (nw, W), 0)
    inn2 = lax.broadcasted_iota(jnp.int32, (nw, W), 1)
    q_pos2 = win2 * W + inn2                                    # (nw, W)
    ksegs = []
    for i in range(lb + 1):
        shift = lb - i
        src = win2 - shift
        ksegs.append(jnp.where(src >= 0, src * W + inn2, int(pad_value)))
    k_pos2 = jnp.concatenate(ksegs, axis=1)                     # (nw, M)
    q_pos = jnp.concatenate([q_pos2] * nt, axis=0)              # (G, W)
    k_pos = jnp.concatenate([k_pos2] * nt, axis=0)              # (G, M)
    mask = (q_pos[:, :, None, None] < k_pos[:, None, None, :]) | \
           (k_pos[:, None, None, :] < k_pos[:, None, :, None])  # (G, W, M, M)

    attn = jnp.where(mask, IGNORE, attn)
    attn = jnp.where(attn == pad_cmp, IGNORE, attn)    # reference's pad quirk

    # softmax over the flattened (m, l) pair per query position
    # TODO(synk): a (G, W, M*M) trailing-dim reshape would make these single
    # lane-axis reductions; skipped to avoid an in-kernel relayout at this size.
    mx = jnp.max(jnp.max(attn, axis=3, keepdims=True), axis=2, keepdims=True)
    ex = jnp.exp(attn - mx)
    den = jnp.sum(jnp.sum(ex, axis=3, keepdims=True), axis=2, keepdims=True)
    score = ex / den

    # z[g,n,:] = sum_m (sum_l score) la_d[m,:] + sum_l (sum_m score) la_e[l,:]
    sm = jnp.sum(score, axis=3)               # (G, W, M)
    sl = jnp.sum(score, axis=2)               # (G, W, M)
    z = lax.dot_general(sm.astype(bf16), lad.astype(bf16),
                        (((2,), (1,)), ((0,), (0,))),
                        preferred_element_type=f32)
    z = z + lax.dot_general(sl.astype(bf16), lae.astype(bf16),
                            (((2,), (1,)), ((0,), (0,))),
                            preferred_element_type=f32)        # (G, W, dt)

    z_h = []
    for h in range(nt):
        zh = z[h * nw:(h + 1) * nw].reshape(T_pad, dt)
        if T_pad != T:
            zh = zh[:T]
        z_h.append(zh)
    z_tri = jnp.concatenate(z_h, axis=-1)                       # (T, nt*dt)

    # ---------------- output projection ---------------------------------------
    z_cat = jnp.concatenate([z_attn, z_tri], axis=-1)           # (T, HD + NTD)
    out = jnp.dot(z_cat.astype(bf16), wo_ref[...],
                  preferred_element_type=f32) + bo_ref[...]
    o_ref[0] = out


# --------------------------- Pallas-path wrapper ------------------------------
def prepare_fused_inputs(params, cfg):
    """One-time (init) prep: bf16 fused weights, rotary tables, pair-swap perms."""
    H, D = cfg.n_heads, cfg.d_head
    nt, dt = cfg.nt_heads, cfg.dt_head
    assert nt > 0, "fused kernel assumes nt_heads > 0"  # TODO(synk): nt_heads==0 path
    if cfg.use_rotary:
        assert dt == D, "module shares one rotary table between d_head and dt_head"
    w_proj = jnp.concatenate([params["qkv_w"], params["abcde_w"]],
                             axis=1).astype(jnp.bfloat16)
    b_proj = jnp.concatenate([params["qkv_b"], params["abcde_b"]], axis=0).reshape(1, -1)
    w_out = params["out_w"].astype(jnp.bfloat16)
    b_out = params["out_b"].reshape(1, -1)
    cos, sin = precompute_freqs_cis(D, cfg.n_ctx)               # (n_ctx, D//2)
    cos_full = jnp.repeat(cos, 2, axis=-1)                      # c0 c0 c1 c1 ...
    sin_full = jnp.stack([-sin, sin], axis=-1).reshape(cfg.n_ctx, D)   # -s0 s0 -s1 s1 ...
    return dict(
        w_proj=w_proj, b_proj=b_proj, w_out=w_out, b_out=b_out,
        cos_q=jnp.tile(cos_full, (1, H)), sin_q=jnp.tile(sin_full, (1, H)),
        cos_t=jnp.tile(cos_full, (1, nt)), sin_t=jnp.tile(sin_full, (1, nt)),
        perm_q=pair_swap_perm(H * D), perm_t=pair_swap_perm(nt * dt),
    )


def mixed_local_attention_forward(x, fused, cfg):
    B, T, dm = x.shape
    H, D = cfg.n_heads, cfg.d_head
    nt, dt = cfg.nt_heads, cfg.dt_head
    W, lb = cfg.window_size, cfg.look_backward
    assert T <= cfg.n_ctx, "sequence longer than rotary tables"
    T_pad = find_multiple(T, W)
    if not cfg.autopad:
        assert T_pad == T, "autopad=False requires seq_len % window_size == 0"
    nw = T_pad // W
    M = W * (lb + 1)

    cos_q = fused["cos_q"][:T]
    sin_q = fused["sin_q"][:T]
    cos_t = fused["cos_t"][:T]
    sin_t = fused["sin_t"][:T]

    kernel = partial(fused_forward_kernel, T=T, H=H, D=D, nt=nt, dt=dt,
                     W=W, lb=lb, T_pad=T_pad, nw=nw, M=M,
                     pad_value=float(cfg.pad_value), use_rotary=cfg.use_rotary)

    def full_spec(a):
        nd = a.ndim
        return pl.BlockSpec(a.shape, lambda i: (0,) * nd)

    operands = (x, fused["w_proj"], fused["b_proj"], fused["w_out"], fused["b_out"],
                cos_q, sin_q, cos_t, sin_t, fused["perm_q"], fused["perm_t"])
    in_specs = [pl.BlockSpec((1, T, dm), lambda i: (i, 0, 0))] + \
               [full_spec(a) for a in operands[1:]]

    # NOTE: the output block last dim (d_model=32) is below 128 lanes but is the
    # full, contiguous extent -> one ~1 KiB DMA per program; repacking it to a
    # lane-dense 128-wide slab would only add an in-kernel relayout at this size.
    return pl.pallas_call(
        kernel,
        out_shape=jax.ShapeDtypeStruct((B, T, dm), jnp.float32),
        grid=(B,),
        in_specs=in_specs,
        out_specs=pl.BlockSpec((1, T, dm), lambda i: (i, 0, 0)),
        compiler_params=pltpu.CompilerParams(dimension_semantics=("parallel",)),
    )(*operands)


# ------------------------- pure-JAX reference (check) -------------------------
def ref_tri_z(a, b, c, d, e, cfg):
    B, nt, ts, dt = a.shape
    w, lb = cfg.window_size, cfg.look_backward
    flat = lambda t_: t_.reshape(B * nt, ts, dt)
    a, b, c, d, e = map(flat, (a, b, c, d, e))
    orig = ts
    a, b, c, d, e = [pad_to_multiple(t_, w, dim=-2, value=float(cfg.pad_value))[1]
                     for t_ in (a, b, c, d, e)]
    padded = a.shape[1]
    nw = padded // w
    win = lambda t_: t_.reshape(B * nt, nw, w, dt)
    a, b, c, d, e = map(win, (a, b, c, d, e))
    la = lambda t_: look_around(t_, backward=lb, forward=0,
                                pad_value=float(cfg.pad_value))
    la_a, la_b, la_d, la_e = la(a), la(b), la(d), la(e)
    attn = jnp.einsum('xhnd,xhmd,xhld->xhnml', c, la_a, la_b)
    cm = get_causal_mask(padded, w, lb, cfg.pad_value)[:, :nw]
    attn = jnp.where(cm, IGNORE, attn)
    attn = jnp.where(attn == float(cfg.pad_value), IGNORE, attn)
    attn = attn / cfg.dt_head
    bs, hs, ns, ms, ls = attn.shape
    score = jax.nn.softmax(attn.reshape(bs, hs, ns, ms * ls), axis=-1)
    score = score.reshape(bs, hs, ns, ms, ls)
    z = (jnp.einsum('xhnml,xhmd->xhnd', score, la_d)
         + jnp.einsum('xhnml,xhld->xhnd', score, la_e))
    z = z.reshape(B, nt, nw, w, dt).transpose(0, 2, 3, 1, 4).reshape(B, nw * w, nt * dt)
    return z[:, :orig]


def ref_forward(x, params, cfg):
    B, ts, dm = x.shape
    H, D = cfg.n_heads, cfg.d_head
    nt, dt = cfg.nt_heads, cfg.dt_head
    cos, sin = precompute_freqs_cis(cfg.d_head, cfg.n_ctx)
    x2d = x.reshape(B * ts, dm)
    qkv = (x2d @ params["qkv_w"] + params["qkv_b"]).reshape(B, ts, 3 * H * D)
    q, k, v = jnp.split(qkv, 3, axis=-1)
    q = q.reshape(B, ts, H, D).transpose(0, 2, 1, 3)
    k = k.reshape(B, ts, H, D).transpose(0, 2, 1, 3)
    v = v.reshape(B, ts, H, D).transpose(0, 2, 1, 3)
    if cfg.use_rotary:
        q = apply_rotary_bhtd(q, cos, sin)
        k = apply_rotary_bhtd(k, cos, sin)
    s = jnp.einsum('bhnd,bhmd->bhnm', q, k) / math.sqrt(D)
    causal = jnp.tril(jnp.ones((ts, ts), dtype=bool))
    s = jnp.where(causal[None, None], s, -jnp.inf)
    p = jax.nn.softmax(s, axis=-1)
    z = jnp.einsum('bhnm,bhmd->bhnd', p, v)
    z_attn = z.transpose(0, 2, 1, 3).reshape(B, ts, H * D)
    if nt > 0:
        abcde = (x2d @ params["abcde_w"] + params["abcde_b"])
        abcde = abcde.reshape(B, ts, 5, nt, dt).transpose(2, 0, 3, 1, 4)
        a, b_, c, d, e = [abcde[i] for i in range(5)]
        if cfg.use_rotary:
            a = apply_rotary_bhtd(a, cos, sin)
            b_ = apply_rotary_bhtd(b_, cos, sin)
            c = apply_rotary_bhtd(c, cos, sin)
        z_tri = ref_tri_z(a, b_, c, d, e, cfg)
        z_attn = jnp.concatenate([z_attn, z_tri], axis=-1)
    out = z_attn.reshape(B * ts, -1) @ params["out_w"] + params["out_b"]
    return out.reshape(B, ts, dm)


# ------------------------------ params / main ---------------------------------
def init_linear(key, in_f, out_f):
    k1, k2 = jax.random.split(key)
    bound = 1.0 / math.sqrt(in_f)
    w = jax.random.uniform(k1, (in_f, out_f), jnp.float32, -bound, bound)
    b = jax.random.uniform(k2, (out_f,), jnp.float32, -bound, bound)
    return w, b


def init_params(key, cfg):
    k1, k2, k3 = jax.random.split(key, 3)
    qkv_w, qkv_b = init_linear(k1, cfg.d_model, 3 * cfg.d_head * cfg.n_heads)
    abcde_w, abcde_b = init_linear(k2, cfg.d_model, 5 * cfg.dt_head * cfg.nt_heads)
    out_in = cfg.d_head * cfg.n_heads + cfg.dt_head * cfg.nt_heads
    out_w, out_b = init_linear(k3, out_in, cfg.d_model)
    return dict(qkv_w=qkv_w, qkv_b=qkv_b, abcde_w=abcde_w, abcde_b=abcde_b,
                out_w=out_w, out_b=out_b)


if __name__ == "__main__":
    cfg = Config()
    key = jax.random.PRNGKey(0)
    kp, kx = jax.random.split(key)
    params = init_params(kp, cfg)
    x = jax.random.normal(kx, (2, cfg.n_ctx, cfg.d_model), dtype=jnp.float32)

    fused = prepare_fused_inputs(params, cfg)   # bf16 weights / tables built once
    fwd = jax.jit(partial(mixed_local_attention_forward, cfg=cfg))
    out = jax.block_until_ready(fwd(x, fused))

    ref = ref_forward(x, params, cfg)
    # bf16 MXU operands (f32 accumulation) throughout -> loose tolerance.
    np.testing.assert_allclose(np.asarray(out), np.asarray(ref), rtol=2.5e-2, atol=2.5e-2)
    assert out.shape == (2, cfg.n_ctx, cfg.d_model)
    assert bool(jnp.all(jnp.isfinite(out)))
    # TODO(synk): dropout / gradient checkpointing are training-only (no-op here).
    print("KERNEL_OK")
</pallas_src>

<mosaic_0001>
module attributes {stable_mosaic.version = 11 : i64} {
  func.func @fused_forward_kernel(%arg0: i32, %arg1: memref<1x8x32xf32, #tpu.memory_space<vmem>>, %arg2: memref<32x128xbf16, #tpu.memory_space<vmem>>, %arg3: memref<1x128xf32, #tpu.memory_space<vmem>>, %arg4: memref<32x32xbf16, #tpu.memory_space<vmem>>, %arg5: memref<1x32xf32, #tpu.memory_space<vmem>>, %arg6: memref<8x16xf32, #tpu.memory_space<vmem>>, %arg7: memref<8x16xf32, #tpu.memory_space<vmem>>, %arg8: memref<8x16xf32, #tpu.memory_space<vmem>>, %arg9: memref<8x16xf32, #tpu.memory_space<vmem>>, %arg10: memref<16x16xf32, #tpu.memory_space<vmem>>, %arg11: memref<16x16xf32, #tpu.memory_space<vmem>>, %arg12: memref<1x8x32xf32, #tpu.memory_space<vmem>>) attributes {dimension_semantics = [#tpu.dimension_semantics<parallel>], iteration_bounds = array<i64: 2>, scalar_prefetch = 0 : i64, scratch_operands = 0 : i64, tpu.core_type = #tpu.core_type<tc>, window_params = [{transform_indices = @transform_0, window_bounds = array<i64: 1, 8, 32>}, {pipeline_mode = #tpu.pipeline_mode<synchronous>, transform_indices = @transform_1, window_bounds = array<i64: 32, 128>}, {pipeline_mode = #tpu.pipeline_mode<synchronous>, transform_indices = @transform_2, window_bounds = array<i64: 1, 128>}, {pipeline_mode = #tpu.pipeline_mode<synchronous>, transform_indices = @transform_3, window_bounds = array<i64: 32, 32>}, {pipeline_mode = #tpu.pipeline_mode<synchronous>, transform_indices = @transform_4, window_bounds = array<i64: 1, 32>}, {pipeline_mode = #tpu.pipeline_mode<synchronous>, transform_indices = @transform_5, window_bounds = array<i64: 8, 16>}, {pipeline_mode = #tpu.pipeline_mode<synchronous>, transform_indices = @transform_6, window_bounds = array<i64: 8, 16>}, {pipeline_mode = #tpu.pipeline_mode<synchronous>, transform_indices = @transform_7, window_bounds = array<i64: 8, 16>}, {pipeline_mode = #tpu.pipeline_mode<synchronous>, transform_indices = @transform_8, window_bounds = array<i64: 8, 16>}, {pipeline_mode = #tpu.pipeline_mode<synchronous>, transform_indices = @transform_9, window_bounds = array<i64: 16, 16>}, {pipeline_mode = #tpu.pipeline_mode<synchronous>, transform_indices = @transform_10, window_bounds = array<i64: 16, 16>}, {transform_indices = @transform_11, window_bounds = array<i64: 1, 8, 32>}]} {
    %c0 = arith.constant 0 : index
    %c0_0 = arith.constant 0 : index
    %c0_1 = arith.constant 0 : index
    %0 = vector.load %arg1[%c0, %c0_0, %c0_1] : memref<1x8x32xf32, #tpu.memory_space<vmem>>, vector<1x8x32xf32>
    %1 = vector.shape_cast %0 : vector<1x8x32xf32> to vector<8x32xf32>
    %2 = arith.truncf %1 : vector<8x32xf32> to vector<8x32xbf16>
    %c0_2 = arith.constant 0 : index
    %c0_3 = arith.constant 0 : index
    %3 = vector.load %arg2[%c0_2, %c0_3] : memref<32x128xbf16, #tpu.memory_space<vmem>>, vector<32x128xbf16>
    %cst = arith.constant dense<0.000000e+00> : vector<8x128xf32>
    %4 = tpu.matmul %2, %3, %cst {dimension_numbers = #tpu.dot_dimension_numbers<[1], [0], [0], [1], [0, 0, 1, 1], [], []>} : vector<8x32xbf16>, vector<32x128xbf16>, vector<8x128xf32> -> vector<8x128xf32>
    %c0_4 = arith.constant 0 : index
    %c0_5 = arith.constant 0 : index
    %5 = vector.load %arg3[%c0_4, %c0_5] : memref<1x128xf32, #tpu.memory_space<vmem>>, vector<1x128xf32>
    %6 = vector.broadcast %5 : vector<1x128xf32> to vector<8x128xf32>
    %7 = arith.addf %4, %6 : vector<8x128xf32>
    %8 = vector.extract_strided_slice %7 {offsets = [0, 0], sizes = [8, 16], strides = [1, 1]} : vector<8x128xf32> to vector<8x16xf32>
    %9 = vector.extract_strided_slice %7 {offsets = [0, 16], sizes = [8, 16], strides = [1, 1]} : vector<8x128xf32> to vector<8x16xf32>
    %10 = vector.extract_strided_slice %7 {offsets = [0, 32], sizes = [8, 16], strides = [1, 1]} : vector<8x128xf32> to vector<8x16xf32>
    %c0_6 = arith.constant 0 : index
    %c0_7 = arith.constant 0 : index
    %11 = vector.load %arg6[%c0_6, %c0_7] : memref<8x16xf32, #tpu.memory_space<vmem>>, vector<8x16xf32>
    %c0_8 = arith.constant 0 : index
    %c0_9 = arith.constant 0 : index
    %12 = vector.load %arg7[%c0_8, %c0_9] : memref<8x16xf32, #tpu.memory_space<vmem>>, vector<8x16xf32>
    %c0_10 = arith.constant 0 : index
    %c0_11 = arith.constant 0 : index
    %13 = vector.load %arg10[%c0_10, %c0_11] : memref<16x16xf32, #tpu.memory_space<vmem>>, vector<16x16xf32>
    %cst_12 = arith.constant dense<0.000000e+00> : vector<8x16xf32>
    %14 = tpu.matmul %8, %13, %cst_12 {dimension_numbers = #tpu.dot_dimension_numbers<[1], [0], [0], [1], [0, 0, 1, 1], [], []>} : vector<8x16xf32>, vector<16x16xf32>, vector<8x16xf32> -> vector<8x16xf32>
    %15 = arith.mulf %8, %11 : vector<8x16xf32>
    %16 = arith.mulf %14, %12 : vector<8x16xf32>
    %17 = arith.addf %15, %16 : vector<8x16xf32>
    %c0_13 = arith.constant 0 : index
    %c0_14 = arith.constant 0 : index
    %18 = vector.load %arg6[%c0_13, %c0_14] : memref<8x16xf32, #tpu.memory_space<vmem>>, vector<8x16xf32>
    %c0_15 = arith.constant 0 : index
    %c0_16 = arith.constant 0 : index
    %19 = vector.load %arg7[%c0_15, %c0_16] : memref<8x16xf32, #tpu.memory_space<vmem>>, vector<8x16xf32>
    %c0_17 = arith.constant 0 : index
    %c0_18 = arith.constant 0 : index
    %20 = vector.load %arg10[%c0_17, %c0_18] : memref<16x16xf32, #tpu.memory_space<vmem>>, vector<16x16xf32>
    %cst_19 = arith.constant dense<0.000000e+00> : vector<8x16xf32>
    %21 = tpu.matmul %9, %20, %cst_19 {dimension_numbers = #tpu.dot_dimension_numbers<[1], [0], [0], [1], [0, 0, 1, 1], [], []>} : vector<8x16xf32>, vector<16x16xf32>, vector<8x16xf32> -> vector<8x16xf32>
    %22 = arith.mulf %9, %18 : vector<8x16xf32>
    %23 = arith.mulf %21, %19 : vector<8x16xf32>
    %24 = arith.addf %22, %23 : vector<8x16xf32>
    %cst_20 = arith.constant 0.353553385 : f32
    %25 = vector.broadcast %cst_20 : f32 to vector<8x16xf32>
    %26 = arith.mulf %17, %25 : vector<8x16xf32>
    %27 = vector.extract_strided_slice %26 {offsets = [0, 0], sizes = [8, 8], strides = [1, 1]} : vector<8x16xf32> to vector<8x8xf32>
    %28 = vector.extract_strided_slice %26 {offsets = [0, 8], sizes = [8, 8], strides = [1, 1]} : vector<8x16xf32> to vector<8x8xf32>
    %29 = vector.shape_cast %27 : vector<8x8xf32> to vector<1x8x8xf32>
    %30 = vector.shape_cast %28 : vector<8x8xf32> to vector<1x8x8xf32>
    %31 = tpu.concatenate %29, %30 in 0 : vector<1x8x8xf32>, vector<1x8x8xf32> -> vector<2x8x8xf32>
    %32 = arith.truncf %31 : vector<2x8x8xf32> to vector<2x8x8xbf16>
    %33 = vector.extract_strided_slice %24 {offsets = [0, 0], sizes = [8, 8], strides = [1, 1]} : vector<8x16xf32> to vector<8x8xf32>
    %34 = vector.extract_strided_slice %24 {offsets = [0, 8], sizes = [8, 8], strides = [1, 1]} : vector<8x16xf32> to vector<8x8xf32>
    %35 = vector.shape_cast %33 : vector<8x8xf32> to vector<1x8x8xf32>
    %36 = vector.shape_cast %34 : vector<8x8xf32> to vector<1x8x8xf32>
    %37 = tpu.concatenate %35, %36 in 0 : vector<1x8x8xf32>, vector<1x8x8xf32> -> vector<2x8x8xf32>
    %38 = arith.truncf %37 : vector<2x8x8xf32> to vector<2x8x8xbf16>
    %39 = vector.extract_strided_slice %10 {offsets = [0, 0], sizes = [8, 8], strides = [1, 1]} : vector<8x16xf32> to vector<8x8xf32>
    %40 = vector.extract_strided_slice %10 {offsets = [0, 8], sizes = [8, 8], strides = [1, 1]} : vector<8x16xf32> to vector<8x8xf32>
    %41 = vector.shape_cast %39 : vector<8x8xf32> to vector<1x8x8xf32>
    %42 = vector.shape_cast %40 : vector<8x8xf32> to vector<1x8x8xf32>
    %43 = tpu.concatenate %41, %42 in 0 : vector<1x8x8xf32>, vector<1x8x8xf32> -> vector<2x8x8xf32>
    %44 = arith.truncf %43 : vector<2x8x8xf32> to vector<2x8x8xbf16>
    %cst_21 = arith.constant dense<0.000000e+00> : vector<2x8x8xf32>
    %45 = tpu.matmul %32, %38, %cst_21 {dimension_numbers = #tpu.dot_dimension_numbers<[2], [2], [1], [1], [0, 0, 0, 1, 1, 1], [0], [0]>} : vector<2x8x8xbf16>, vector<2x8x8xbf16>, vector<2x8x8xf32> -> vector<2x8x8xf32>
    %46 = tpu.iota {dimensions = array<i32: 0>} : vector<8x8xi32>
    %47 = tpu.iota {dimensions = array<i32: 1>} : vector<8x8xi32>
    %48 = arith.cmpi sge, %46, %47 : vector<8x8xi32>
    %49 = vector.shape_cast %48 : vector<8x8xi1> to vector<1x8x8xi1>
    %cst_22 = arith.constant -1.000000e+30 : f32
    %50 = vector.shape_cast %49 : vector<1x8x8xi1> to vector<1x8x8xi1>
    %51 = vector.broadcast %50 : vector<1x8x8xi1> to vector<2x8x8xi1>
    %52 = vector.broadcast %cst_22 : f32 to vector<2x8x8xf32>
    %53 = arith.select %51, %45, %52 : vector<2x8x8xi1>, vector<2x8x8xf32>
    %cst_23 = arith.constant dense<0xFF800000> : vector<2x8xf32>
    %54 = vector.multi_reduction <maximumf>, %53, %cst_23 [2] : vector<2x8x8xf32> to vector<2x8xf32>
    %55 = vector.shape_cast %54 : vector<2x8xf32> to vector<2x8x1xf32>
    %56 = vector.broadcast %55 : vector<2x8x1xf32> to vector<2x8x8xf32>
    %57 = arith.subf %53, %56 : vector<2x8x8xf32>
    %58 = math.exp %57 : vector<2x8x8xf32>
    %cst_24 = arith.constant dense<0.000000e+00> : vector<2x8xf32>
    %59 = vector.multi_reduction <add>, %58, %cst_24 [2] : vector<2x8x8xf32> to vector<2x8xf32>
    %60 = vector.shape_cast %59 : vector<2x8xf32> to vector<2x8x1xf32>
    %61 = vector.broadcast %60 : vector<2x8x1xf32> to vector<2x8x8xf32>
    %62 = arith.divf %58, %61 : vector<2x8x8xf32>
    %63 = arith.truncf %62 : vector<2x8x8xf32> to vector<2x8x8xbf16>
    %cst_25 = arith.constant dense<0.000000e+00> : vector<2x8x8xf32>
    %64 = tpu.matmul %63, %44, %cst_25 {dimension_numbers = #tpu.dot_dimension_numbers<[2], [1], [1], [2], [0, 0, 0, 1, 1, 2], [0], [0]>} : vector<2x8x8xbf16>, vector<2x8x8xbf16>, vector<2x8x8xf32> -> vector<2x8x8xf32>
    %65 = vector.extract_strided_slice %64 {offsets = [0, 0, 0], sizes = [1, 8, 8], strides = [1, 1, 1]} : vector<2x8x8xf32> to vector<1x8x8xf32>
    %66 = vector.shape_cast %65 : vector<1x8x8xf32> to vector<8x8xf32>
    %67 = vector.extract_strided_slice %64 {offsets = [1, 0, 0], sizes = [1, 8, 8], strides = [1, 1, 1]} : vector<2x8x8xf32> to vector<1x8x8xf32>
    %68 = vector.shape_cast %67 : vector<1x8x8xf32> to vector<8x8xf32>
    %69 = tpu.concatenate %66, %68 in 1 : vector<8x8xf32>, vector<8x8xf32> -> vector<8x16xf32>
    %70 = vector.extract_strided_slice %7 {offsets = [0, 48], sizes = [8, 16], strides = [1, 1]} : vector<8x128xf32> to vector<8x16xf32>
    %71 = vector.extract_strided_slice %7 {offsets = [0, 64], sizes = [8, 16], strides = [1, 1]} : vector<8x128xf32> to vector<8x16xf32>
    %72 = vector.extract_strided_slice %7 {offsets = [0, 80], sizes = [8, 16], strides = [1, 1]} : vector<8x128xf32> to vector<8x16xf32>
    %73 = vector.extract_strided_slice %7 {offsets = [0, 96], sizes = [8, 16], strides = [1, 1]} : vector<8x128xf32> to vector<8x16xf32>
    %74 = vector.extract_strided_slice %7 {offsets = [0, 112], sizes = [8, 16], strides = [1, 1]} : vector<8x128xf32> to vector<8x16xf32>
    %c0_26 = arith.constant 0 : index
    %c0_27 = arith.constant 0 : index
    %75 = vector.load %arg8[%c0_26, %c0_27] : memref<8x16xf32, #tpu.memory_space<vmem>>, vector<8x16xf32>
    %c0_28 = arith.constant 0 : index
    %c0_29 = arith.constant 0 : index
    %76 = vector.load %arg9[%c0_28, %c0_29] : memref<8x16xf32, #tpu.memory_space<vmem>>, vector<8x16xf32>
    %c0_30 = arith.constant 0 : index
    %c0_31 = arith.constant 0 : index
    %77 = vector.load %arg11[%c0_30, %c0_31] : memref<16x16xf32, #tpu.memory_space<vmem>>, vector<16x16xf32>
    %cst_32 = arith.constant dense<0.000000e+00> : vector<8x16xf32>
    %78 = tpu.matmul %70, %77, %cst_32 {dimension_numbers = #tpu.dot_dimension_numbers<[1], [0], [0], [1], [0, 0, 1, 1], [], []>} : vector<8x16xf32>, vector<16x16xf32>, vector<8x16xf32> -> vector<8x16xf32>
    %79 = arith.mulf %70, %75 : vector<8x16xf32>
    %80 = arith.mulf %78, %76 : vector<8x16xf32>
    %81 = arith.addf %79, %80 : vector<8x16xf32>
    %c0_33 = arith.constant 0 : index
    %c0_34 = arith.constant 0 : index
    %82 = vector.load %arg8[%c0_33, %c0_34] : memref<8x16xf32, #tpu.memory_space<vmem>>, vector<8x16xf32>
    %c0_35 = arith.constant 0 : index
    %c0_36 = arith.constant 0 : index
    %83 = vector.load %arg9[%c0_35, %c0_36] : memref<8x16xf32, #tpu.memory_space<vmem>>, vector<8x16xf32>
    %c0_37 = arith.constant 0 : index
    %c0_38 = arith.constant 0 : index
    %84 = vector.load %arg11[%c0_37, %c0_38] : memref<16x16xf32, #tpu.memory_space<vmem>>, vector<16x16xf32>
    %cst_39 = arith.constant dense<0.000000e+00> : vector<8x16xf32>
    %85 = tpu.matmul %71, %84, %cst_39 {dimension_numbers = #tpu.dot_dimension_numbers<[1], [0], [0], [1], [0, 0, 1, 1], [], []>} : vector<8x16xf32>, vector<16x16xf32>, vector<8x16xf32> -> vector<8x16xf32>
    %86 = arith.mulf %71, %82 : vector<8x16xf32>
    %87 = arith.mulf %85, %83 : vector<8x16xf32>
    %88 = arith.addf %86, %87 : vector<8x16xf32>
    %c0_40 = arith.constant 0 : index
    %c0_41 = arith.constant 0 : index
    %89 = vector.load %arg8[%c0_40, %c0_41] : memref<8x16xf32, #tpu.memory_space<vmem>>, vector<8x16xf32>
    %c0_42 = arith.constant 0 : index
    %c0_43 = arith.constant 0 : index
    %90 = vector.load %arg9[%c0_42, %c0_43] : memref<8x16xf32, #tpu.memory_space<vmem>>, vector<8x16xf32>
    %c0_44 = arith.constant 0 : index
    %c0_45 = arith.constant 0 : index
    %91 = vector.load %arg11[%c0_44, %c0_45] : memref<16x16xf32, #tpu.memory_space<vmem>>, vector<16x16xf32>
    %cst_46 = arith.constant dense<0.000000e+00> : vector<8x16xf32>
    %92 = tpu.matmul %72, %91, %cst_46 {dimension_numbers = #tpu.dot_dimension_numbers<[1], [0], [0], [1], [0, 0, 1, 1], [], []>} : vector<8x16xf32>, vector<16x16xf32>, vector<8x16xf32> -> vector<8x16xf32>
    %93 = arith.mulf %72, %89 : vector<8x16xf32>
    %94 = arith.mulf %92, %90 : vector<8x16xf32>
    %95 = arith.addf %93, %94 : vector<8x16xf32>
    %cst_47 = arith.constant 1.250000e-01 : f32
    %96 = vector.broadcast %cst_47 : f32 to vector<8x16xf32>
    %97 = arith.mulf %95, %96 : vector<8x16xf32>
    %98 = vector.extract_strided_slice %97 {offsets = [0, 0], sizes = [8, 8], strides = [1, 1]} : vector<8x16xf32> to vector<8x8xf32>
    %99 = vector.shape_cast %98 : vector<8x8xf32> to vector<2x4x8xf32>
    %100 = vector.extract_strided_slice %81 {offsets = [0, 0], sizes = [8, 8], strides = [1, 1]} : vector<8x16xf32> to vector<8x8xf32>
    %101 = vector.shape_cast %100 : vector<8x8xf32> to vector<2x4x8xf32>
    %cst_48 = arith.constant 0.000000e+00 : f32
    %102 = vector.broadcast %cst_48 : f32 to vector<1x4x8xf32>
    %103 = vector.extract_strided_slice %101 {offsets = [0, 0, 0], sizes = [1, 4, 8], strides = [1, 1, 1]} : vector<2x4x8xf32> to vector<1x4x8xf32>
    %104 = tpu.concatenate %102, %103 in 0 : vector<1x4x8xf32>, vector<1x4x8xf32> -> vector<2x4x8xf32>
    %105 = tpu.concatenate %104, %101 in 1 : vector<2x4x8xf32>, vector<2x4x8xf32> -> vector<2x8x8xf32>
    %106 = vector.extract_strided_slice %88 {offsets = [0, 0], sizes = [8, 8], strides = [1, 1]} : vector<8x16xf32> to vector<8x8xf32>
    %107 = vector.shape_cast %106 : vector<8x8xf32> to vector<2x4x8xf32>
    %cst_49 = arith.constant 0.000000e+00 : f32
    %108 = vector.broadcast %cst_49 : f32 to vector<1x4x8xf32>
    %109 = vector.extract_strided_slice %107 {offsets = [0, 0, 0], sizes = [1, 4, 8], strides = [1, 1, 1]} : vector<2x4x8xf32> to vector<1x4x8xf32>
    %110 = tpu.concatenate %108, %109 in 0 : vector<1x4x8xf32>, vector<1x4x8xf32> -> vector<2x4x8xf32>
    %111 = tpu.concatenate %110, %107 in 1 : vector<2x4x8xf32>, vector<2x4x8xf32> -> vector<2x8x8xf32>
    %112 = vector.extract_strided_slice %73 {offsets = [0, 0], sizes = [8, 8], strides = [1, 1]} : vector<8x16xf32> to vector<8x8xf32>
    %113 = vector.shape_cast %112 : vector<8x8xf32> to vector<2x4x8xf32>
    %cst_50 = arith.constant 0.000000e+00 : f32
    %114 = vector.broadcast %cst_50 : f32 to vector<1x4x8xf32>
    %115 = vector.extract_strided_slice %113 {offsets = [0, 0, 0], sizes = [1, 4, 8], strides = [1, 1, 1]} : vector<2x4x8xf32> to vector<1x4x8xf32>
    %116 = tpu.concatenate %114, %115 in 0 : vector<1x4x8xf32>, vector<1x4x8xf32> -> vector<2x4x8xf32>
    %117 = tpu.concatenate %116, %113 in 1 : vector<2x4x8xf32>, vector<2x4x8xf32> -> vector<2x8x8xf32>
    %118 = vector.extract_strided_slice %74 {offsets = [0, 0], sizes = [8, 8], strides = [1, 1]} : vector<8x16xf32> to vector<8x8xf32>
    %119 = vector.shape_cast %118 : vector<8x8xf32> to vector<2x4x8xf32>
    %cst_51 = arith.constant 0.000000e+00 : f32
    %120 = vector.broadcast %cst_51 : f32 to vector<1x4x8xf32>
    %121 = vector.extract_strided_slice %119 {offsets = [0, 0, 0], sizes = [1, 4, 8], strides = [1, 1, 1]} : vector<2x4x8xf32> to vector<1x4x8xf32>
    %122 = tpu.concatenate %120, %121 in 0 : vector<1x4x8xf32>, vector<1x4x8xf32> -> vector<2x4x8xf32>
    %123 = tpu.concatenate %122, %119 in 1 : vector<2x4x8xf32>, vector<2x4x8xf32> -> vector<2x8x8xf32>
    %124 = vector.extract_strided_slice %97 {offsets = [0, 8], sizes = [8, 8], strides = [1, 1]} : vector<8x16xf32> to vector<8x8xf32>
    %125 = vector.shape_cast %124 : vector<8x8xf32> to vector<2x4x8xf32>
    %126 = vector.extract_strided_slice %81 {offsets = [0, 8], sizes = [8, 8], strides = [1, 1]} : vector<8x16xf32> to vector<8x8xf32>
    %127 = vector.shape_cast %126 : vector<8x8xf32> to vector<2x4x8xf32>
    %cst_52 = arith.constant 0.000000e+00 : f32
    %128 = vector.broadcast %cst_52 : f32 to vector<1x4x8xf32>
    %129 = vector.extract_strided_slice %127 {offsets = [0, 0, 0], sizes = [1, 4, 8], strides = [1, 1, 1]} : vector<2x4x8xf32> to vector<1x4x8xf32>
    %130 = tpu.concatenate %128, %129 in 0 : vector<1x4x8xf32>, vector<1x4x8xf32> -> vector<2x4x8xf32>
    %131 = tpu.concatenate %130, %127 in 1 : vector<2x4x8xf32>, vector<2x4x8xf32> -> vector<2x8x8xf32>
    %132 = vector.extract_strided_slice %88 {offsets = [0, 8], sizes = [8, 8], strides = [1, 1]} : vector<8x16xf32> to vector<8x8xf32>
    %133 = vector.shape_cast %132 : vector<8x8xf32> to vector<2x4x8xf32>
    %cst_53 = arith.constant 0.000000e+00 : f32
    %134 = vector.broadcast %cst_53 : f32 to vector<1x4x8xf32>
    %135 = vector.extract_strided_slice %133 {offsets = [0, 0, 0], sizes = [1, 4, 8], strides = [1, 1, 1]} : vector<2x4x8xf32> to vector<1x4x8xf32>
    %136 = tpu.concatenate %134, %135 in 0 : vector<1x4x8xf32>, vector<1x4x8xf32> -> vector<2x4x8xf32>
    %137 = tpu.concatenate %136, %133 in 1 : vector<2x4x8xf32>, vector<2x4x8xf32> -> vector<2x8x8xf32>
    %138 = vector.extract_strided_slice %73 {offsets = [0, 8], sizes = [8, 8], strides = [1, 1]} : vector<8x16xf32> to vector<8x8xf32>
    %139 = vector.shape_cast %138 : vector<8x8xf32> to vector<2x4x8xf32>
    %cst_54 = arith.constant 0.000000e+00 : f32
    %140 = vector.broadcast %cst_54 : f32 to vector<1x4x8xf32>
    %141 = vector.extract_strided_slice %139 {offsets = [0, 0, 0], sizes = [1, 4, 8], strides = [1, 1, 1]} : vector<2x4x8xf32> to vector<1x4x8xf32>
    %142 = tpu.concatenate %140, %141 in 0 : vector<1x4x8xf32>, vector<1x4x8xf32> -> vector<2x4x8xf32>
    %143 = tpu.concatenate %142, %139 in 1 : vector<2x4x8xf32>, vector<2x4x8xf32> -> vector<2x8x8xf32>
    %144 = vector.extract_strided_slice %74 {offsets = [0, 8], sizes = [8, 8], strides = [1, 1]} : vector<8x16xf32> to vector<8x8xf32>
    %145 = vector.shape_cast %144 : vector<8x8xf32> to vector<2x4x8xf32>
    %cst_55 = arith.constant 0.000000e+00 : f32
    %146 = vector.broadcast %cst_55 : f32 to vector<1x4x8xf32>
    %147 = vector.extract_strided_slice %145 {offsets = [0, 0, 0], sizes = [1, 4, 8], strides = [1, 1, 1]} : vector<2x4x8xf32> to vector<1x4x8xf32>
    %148 = tpu.concatenate %146, %147 in 0 : vector<1x4x8xf32>, vector<1x4x8xf32> -> vector<2x4x8xf32>
    %149 = tpu.concatenate %148, %145 in 1 : vector<2x4x8xf32>, vector<2x4x8xf32> -> vector<2x8x8xf32>
    %150 = tpu.concatenate %99, %125 in 0 : vector<2x4x8xf32>, vector<2x4x8xf32> -> vector<4x4x8xf32>
    %151 = tpu.concatenate %105, %131 in 0 : vector<2x8x8xf32>, vector<2x8x8xf32> -> vector<4x8x8xf32>
    %152 = tpu.concatenate %111, %137 in 0 : vector<2x8x8xf32>, vector<2x8x8xf32> -> vector<4x8x8xf32>
    %153 = tpu.concatenate %117, %143 in 0 : vector<2x8x8xf32>, vector<2x8x8xf32> -> vector<4x8x8xf32>
    %154 = tpu.concatenate %123, %149 in 0 : vector<2x8x8xf32>, vector<2x8x8xf32> -> vector<4x8x8xf32>
    %155 = vector.shape_cast %150 : vector<4x4x8xf32> to vector<4x4x1x8xf32>
    %156 = vector.shape_cast %151 : vector<4x8x8xf32> to vector<4x1x8x8xf32>
    %157 = vector.broadcast %155 : vector<4x4x1x8xf32> to vector<4x4x8x8xf32>
    %158 = vector.broadcast %156 : vector<4x1x8x8xf32> to vector<4x4x8x8xf32>
    %159 = arith.mulf %157, %158 : vector<4x4x8x8xf32>
    %160 = vector.shape_cast %159 : vector<4x4x8x8xf32> to vector<4x32x8xf32>
    %161 = arith.truncf %160 : vector<4x32x8xf32> to vector<4x32x8xbf16>
    %162 = arith.truncf %152 : vector<4x8x8xf32> to vector<4x8x8xbf16>
    %cst_56 = arith.constant dense<0.000000e+00> : vector<4x32x8xf32>
    %163 = tpu.matmul %161, %162, %cst_56 {dimension_numbers = #tpu.dot_dimension_numbers<[2], [2], [1], [1], [0, 0, 0, 1, 1, 1], [0], [0]>} : vector<4x32x8xbf16>, vector<4x8x8xbf16>, vector<4x32x8xf32> -> vector<4x32x8xf32>
    %164 = vector.shape_cast %163 : vector<4x32x8xf32> to vector<4x4x8x8xf32>
    %165 = tpu.iota {dimensions = array<i32: 0>} : vector<2x4xi32>
    %166 = tpu.iota {dimensions = array<i32: 1>} : vector<2x4xi32>
    %c4_i32 = arith.constant 4 : i32
    %167 = vector.broadcast %c4_i32 : i32 to vector<2x4xi32>
    %168 = arith.muli %165, %167 : vector<2x4xi32>
    %169 = arith.addi %168, %166 : vector<2x4xi32>
    %c1_i32 = arith.constant 1 : i32
    %170 = vector.broadcast %c1_i32 : i32 to vector<2x4xi32>
    %171 = arith.subi %165, %170 : vector<2x4xi32>
    %c0_i32 = arith.constant 0 : i32
    %172 = vector.broadcast %c0_i32 : i32 to vector<2x4xi32>
    %173 = arith.cmpi sge, %171, %172 : vector<2x4xi32>
    %c4_i32_57 = arith.constant 4 : i32
    %174 = vector.broadcast %c4_i32_57 : i32 to vector<2x4xi32>
    %175 = arith.muli %171, %174 : vector<2x4xi32>
    %176 = arith.addi %175, %166 : vector<2x4xi32>
    %c0_i32_58 = arith.constant 0 : i32
    %177 = vector.broadcast %c0_i32_58 : i32 to vector<2x4xi32>
    %178 = arith.select %173, %176, %177 : vector<2x4xi1>, vector<2x4xi32>
    %c0_i32_59 = arith.constant 0 : i32
    %179 = vector.broadcast %c0_i32_59 : i32 to vector<2x4xi32>
    %180 = arith.subi %165, %179 : vector<2x4xi32>
    %c0_i32_60 = arith.constant 0 : i32
    %181 = vector.broadcast %c0_i32_60 : i32 to vector<2x4xi32>
    %182 = arith.cmpi sge, %180, %181 : vector<2x4xi32>
    %c4_i32_61 = arith.constant 4 : i32
    %183 = vector.broadcast %c4_i32_61 : i32 to vector<2x4xi32>
    %184 = arith.muli %180, %183 : vector<2x4xi32>
    %185 = arith.addi %184, %166 : vector<2x4xi32>
    %c0_i32_62 = arith.constant 0 : i32
    %186 = vector.broadcast %c0_i32_62 : i32 to vector<2x4xi32>
    %187 = arith.select %182, %185, %186 : vector<2x4xi1>, vector<2x4xi32>
    %188 = tpu.concatenate %178, %187 in 1 : vector<2x4xi32>, vector<2x4xi32> -> vector<2x8xi32>
    %189 = tpu.concatenate %169, %169 in 0 : vector<2x4xi32>, vector<2x4xi32> -> vector<4x4xi32>
    %190 = tpu.concatenate %188, %188 in 0 : vector<2x8xi32>, vector<2x8xi32> -> vector<4x8xi32>
    %191 = vector.shape_cast %189 : vector<4x4xi32> to vector<4x4x1x1xi32>
    %192 = vector.shape_cast %190 : vector<4x8xi32> to vector<4x1x1x8xi32>
    %193 = vector.broadcast %191 : vector<4x4x1x1xi32> to vector<4x4x1x8xi32>
    %194 = vector.broadcast %192 : vector<4x1x1x8xi32> to vector<4x4x1x8xi32>
    %195 = arith.cmpi slt, %193, %194 : vector<4x4x1x8xi32>
    %196 = vector.shape_cast %190 : vector<4x8xi32> to vector<4x1x1x8xi32>
    %197 = vector.shape_cast %190 : vector<4x8xi32> to vector<4x1x8x1xi32>
    %198 = vector.broadcast %196 : vector<4x1x1x8xi32> to vector<4x1x8x8xi32>
    %199 = vector.broadcast %197 : vector<4x1x8x1xi32> to vector<4x1x8x8xi32>
    %200 = arith.cmpi slt, %198, %199 : vector<4x1x8x8xi32>
    %201 = vector.broadcast %195 : vector<4x4x1x8xi1> to vector<4x4x8x8xi1>
    %202 = vector.broadcast %200 : vector<4x1x8x8xi1> to vector<4x4x8x8xi1>
    %203 = arith.ori %201, %202 : vector<4x4x8x8xi1>
    %cst_63 = arith.constant -1.000000e+06 : f32
    %204 = vector.broadcast %cst_63 : f32 to vector<4x4x8x8xf32>
    %205 = arith.select %203, %204, %164 : vector<4x4x8x8xi1>, vector<4x4x8x8xf32>
    %cst_64 = arith.constant 0.000000e+00 : f32
    %206 = vector.broadcast %cst_64 : f32 to vector<4x4x8x8xf32>
    %207 = arith.cmpf oeq, %205, %206 : vector<4x4x8x8xf32>
    %cst_65 = arith.constant -1.000000e+06 : f32
    %208 = vector.broadcast %cst_65 : f32 to vector<4x4x8x8xf32>
    %209 = arith.select %207, %208, %205 : vector<4x4x8x8xi1>, vector<4x4x8x8xf32>
    %cst_66 = arith.constant dense<0xFF800000> : vector<4x4x8xf32>
    %210 = vector.multi_reduction <maximumf>, %209, %cst_66 [3] : vector<4x4x8x8xf32> to vector<4x4x8xf32>
    %211 = vector.shape_cast %210 : vector<4x4x8xf32> to vector<4x4x8x1xf32>
    %cst_67 = arith.constant dense<0xFF800000> : vector<4x4x1xf32>
    %212 = vector.multi_reduction <maximumf>, %211, %cst_67 [2] : vector<4x4x8x1xf32> to vector<4x4x1xf32>
    %213 = vector.shape_cast %212 : vector<4x4x1xf32> to vector<4x4x1x1xf32>
    %214 = vector.broadcast %213 : vector<4x4x1x1xf32> to vector<4x4x8x8xf32>
    %215 = arith.subf %209, %214 : vector<4x4x8x8xf32>
    %216 = math.exp %215 : vector<4x4x8x8xf32>
    %cst_68 = arith.constant dense<0.000000e+00> : vector<4x4x8xf32>
    %217 = vector.multi_reduction <add>, %216, %cst_68 [3] : vector<4x4x8x8xf32> to vector<4x4x8xf32>
    %218 = vector.shape_cast %217 : vector<4x4x8xf32> to vector<4x4x8x1xf32>
    %cst_69 = arith.constant dense<0.000000e+00> : vector<4x4x1xf32>
    %219 = vector.multi_reduction <add>, %218, %cst_69 [2] : vector<4x4x8x1xf32> to vector<4x4x1xf32>
    %220 = vector.shape_cast %219 : vector<4x4x1xf32> to vector<4x4x1x1xf32>
    %221 = vector.broadcast %220 : vector<4x4x1x1xf32> to vector<4x4x8x8xf32>
    %222 = arith.divf %216, %221 : vector<4x4x8x8xf32>
    %cst_70 = arith.constant dense<0.000000e+00> : vector<4x4x8xf32>
    %223 = vector.multi_reduction <add>, %222, %cst_70 [3] : vector<4x4x8x8xf32> to vector<4x4x8xf32>
    %cst_71 = arith.constant dense<0.000000e+00> : vector<4x4x8xf32>
    %224 = vector.multi_reduction <add>, %222, %cst_71 [2] : vector<4x4x8x8xf32> to vector<4x4x8xf32>
    %225 = arith.truncf %223 : vector<4x4x8xf32> to vector<4x4x8xbf16>
    %226 = arith.truncf %153 : vector<4x8x8xf32> to vector<4x8x8xbf16>
    %cst_72 = arith.constant dense<0.000000e+00> : vector<4x4x8xf32>
    %227 = tpu.matmul %225, %226, %cst_72 {dimension_numbers = #tpu.dot_dimension_numbers<[2], [1], [1], [2], [0, 0, 0, 1, 1, 2], [0], [0]>} : vector<4x4x8xbf16>, vector<4x8x8xbf16>, vector<4x4x8xf32> -> vector<4x4x8xf32>
    %228 = arith.truncf %224 : vector<4x4x8xf32> to vector<4x4x8xbf16>
    %229 = arith.truncf %154 : vector<4x8x8xf32> to vector<4x8x8xbf16>
    %cst_73 = arith.constant dense<0.000000e+00> : vector<4x4x8xf32>
    %230 = tpu.matmul %228, %229, %cst_73 {dimension_numbers = #tpu.dot_dimension_numbers<[2], [1], [1], [2], [0, 0, 0, 1, 1, 2], [0], [0]>} : vector<4x4x8xbf16>, vector<4x8x8xbf16>, vector<4x4x8xf32> -> vector<4x4x8xf32>
    %231 = arith.addf %227, %230 : vector<4x4x8xf32>
    %232 = vector.extract_strided_slice %231 {offsets = [0, 0, 0], sizes = [2, 4, 8], strides = [1, 1, 1]} : vector<4x4x8xf32> to vector<2x4x8xf32>
    %233 = vector.shape_cast %232 : vector<2x4x8xf32> to vector<8x8xf32>
    %234 = vector.extract_strided_slice %231 {offsets = [2, 0, 0], sizes = [2, 4, 8], strides = [1, 1, 1]} : vector<4x4x8xf32> to vector<2x4x8xf32>
    %235 = vector.shape_cast %234 : vector<2x4x8xf32> to vector<8x8xf32>
    %236 = tpu.concatenate %233, %235 in 1 : vector<8x8xf32>, vector<8x8xf32> -> vector<8x16xf32>
    %237 = tpu.concatenate %69, %236 in 1 : vector<8x16xf32>, vector<8x16xf32> -> vector<8x32xf32>
    %238 = arith.truncf %237 : vector<8x32xf32> to vector<8x32xbf16>
    %c0_74 = arith.constant 0 : index
    %c0_75 = arith.constant 0 : index
    %239 = vector.load %arg4[%c0_74, %c0_75] : memref<32x32xbf16, #tpu.memory_space<vmem>>, vector<32x32xbf16>
    %cst_76 = arith.constant dense<0.000000e+00> : vector<8x32xf32>
    %240 = tpu.matmul %238, %239, %cst_76 {dimension_numbers = #tpu.dot_dimension_numbers<[1], [0], [0], [1], [0, 0, 1, 1], [], []>} : vector<8x32xbf16>, vector<32x32xbf16>, vector<8x32xf32> -> vector<8x32xf32>
    %c0_77 = arith.constant 0 : index
    %c0_78 = arith.constant 0 : index
    %241 = vector.load %arg5[%c0_77, %c0_78] : memref<1x32xf32, #tpu.memory_space<vmem>>, vector<1x32xf32>
    %242 = vector.broadcast %241 : vector<1x32xf32> to vector<8x32xf32>
    %243 = arith.addf %240, %242 : vector<8x32xf32>
    %c0_79 = arith.constant 0 : index
    %c0_80 = arith.constant 0 : index
    %c0_81 = arith.constant 0 : index
    %244 = vector.load %arg12[%c0_79, %c0_80, %c0_81] : memref<1x8x32xf32, #tpu.memory_space<vmem>>, vector<1x8x32xf32>
    %245 = vector.shape_cast %244 : vector<1x8x32xf32> to vector<8x32xf32>
    %246 = vector.shape_cast %243 : vector<8x32xf32> to vector<1x8x32xf32>
    tpu.vector_store %arg12[%c0_79, %c0_80, %c0_81], %246 {strides = array<i32>} : memref<1x8x32xf32, #tpu.memory_space<vmem>>, vector<1x8x32xf32>,
    return
  }
  func.func @transform_0(%arg0: i32) -> (i32, i32, i32) {
    %c0_i32 = arith.constant 0 : i32
    %c0_i32_0 = arith.constant 0 : i32
    %c0_i32_1 = arith.constant 0 : i32
    return %arg0, %c0_i32, %c0_i32_0 : i32, i32, i32
  }
  func.func @transform_1(%arg0: i32) -> (i32, i32) {
    %c0_i32 = arith.constant 0 : i32
    %c0_i32_0 = arith.constant 0 : i32
    %c0_i32_1 = arith.constant 0 : i32
    return %c0_i32, %c0_i32_0 : i32, i32
  }
  func.func @transform_2(%arg0: i32) -> (i32, i32) {
    %c0_i32 = arith.constant 0 : i32
    %c0_i32_0 = arith.constant 0 : i32
    %c0_i32_1 = arith.constant 0 : i32
    return %c0_i32, %c0_i32_0 : i32, i32
  }
  func.func @transform_3(%arg0: i32) -> (i32, i32) {
    %c0_i32 = arith.constant 0 : i32
    %c0_i32_0 = arith.constant 0 : i32
    %c0_i32_1 = arith.constant 0 : i32
    return %c0_i32, %c0_i32_0 : i32, i32
  }
  func.func @transform_4(%arg0: i32) -> (i32, i32) {
    %c0_i32 = arith.constant 0 : i32
    %c0_i32_0 = arith.constant 0 : i32
    %c0_i32_1 = arith.constant 0 : i32
    return %c0_i32, %c0_i32_0 : i32, i32
  }
  func.func @transform_5(%arg0: i32) -> (i32, i32) {
    %c0_i32 = arith.constant 0 : i32
    %c0_i32_0 = arith.constant 0 : i32
    %c0_i32_1 = arith.constant 0 : i32
    return %c0_i32, %c0_i32_0 : i32, i32
  }
  func.func @transform_6(%arg0: i32) -> (i32, i32) {
    %c0_i32 = arith.constant 0 : i32
    %c0_i32_0 = arith.constant 0 : i32
    %c0_i32_1 = arith.constant 0 : i32
    return %c0_i32, %c0_i32_0 : i32, i32
  }
  func.func @transform_7(%arg0: i32) -> (i32, i32) {
    %c0_i32 = arith.constant 0 : i32
    %c0_i32_0 = arith.constant 0 : i32
    %c0_i32_1 = arith.constant 0 : i32
    return %c0_i32, %c0_i32_0 : i32, i32
  }
  func.func @transform_8(%arg0: i32) -> (i32, i32) {
    %c0_i32 = arith.constant 0 : i32
    %c0_i32_0 = arith.constant 0 : i32
    %c0_i32_1 = arith.constant 0 : i32
    return %c0_i32, %c0_i32_0 : i32, i32
  }
  func.func @transform_9(%arg0: i32) -> (i32, i32) {
    %c0_i32 = arith.constant 0 : i32
    %c0_i32_0 = arith.constant 0 : i32
    %c0_i32_1 = arith.constant 0 : i32
    return %c0_i32, %c0_i32_0 : i32, i32
  }
  func.func @transform_10(%arg0: i32) -> (i32, i32) {
    %c0_i32 = arith.constant 0 : i32
    %c0_i32_0 = arith.constant 0 : i32
    %c0_i32_1 = arith.constant 0 : i32
    return %c0_i32, %c0_i32_0 : i32, i32
  }
  func.func @transform_11(%arg0: i32) -> (i32, i32, i32) {
    %c0_i32 = arith.constant 0 : i32
    %c0_i32_0 = arith.constant 0 : i32
    %c0_i32_1 = arith.constant 0 : i32
    return %arg0, %c0_i32, %c0_i32_0 : i32, i32, i32
  }
}

</mosaic_0001>

<bundles_post_ra>
// kernel: mixed_local_attention_forward.1
= control target key start
LH: loop header
LB: loop body
LE: loop exit
PB: predicated region body
PF: predicated region fallthrough
CT: control target
= control target key end

     0   :  { %s5096_s0 = inlined_call_operand.hbm [shape: f32[2,8,32], index: 0, kind: input, shape index: {}]   ;;  %s5097_s1 = inlined_call_operand.hbm [shape: bf16[32,128], index: 1, kind: input, shape index: {}]   ;;  %s5098_s2 = inlined_call_operand.vmem [shape: f32[1,128], index: 2, kind: input, shape index: {}]   ;;  %s5099_s3 = inlined_call_operand.hbm [shape: bf16[32,32], index: 3, kind: input, shape index: {}]   ;;  %s5100_s4 = inlined_call_operand.hbm [shape: f32[1,32], index: 4, kind: input, shape index: {}]   ;;  %s5101_s5 = inlined_call_operand.hbm [shape: f32[8,16], index: 5, kind: input, shape index: {}]   ;;  %s5102_s6 = inlined_call_operand.hbm [shape: f32[8,16], index: 6, kind: input, shape index: {}]   ;;  %s5103_s7 = inlined_call_operand.hbm [shape: f32[8,16], index: 7, kind: input, shape index: {}]   ;;  %s5104_s8 = inlined_call_operand.hbm [shape: f32[8,16], index: 8, kind: input, shape index: {}]   ;;  %s5105_s9 = inlined_call_operand.hbm [shape: f32[16,16], index: 9, kind: input, shape index: {}]   ;;  %s5106_s10 = inlined_call_operand.hbm [shape: f32[16,16], index: 10, kind: input, shape index: {}]   ;;  %s5107_s11 = inlined_call_operand.hbm [shape: f32[2,8,32], index: 11, kind: output, shape index: {}]  }
   0x1   :  { %5116 = sst [smem:[#allocation27_spill]] %s5097_s1 }
   0x2   :  { %5117 = sst [smem:[#allocation28_spill]] %s5099_s3 }
   0x3   :  { %5118 = sst [smem:[#allocation29_spill]] %s5100_s4 }
   0x4   :  { %5119 = sst [smem:[#allocation30_spill]] %s5102_s6 }
   0x5   :  { %5120 = sst [smem:[#allocation31_spill]] %s5107_s11 }
   0x6   :  { %16 = vsyncpa [#allocation3], 0 }
   0x7   :  { %18 = vsyncpa [#allocation3 + $0x1], 0 }
   0x8   :  { %19 = vsyncpa [#allocation6], 0 }
   0x9   :  { %20 = vsyncpa [#allocation9], 0 }
   0xa   :  { %21 = vsyncpa [#allocation12], 0 }
   0xb   :  { %22 = vsyncpa [#allocation15], 0 }
   0xc   :  { %23 = vsyncpa [#allocation18], 0 }
   0xd   :  { %24 = vsyncpa [#allocation4], 0 }
   0xe   :  { %26 = vsyncpa [#allocation4 + $0x1], 0  ;;  %s3759_s17 = smov 0   ;;  %s3761_s18 = smov 0  }
   0xf   :  { %s3763_s19 = smov 0   ;;  %s3765_s20 = smov 0  }
  0x10 LB: > { %s5121_s1 = sld [smem:[#allocation27_spill]]  ;;  %s3783_s24 = sadd.s32 4294967295, %s3670_s20   ;;  %s3670_s20 = sphi %s3765_s20, %s5296_s20   ;;  %s3666_s19 = sphi %s3763_s19, %s5295_s19   ;;  %s3662_s18 = sphi %s3761_s18, %s5294_s18   ;;  %s3658_s17 = sphi %s3759_s17, %s5293_s17  }
  0x11   : > { %p2929_p0 = scmp.ge.s32.totalorder %s3670_s20, 1  ;;  %p53_p1 = scmp.eq.s32.totalorder %s3783_s24, 0 }
  0x12   : > { %p299_p2 = scmp.lt.s32.totalorder %s3670_s20, 3  ;;  %s3672_s26 = smov [#allocation5]  }
  0x13   : > { %s312_s27 = sshll.u32 %s3672_s26, 4  ;;  %s5123_s4 = sld [smem:[#allocation29_spill]]  ;;  %s313_s27 = int_to_ptr.vmem [resolvable:$true] %s312_s27 }
  0x14   : > { %p3788_p3 = pnand %p2929_p0, %p299_p2  ;;  %s5125_s6 = sld [smem:[#allocation30_spill]] }
  0x15   : > { %s3673_s16 = smov [#allocation8]   ;;  %s3674_s22 = smov 64  }
  0x16   : > { %s310_s23 = sshll.u32 %s5121_s1, 4  ;;  %p3062_p4 = pneg %p3788_p3  ;;  %s311_s23 = int_to_ptr.hbm [resolvable:$true] %s310_s23 }
  0x17   : > { %s344_s21 = sshll.u32 %s3673_s16, 4  ;;  %s3675_s26 = smov 4   ;;  %s345_s21 = int_to_ptr.vmem [resolvable:$true] %s344_s21 }
  0x18   : > { %p3800_p6 = pnand %p3062_p4, %p53_p1  ;;  %s390_s1 = sshll.u32 %s5104_s8, 4  ;;  %s391_s1 = int_to_ptr.hbm [resolvable:$true] %s390_s1 }
  0x19   : > { %s342_s30 = sshll.u32 %s5123_s4, 4  ;;  %s3676_s4 = smov [#allocation11]   ;;  %s343_s30 = int_to_ptr.hbm [resolvable:$true] %s342_s30 }
  0x1a   : > { %s366_s15 = sshll.u32 %s5125_s6, 4  ;;  %s368_s11 = sshll.u32 %s3676_s4, 4  ;;  %s367_s15 = int_to_ptr.hbm [resolvable:$true] %s366_s15  ;;  %s369_s11 = int_to_ptr.vmem [resolvable:$true] %s368_s11 }
  0x1b   : > { %3065 = dma.hbm_to_vmem [thread:$0]  (!%p3800_p6), %s311_s23, 256, %s313_s27, [#allocation6], %s3674_s22, %s3674_s22, %s3675_s26  }
  0x1c   : > { %3071 = dma.hbm_to_vmem [thread:$0]  (!%p3800_p6), %s343_s30, 16, %s345_s21, [#allocation9]  }
  0x1d   : > { %3077 = dma.hbm_to_vmem [thread:$0]  (!%p3800_p6), %s367_s15, 128, %s369_s11, [#allocation12]  }
  0x1e   : > { %s3677_s13 = smov [#allocation14]   ;;  %s5126_s3 = sld [smem:[#allocation28_spill]] }
  0x1f   : > { %s392_s14 = sshll.u32 %s3677_s13, 4  ;;  %s354_s21 = sshll.u32 %s5101_s5, 4  ;;  %s393_s14 = int_to_ptr.vmem [resolvable:$true] %s392_s14  ;;  %s355_s21 = int_to_ptr.hbm [resolvable:$true] %s354_s21 }
  0x20   : > { %3083 = dma.hbm_to_vmem [thread:$0]  (!%p3800_p6), %s391_s1, 128, %s393_s14, [#allocation15]  }
  0x21   : > { %s3678_s4 = smov [#allocation7]   ;;  %s3679_s11 = smov [#allocation10]  }
  0x22   : > { %s329_s28 = sshll.u32 %s3678_s4, 4  ;;  %s356_s15 = sshll.u32 %s3679_s11, 4  ;;  %s330_s28 = int_to_ptr.vmem [resolvable:$true] %s329_s28  ;;  %s357_s15 = int_to_ptr.vmem [resolvable:$true] %s356_s15 }
  0x23   : > { %s378_s13 = sshll.u32 %s5103_s7, 4  ;;  %s401_s16 = sshll.u32 %s5105_s9, 4  ;;  %s379_s13 = int_to_ptr.hbm [resolvable:$true] %s378_s13  ;;  %s402_s16 = int_to_ptr.hbm [resolvable:$true] %s401_s16 }
  0x24   : > { %s327_s23 = sshll.u32 %s5126_s3, 4  ;;  %s3680_s27 = smov [#allocation13]   ;;  %s328_s23 = int_to_ptr.hbm [resolvable:$true] %s327_s23 }
  0x25   : > { %3068 = dma.hbm_to_vmem [thread:$0]  (!%p3800_p6), %s328_s23, 256, %s330_s28, [#allocation6], %s3674_s22, %s3674_s22, %s3675_s26  }
  0x26   : > { %3074 = dma.hbm_to_vmem [thread:$0]  (!%p3800_p6), %s355_s21, 128, %s357_s15, [#allocation9]  }
  0x27   : > { %s380_s30 = sshll.u32 %s3680_s27, 4  ;;  %s3681_s22 = smov [#allocation16]   ;;  %s381_s30 = int_to_ptr.vmem [resolvable:$true] %s380_s30 }
  0x28   : > { %3080 = dma.hbm_to_vmem [thread:$0]  (!%p3800_p6), %s379_s13, 128, %s381_s30, [#allocation12]  }
  0x29   : > { %s403_s26 = sshll.u32 %s3681_s22, 4  ;;  %s3682_s23 = smov 128   ;;  %s404_s26 = int_to_ptr.vmem [resolvable:$true] %s403_s26 }
  0x2a   : > { %s3683_s21 = smov 8   ;;  %s415_s11 = sshll.u32 %s5106_s10, 4  ;;  %s416_s11 = int_to_ptr.hbm [resolvable:$true] %s415_s11 }
  0x2b   : > { %3086 = dma.hbm_to_vmem [thread:$0]  (!%p3800_p6), %s402_s16, 256, %s404_s26, [#allocation15], %s3682_s23, %s3682_s23, %s3683_s21  }
  0x2c   : > { %s3684_s15 = smov [#allocation17]   ;;  %s2928_s29 = sadd.s32 4294967294, %s3670_s20  }
  0x2d   : > { %s417_s6 = sshll.u32 %s3684_s15, 4  ;;  %s3845_s13 = sadd.s32 1, %s3670_s20   ;;  %s418_s6 = int_to_ptr.vmem [resolvable:$true] %s417_s6 }
  0x2e   : > { %3089 = dma.hbm_to_vmem [thread:$0]  (!%p3800_p6), %s416_s11, 256, %s418_s6, [#allocation18], %s3682_s23, %s3682_s23, %s3683_s21  }
  0x2f   : > { %s39_s1 = sadd.s32 1, %s3666_s19  ;;  %s36_s14 = ssub.s32 %s3670_s20, %s3845_s13 }
  0x30   : > { %p46_p7 = scmp.ne.s32.totalorder %s3666_s19, %s3662_s18  ;;  %p37_p8 = scmp.eq.s32.totalorder %s36_s14, 0 }
  0x31   : > { %p47_p9 = scmp.eq.s32.totalorder %s3670_s20, 0  ;;  %p52_p10 = scmp.ne.s32.totalorder %s3662_s18, %s3658_s17 }
  0x32   : > { %p286_p11 = scmp.eq.s32.totalorder %s3783_s24, 1  ;;  %p292_p0 = scmp.eq.s32.totalorder %s2928_s29, 1 }
  0x33   : > { %s3857_s16 = scalar_select %p37_p8, %s3666_s19, %s39_s1  }
  0x34   : > { %p3861_p12 = por %p53_p1, %p52_p10  ;;  %p3865_p13 = por %p286_p11, %p46_p7 }
  0x35   : > { %p48_p2 = por %p47_p9, %p46_p7  ;;  %s431_s30 = sand.u32 1, %s3666_s19  }
  0x36   : > { %p3870_p4 = por %p292_p0, %p52_p10  ;;  %p3107_p6 = scmp.lt.s32.totalorder %s3670_s20, 2 }
  0x37   : > { %s2940_s26 = sshll.u32 %s431_s30, 3  ;;  %s2941_s23 = sshll.u32 %s3670_s20, 3 }
  0x38   : > { %s439_s28 = scalar_lea.hbm %s5096_s0, %s2941_s23  ;;  %s435_s15 = scalar_lea.vmem [#allocation2], %s2940_s26 }
  0x39   : > { %s441_s11 = sshll.u32 %s439_s28, 4  ;;  %s443_s6 = sshll.u32 %s435_s15, 4  ;;  %s442_s11 = int_to_ptr.hbm [resolvable:$true] %s441_s11  ;;  %s444_s6 = int_to_ptr.vmem [resolvable:$true] %s443_s6 }
  0x3a   : > { %p3879_p8 = pnand %p3107_p6, %p48_p2  ;;  %s432_s1 = scalar_lea.sflag [#allocation3], %s431_s30 }
  0x3b   : > { %s3554_s14 = sshra.s32 %s442_s11, 4  ;;  %s3561_s26 = scalar_lea.hbm %s5096_s0, 16  ;;  %s3555_s14 = int_to_ptr.hbm [resolvable:$true] %s3554_s14 }
  0x3c   : > { %s3556_s3 = scalar_lea.hbm %s3555_s14, 8  ;;  %p3558_p9 = pneg %p3879_p8 }
  0x3d   : > { %p3557_p7 = scmp.ne.s32.totalorder %s3555_s14, %s3556_s3  ;;  %p3562_p0 = scmp.lt.s32.totalorder %s3555_s14, %s5096_s0 }
  0x3e   : > { %p3563_p2 = scmp.lt.s32.totalorder %s3561_s26, %s3556_s3 }
  0x3f   : > { %p3559_p10 = pnand %p3558_p9, %p3557_p7 }
  0x40   : > { %p3564_p6 = por %p3563_p2, %p3562_p0 }
  0x41   : > { %p3560_p11 = pneg %p3559_p10 }
  0x43   : > { %p3565_p5 = pnand %p3564_p6, %p3560_p11 }
  0x45   : > { %3568 = shalt.err (!%p3565_p5)
}
  0x46   : > { %3093 = dma.hbm_to_vmem [thread:$0]  (!%p3879_p8), %s442_s11, 128, %s444_s6, %s432_s1  }
  0x47   : > { %452 = sbr.rel (%p3788_p3) target bundleno = 2875 (0xb3b), region = 64  ;;  %s3896_s30 = sand.u32 (!%p3788_p3), 1, %s3662_s18  }
  0x48   : > { %s2943_s15 = sshll.u32 (!%p3788_p3), %s3896_s30, 3  ;;  %s455_s23 = scalar_lea.sflag (!%p3788_p3), [#allocation3], %s3896_s30 }
  0x49   : > { %s458_s3 = scalar_lea.vmem (!%p3788_p3), [#allocation2], %s2943_s15 }
  0x4c   : > { %3629 = dma.done.wait (%p3861_p12), %s455_s23, 128  }
  0x4d   : > { %3631 = vsyncadd (%p3861_p12), %s455_s23, 4294967168 }
  0x4e   : > { %3633 = dma.done.wait (%p53_p1), [#allocation6], 512  }
  0x4f   : > { %3635 = vsyncadd (%p53_p1), [#allocation6], 4294966784 }
  0x50   : > { %3637 = dma.done.wait (%p53_p1), [#allocation9], 144  }
  0x51   : > { %3639 = vsyncadd (%p53_p1), [#allocation9], 4294967152 }
  0x52   : > { %3641 = dma.done.wait (%p53_p1), [#allocation12], 256  }
  0x53   : > { %3643 = vsyncadd (%p53_p1), [#allocation12], 4294967040 }
  0x54   : > { %3645 = dma.done.wait (%p53_p1), [#allocation15], 384  }
  0x55   : > { %3647 = vsyncadd (%p53_p1), [#allocation15], 4294966912 }
  0x56   : > { %3649 = dma.done.wait (%p53_p1), [#allocation18], 256  }
  0x57   : > { %3651 = vsyncadd (%p53_p1), [#allocation18], 4294967040  ;;  %v3019_v0 = vld [vmem:[#allocation5 + $0x8] sm:$0xff]  ;;  %v3018_v1 = vld [vmem:[#allocation5] sm:$0xff]  ;;  %vm5109_vm0 = vcmask 261120   ;;  %vm5110_vm1 = vcmask 130048   ;;  %v716_v48 = vlaneseq }
  0x58   : > { %576 = vmatpush.bf16.msra.mxu0 %v3019_v0  ;;  %v544_v2 = vld [vmem:[%s458_s3] sm:$0xff]  ;;  %v585_v5 = vld [vmem:[#allocation16] sm:$0xff]  ;;  %s3685_s11 = smov 112   ;;  %s3686_s6 = smov 16   ;;  %vm5114_vm2 = vcmask 1043456   ;;  %vm5115_vm3 = vcmask 64512  }
  0x59   : > { %v545_v3 = vpack.c.bf16 %v544_v2, %v544_v2  ;;  %v586_v4 = vld [vmem:[#allocation16 + $0x8] sm:$0xff]  ;;  %v3210_v6 = vld [vmem:[%s5098_s2] ss:$0 sm:$0xff]  ;;  %s3687_s29 = smov 120   ;;  %s3688_s1 = smov 64   ;;  %v3947_v21 = vld [vmem:[#allocation13] sm:$0xff] }
  0x5a   : > { %605 = vmatpush.msra.mxu1 %v586_v4  ;;  %632 = vmatpush.msra.mxu2 %v586_v4  ;;  %v583_v10 = vld [vmem:[#allocation10] sm:$0xff]  ;;  %v584_v12 = vld [vmem:[#allocation11] sm:$0xff]  ;;  %s3689_s14 = smov 96   ;;  %s3690_s21 = smov 48   ;;  %v832_v42 = vld [vmem:[#allocation17 + $0x8] sm:$0xff]  ;;  %v3965_v49 = vshrl.u32 %v716_v48, 7 }
  0x5b   : > { %s3691_s26 = smov 80   ;;  %v831_v43 = vld [vmem:[#allocation17] sm:$0xff]  ;;  %v3970_v50 = vand.u32 127, %v716_v48  ;;  %v3979_v58 = vld [vmem:[#allocation14] sm:$0xff]  ;;  %s3692_s4 = smov 72   ;;  %vm5112_vm9 = vcmask 1042434  }
  0x5c   : > { %577 = vmatpush.bf16.msra.mxu0 %v3018_v1  ;;  %606 = vmatpush.msra.mxu1 %v585_v5  ;;  %s3693_s28 = smov 56   ;;  %vm5111_vm10 = vcmask 1043459   ;;  %vm5113_vm11 = vcmask 1041409   ;;  %vm1104_vm12 = vcmask 1040384   ;;  %vm1402_vm13 = vcmask 1041408   ;;  %s3694_s23 = smov 4  }
  0x5d   : > { %633 = vmatpush.msra.mxu2 %v585_v5  ;;  %3187 = vset.pattern.permute.xlu0 %v3965_v49  ;;  %vm720_vm4 = vcmp.ge.s32.totalorder %v3965_v49, %v3970_v50  ;;  %s3695_s3 = smov 8   ;;  %s3697_s25 = smov 32  }
  0x5e   : > { %3188 = vset.pattern.permute.xlu2 %v3965_v49  ;;  %3189 = vset.pattern.permute.xlu1 %v3965_v49  ;;  %s3698_s12 = smov 24  }
  0x5f   : > { %2962 = vmatmul.msk.bf16.vlgmr.msra.gmra.mxu0 %vm5109_vm0, %v545_v3 }
  0xdc   : > { %v579_v7 = vpop.f32.mrf.mxu0 }
  0xdd   : > { %v3930_v8 = vadd.f32 %v3210_v6, %v579_v7 }
  0xdf   : > { %614 = vrot.lane.b32.xlu0 %v3930_v8, %s3685_s11  ;;  %2963 = vmatmul.msk.f32.vlgmr.msra.gmra.mxu1 %vm5110_vm1, %v3930_v8  ;;  %v611_v14 = vmul.f32 %v583_v10, %v3930_v8  ;;  %v665_v18 = vpack.c.bf16 %v3930_v8, %v3930_v8 }
  0xe1   : > { %v776_v19 = vunpack.c.l.b16 %v665_v18 }
  0xe3   : > { %v777_v20 = vpack.c.b16 %v776_v19, %v776_v19 }
  0xe4   : > { %v581_v9 = vpop.f32.mrf.mxu0 }
  0xe7   : > { %639 = vrot.lane.b32.xlu0 %v583_v10, %s3686_s6 }
 0x151   : > { %v615_v11 = vpop.permute.xlu0 %614 }
 0x152   : > { %2964 = vmatmul.msk.f32.vlgmr.msra.gmra.mxu2 %vm5110_vm1, %v615_v11 }
 0x159   : > { %v640_v22 = vpop.permute.xlu0 %639 }
 0x15a   : > { %v642_v29 = vmul.f32 %v640_v22, %v3930_v8 }
 0x15c   : > { %v608_v13 = vpop.f32.mrf.mxu1 }
 0x15d   : > { %v612_v15 = vmul.f32 %v608_v13, %v584_v12 }
 0x15f   : > { %v613_v16 = vadd.f32 %v612_v15, %v611_v14 }
 0x161   : > { %v649_v17 = vmul.f32 0.35355338, %v613_v16 }
 0x163   : > { %651 = vrot.lane.b32.xlu0 %v649_v17, %s3687_s29  ;;  %v654_v41 = vpack.c.bf16 %v649_v17, %v649_v17 }
 0x16b   : > { %868 = vrot.lane.b32.xlu0 %v3930_v8, %s3688_s1 }
 0x173   : > { %778 = vrot.lane.b32.xlu0 %v777_v20, %s3689_s14  ;;  %v981_v20 = vrot.slane %v3930_v8, 4 }
 0x17b   : > { %902 = vrot.lane.b32.xlu0 %v3930_v8, %s3690_s21 }
 0x183   : > { %858 = vrot.lane.b32.xlu0 %v3947_v21, %s3690_s21 }
 0x1d5   : > { %v635_v23 = vpop.f32.mrf.mxu2  ;;  %v652_v24 = vpop.permute.xlu0 %651 }
 0x1d6   : > { %v643_v25 = vmul.f32 %v635_v23, %v584_v12  ;;  %v655_v46 = vpack.c.bf16 %v652_v24, %v652_v24 }
 0x1d8   : > { %645 = vrot.lane.b32.xlu1 %v643_v25, %s3686_s6 }
 0x1dd   : > { %v869_v26 = vpop.permute.xlu0 %868 }
 0x1e5   : > { %v779_v27 = vpop.permute.xlu0 %778 }
 0x1e6   : > { %v785_v28 = vsel %vm5114_vm2, %v779_v27, 0 }
 0x1e7   : > { %794 = vmatpush.bf16.msrb.mxu2 %v785_v28 }
 0x1eb   : > { %920 = vmatpush.msra.mxu2 %v832_v42 }
 0x1ed   : > { %921 = vmatpush.msra.mxu2 %v831_v43  ;;  %v3991_v4 = vpop.permute.xlu0 %902 }
 0x1f5   : > { %v859_v5 = vpop.permute.xlu0 %858 }
 0x1f6   : > { %v861_v6 = vmul.f32 %v859_v5, %v3930_v8 }
 0x24a   : > { %v646_v30 = vpop.permute.xlu1 %645 }
 0x24b   : > { %v648_v31 = vadd.f32 %v646_v30, %v642_v29 }
 0x24d   : > { %v660_v32 = vpack.c.bf16 %v648_v31, %v648_v31  ;;  %657 = vrot.lane.b32.xlu2 %v648_v31, %s3687_s29 }
 0x24f   : > { %v668_v33 = vunpack.c.l.b16 %v660_v32 }
 0x251   : > { %v669_v34 = vpack.c.b16 %v668_v33, %v668_v33 }
 0x253   : > { %670 = vrot.lane.b32.xlu1 %v669_v34, %s3685_s11 }
 0x25b   : > { %833 = vrot.lane.b32.xlu1 %v3930_v8, %s3691_s26 }
 0x2a7   : > { %v658_v35 = vpop.permute.xlu2 %657 }
 0x2a8   : > { %v661_v36 = vpack.c.bf16 %v658_v35, %v658_v35 }
 0x2aa   : > { %v693_v37 = vunpack.c.l.b16 %v661_v36 }
 0x2ac   : > { %v694_v38 = vpack.c.b16 %v693_v37, %v693_v37 }
 0x2ae   : > { %695 = vrot.lane.b32.xlu2 %v694_v38, %s3685_s11  ;;  %s3015_s11 = sshll.u32 %s3783_s24, 3 }
 0x2c5   : > { %v671_v39 = vpop.permute.xlu1 %670 }
 0x2c6   : > { %v677_v40 = vsel %vm5115_vm3, %v671_v39, 0 }
 0x2c7   : > { %686 = vmatpush.bf16.xpose.msra.mxu3 %v677_v40 }
 0x2cd   : > { %v834_v47 = vpop.permute.xlu1 %833 }
 0x2ce   : > { %2965 = vmatmul.msk.bf16.vlgmr.msra.gmra.mxu3 %vm5115_vm3, %v654_v41 }
 0x308   : > { %v696_v44 = vpop.permute.xlu2 %695 }
 0x309   : > { %v701_v45 = vsel %vm5115_vm3, %v696_v44, 0 }
 0x30a   : > { %710 = vmatpush.bf16.xpose.msrb.mxu1 %v701_v45 }
 0x311   : > { %2966 = vmatmul.msk.bf16.vlgmr.msrb.gmra.mxu1 %vm5115_vm3, %v655_v46 }
 0x312   : > { %851 = vmatpush.msra.mxu1 %v832_v42 }
 0x314   : > { %852 = vmatpush.msra.mxu1 %v831_v43 }
 0x316   : > { %886 = vmatpush.msrb.mxu1 %v832_v42 }
 0x318   : > { %887 = vmatpush.msrb.mxu1 %v831_v43 }
 0x321   : > { %2969 = vmatmul.msk.f32.vlgmr.msra.gmra.mxu1 %vm5110_vm1, %v834_v47 }
 0x329   : > { %2970 = vmatmul.msk.f32.vlgmr.msrb.gmra.mxu1 %vm5110_vm1, %v869_v26 }
 0x351   : > { %v688_v51 = vpop.f32.mrf.mxu3 }
 0x352   : > { %v723_v52 = vsel %vm720_vm4, %v688_v51, -1e+30 }
 0x353   : > { %v725_v53 = vsel %vm5115_vm3, %v723_v52, -inf }
 0x354   : > { %726 = vmax.xlane.f32.xlu2 %v725_v53 }
 0x359   : > { %v690_v54 = vpop.f32.mrf.mxu3 }
 0x36c   : > { %892 = vrot.lane.b32.xlu2 %v3947_v21, %s3688_s1 }
 0x38e   : > { %v712_v55 = vpop.f32.mrf.mxu1 }
 0x38f   : > { %v3977_v56 = vsel %vm720_vm4, %v712_v55, -1e+30 }
 0x390   : > { %v728_v11 = vsel %vm5115_vm3, %v3977_v56, -inf }
 0x396   : > { %v714_v57 = vpop.f32.mrf.mxu1 }
 0x39e   : > { %v854_v59 = vpop.f32.mrf.mxu1 }
 0x39f   : > { %v862_v60 = vmul.f32 %v854_v59, %v3979_v58 }
 0x3a1   : > { %864 = vrot.lane.b32.xlu0 %v862_v60, %s3690_s21 }
 0x3a6   : > { %v889_v61 = vpop.f32.mrf.mxu1 }
 0x3a7   : > { %v896_v62 = vmul.f32 %v889_v61, %v3979_v58 }
 0x3a9   : > { %898 = vrot.lane.b32.xlu0 %v896_v62, %s3688_s1 }
 0x3c7   : > { %v727_v63 = vpop.xlane.xlu2 %726 }
 0x3c8   : > { %v731_v0 = vsub.f32 %v723_v52, %v727_v63 }
 0x3ca   : > { %v733_v1 = vmul.f32 1.442695, %v731_v0 }
 0x3cc   : > { %3212 = vpow2.f32 %v733_v1 }
 0x3cf   : > { %v893_v12 = vpop.permute.xlu2 %892 }
 0x3d0   : > { %v895_v13 = vmul.f32 %v893_v12, %v3930_v8 }
 0x3d2   : > { %v3985_v2 = vpop.eup %3212 }
 0x3d3   : > { %v737_v3 = vsel %vm5115_vm3, %v3985_v2, 0.0 }
 0x3d4   : > { %738 = vadd.xlane.f32.xlu1 %v737_v3 }
 0x3ed   : > { %926 = vrot.lane.b32.xlu1 %v3947_v21, %s3691_s26 }
 0x413   : > { %v865_v7 = vpop.permute.xlu0 %864 }
 0x414   : > { %v3994_v9 = vadd.f32 %v865_v7, %v861_v6 }
 0x416   : > { %v940_v10 = vrot.slane %v3994_v9, 4  ;;  %941 = vst [vmem:[#allocation1] ss:$2 sm:$0xff] %v3994_v9 }
 0x417   : > { %729 = vmax.xlane.f32.xlu1 %v728_v11 }
 0x418   : > { %950 = vst [vmem:[#allocation1 + $0x11] ss:$2 sm:$0xff] %v940_v10 }
 0x41b   : > { %v899_v14 = vpop.permute.xlu0 %898 }
 0x41c   : > { %v4001_v15 = vadd.f32 %v899_v14, %v895_v13 }
 0x41d   : > { %v4003_v16 = vld.sshfl [vmem:[#allocation1] sm:$0xff pattern:$0x75316420] }
 0x41e   : > { %947 = vst [vmem:[#allocation1 + $0x1] ss:$2 sm:$0xff] %v3994_v9  ;;  %v961_v17 = vrot.slane %v4001_v15, 4 }
 0x41f   : > { %v951_v18 = vld.sshfl [vmem:[#allocation1 + $0x10] sm:$0xff pattern:$0x75316420] }
 0x420   : > { %971 = vst [vmem:[#allocation1 + $0x11] ss:$2 sm:$0xff] %v961_v17 }
 0x425   : > { %v4007_v19 = vld.sshfl [vmem:[#allocation1] sm:$0xff pattern:$0x75316420] }
 0x426   : > { %962 = vst [vmem:[#allocation1] ss:$2 sm:$0xff] %v4001_v15 }
 0x427   : > { %v972_v21 = vld.sshfl [vmem:[#allocation1 + $0x10] sm:$0xff pattern:$0x75316420] }
 0x428   : > { %991 = vst [vmem:[#allocation1 + $0x11] ss:$2 sm:$0xff] %v981_v20 }
 0x42d   : > { %v963_v22 = vld.sshfl [vmem:[#allocation1] sm:$0xff pattern:$0x75316420] }
 0x42e   : > { %968 = vst [vmem:[#allocation1 + $0x1] ss:$2 sm:$0xff] %v4001_v15  ;;  %v3177_v26 = vpack.i.bf16 %v972_v21, %v963_v22 }
 0x42f   : > { %v4012_v23 = vld.sshfl [vmem:[#allocation1 + $0x10] sm:$0xff pattern:$0x75316420] }
 0x430   : > { %1010 = vst [vmem:[#allocation1 + $0x11] ss:$2 sm:$0xff] %v981_v20 }
 0x435   : > { %v969_v24 = vld.sshfl [vmem:[#allocation1] sm:$0xff pattern:$0x75316420] }
 0x436   : > { %982 = vst [vmem:[#allocation1] ss:$2 sm:$0xff] %v3930_v8  ;;  %973 = vrot.lane.b32.xlu1 %v969_v24, %s3688_s1 }
 0x437   : > { %v4016_v25 = vld.sshfl [vmem:[#allocation1 + $0x10] sm:$0xff pattern:$0x75316420] }
 0x438   : > { %1029 = vst [vmem:[#allocation1 + $0x11] ss:$2 sm:$0xff] %v940_v10 }
 0x43d   : > { %v4018_v27 = vld.sshfl [vmem:[#allocation1] sm:$0xff pattern:$0x75316420] }
 0x43e   : > { %988 = vst [vmem:[#allocation1 + $0x1] ss:$2 sm:$0xff] %v3930_v8  ;;  %3178 = vrot.lane.b32.xlu1 %v3177_v26, %s3688_s1 }
 0x43f   : > { %v1030_v28 = vld.sshfl [vmem:[#allocation1 + $0x10] sm:$0xff pattern:$0x75316420] }
 0x440   : > { %1048 = vst [vmem:[#allocation1 + $0x11] ss:$2 sm:$0xff] %v961_v17 }
 0x445   : > { %v4022_v29 = vld.sshfl [vmem:[#allocation1] sm:$0xff pattern:$0x75316420] }
 0x446   : > { %1001 = vst [vmem:[#allocation1] ss:$2 sm:$0xff] %v3930_v8 }
 0x447   : > { %v739_v30 = vpop.xlane.xlu1 %738  ;;  %v1049_v31 = vld.sshfl [vmem:[#allocation1 + $0x10] sm:$0xff pattern:$0x75316420] }
 0x448   : > { %3214 = vrcp.f32 %v739_v30  ;;  %1067 = vst [vmem:[#allocation1 + $0x11] ss:$2 sm:$0xff] %v981_v20  ;;  %v754_v37 = vand.u32 2147483648, %v739_v30  ;;  %v752_v39 = vand.u32 2147483647, %v739_v30  ;;  %vm748_vm6 = vweird.f32 %v739_v30 }
 0x44a   : > { %v755_v42 = vor.u32 1.1754944e-38, %v754_v37  ;;  %vm753_vm8 = vcmp.eq.f32.partialorder %v752_v39, 8.507059e+37 }
 0x44d   : > { %v4025_v32 = vld.sshfl [vmem:[#allocation1] sm:$0xff pattern:$0x75316420] }
 0x44e   : > { %v3215_v33 = vpop.eup %3214  ;;  %1007 = vst [vmem:[#allocation1 + $0x1] ss:$2 sm:$0xff] %v3930_v8 }
 0x44f   : > { %v744_v34 = vmul.f32 %v3215_v33, %v739_v30  ;;  %v4028_v35 = vld.sshfl [vmem:[#allocation1 + $0x10] sm:$0xff pattern:$0x75316420]  ;;  %vm749_vm5 = vweird.f32 %v3215_v33 }
 0x450   : > { %1086 = vst [vmem:[#allocation1 + $0x11] ss:$2 sm:$0xff] %v981_v20  ;;  %vm750_vm7 = vmor %vm748_vm6, %vm749_vm5 }
 0x451   : > { %v745_v36 = vsub.f32 1.0, %v744_v34 }
 0x453   : > { %v746_v38 = vmul.f32 %v3215_v33, %v745_v36 }
 0x455   : > { %v4030_v40 = vld.sshfl [vmem:[#allocation1] sm:$0xff pattern:$0x75316420]  ;;  %v747_v41 = vadd.f32 %v3215_v33, %v746_v38 }
 0x456   : > { %1020 = vst [vmem:[#allocation1] ss:$2 sm:$0xff] %v3994_v9 }
 0x457   : > { %v751_v43 = vsel %vm750_vm7, %v3215_v33, %v747_v41  ;;  %vm1399_vm7 = vcmask 31744  }
 0x458   : > { %v756_v44 = vsel %vm753_vm8, %v755_v42, %v751_v43 }
 0x459   : > { %v757_v45 = vmul.f32 %v3985_v2, %v756_v44 }
 0x45b   : > { %v773_v46 = vpack.c.bf16 %v757_v45, %v757_v45 }
 0x45d   : > { %2967 = vmatmul.msk.bf16.vlgmr.msrb.gmra.mxu2 %vm5115_vm3, %v773_v46  ;;  %v1021_v47 = vld.sshfl [vmem:[#allocation1] sm:$0xff pattern:$0x75316420] }
 0x45e   : > { %1026 = vst [vmem:[#allocation1 + $0x1] ss:$2 sm:$0xff] %v3994_v9 }
 0x45f   : > { %v927_v59 = vpop.permute.xlu1 %926 }
 0x460   : > { %v929_v14 = vmul.f32 %v927_v59, %v3930_v8 }
 0x465   : > { %v1027_v48 = vld.sshfl [vmem:[#allocation1] sm:$0xff pattern:$0x75316420] }
 0x466   : > { %1031 = vrot.lane.b32.xlu2 %v1027_v48, %s3692_s4  ;;  %1039 = vst [vmem:[#allocation1] ss:$2 sm:$0xff] %v4001_v15 }
 0x46d   : > { %2971 = vmatmul.msk.f32.vlgmr.msra.gmra.mxu2 %vm5110_vm1, %v3991_v4  ;;  %v1040_v51 = vld.sshfl [vmem:[#allocation1] sm:$0xff pattern:$0x75316420] }
 0x46e   : > { %954 = vrot.lane.b32.xlu2 %v951_v18, %s3691_s26  ;;  %v3182_v52 = vpack.i.bf16 %v1049_v31, %v1040_v51  ;;  %1045 = vst [vmem:[#allocation1 + $0x1] ss:$2 sm:$0xff] %v4001_v15 }
 0x470   : > { %3183 = vrot.lane.b32.xlu1 %v3182_v52, %s3693_s28 }
 0x475   : > { %v1046_v53 = vld.sshfl [vmem:[#allocation1] sm:$0xff pattern:$0x75316420] }
 0x476   : > { %1033 = vrot.lane.b32.xlu2 %v1030_v28, %s3692_s4  ;;  %1058 = vst [vmem:[#allocation1] ss:$2 sm:$0xff] %v3930_v8 }
 0x47d   : > { %v4045_v54 = vld.sshfl [vmem:[#allocation1] sm:$0xff pattern:$0x75316420] }
 0x47e   : > { %1064 = vst [vmem:[#allocation1 + $0x1] ss:$2 sm:$0xff] %v3930_v8 }
 0x485   : > { %v4048_v55 = vld.sshfl [vmem:[#allocation1] sm:$0xff pattern:$0x75316420] }
 0x486   : > { %1077 = vst [vmem:[#allocation1] ss:$2 sm:$0xff] %v3930_v8 }
 0x48a   : > { %v730_v60 = vpop.xlane.xlu1 %729 }
 0x48b   : > { %v732_v30 = vsub.f32 %v3977_v56, %v730_v60 }
 0x48d   : > { %v4051_v57 = vld.sshfl [vmem:[#allocation1] sm:$0xff pattern:$0x75316420]  ;;  %v735_v31 = vmul.f32 1.442695, %v732_v30 }
 0x48e   : > { %1083 = vst [vmem:[#allocation1 + $0x1] ss:$2 sm:$0xff] %v3930_v8 }
 0x48f   : > { %3216 = vpow2.f32 %v735_v31 }
 0x495   : > { %v4085_v33 = vpop.eup %3216 }
 0x4a8   : > { %v974_v61 = vpop.permute.xlu1 %973 }
 0x4a9   : > { %v979_v62 = vsel %vm5114_vm2, 0.0, %v974_v61 }
 0x4aa   : > { %v1216_v63 = vpack.c.bf16 %v979_v62, %v979_v62 }
 0x4ac   : > { %v1241_v0 = vsel %vm5115_vm3, %v1216_v63, 0 }
 0x4ad   : > { %1250 = vmatpush.bf16.xpose.msrb.mxu3 %v1241_v0 }
 0x4b0   : > { %v3179_v1 = vpop.permute.xlu1 %3178 }
 0x4b1   : > { %v3181_v2 = vunpack.i.h.bf16 %v3179_v1  ;;  %v3180_v3 = vunpack.i.l.bf16 %v3179_v1 }
 0x4b3   : > { %v980_v4 = vsel %vm5114_vm2, %v3180_v3, %v3181_v2 }
 0x4b4   : > { %v1217_v5 = vpack.c.bf16 %v980_v4, %v980_v4 }
 0x4b6   : > { %v1283_v6 = vsel %vm5115_vm3, %v1217_v5, 0 }
 0x4b7   : > { %1292 = vmatpush.bf16.xpose.msra.mxu1 %v1283_v6 }
 0x4c0   : > { %v1032_v7 = vpop.permute.xlu2 %1031 }
 0x4c1   : > { %v1037_v9 = vsel %vm5114_vm2, 0.0, %v1032_v7 }
 0x4c2   : > { %1176 = vrot.lane.b32.xlu2 %v1037_v9, %s3691_s26 }
 0x4e0   : > { %v4060_v10 = vpop.f32.mrf.mxu2 }
 0x4e8   : > { %v798_v11 = vpop.f32.mrf.mxu2 }
 0x4f0   : > { %v923_v12 = vpop.f32.mrf.mxu2 }
 0x4f1   : > { %v930_v13 = vmul.f32 %v923_v12, %v3979_v58 }
 0x4f3   : > { %932 = vrot.lane.b32.xlu0 %v930_v13, %s3691_s26 }
 0x4fb   : > { %952 = vrot.lane.b32.xlu0 %v4007_v19, %s3691_s26  ;;  %v955_v19 = vpop.permute.xlu2 %954 }
 0x503   : > { %943 = vrot.lane.b32.xlu0 %v4003_v16, %s3691_s26  ;;  %v1034_v26 = vpop.permute.xlu2 %1033 }
 0x50b   : > { %1022 = vrot.lane.b32.xlu0 %v1021_v47, %s3692_s4 }
 0x51c   : > { %v4089_v36 = vpop.permute.xlu2 %1176 }
 0x565   : > { %v933_v15 = vpop.permute.xlu0 %932 }
 0x566   : > { %v935_v17 = vadd.f32 %v933_v15, %v929_v14 }
 0x568   : > { %v936_v18 = vmul.f32 0.125, %v935_v17 }
 0x56a   : > { %1096 = vrot.lane.b32.xlu2 %v936_v18, %s3687_s29  ;;  %v4073_v21 = vrot.slane %v936_v18, 4  ;;  %v1100_v34 = vrot.slane %v936_v18, 3 }
 0x56c   : > { %v1110_v37 = vsel %vm5112_vm9, %v936_v18, %v1100_v34  ;;  %v1113_v38 = vsel %vm5111_vm10, %v936_v18, %v1100_v34  ;;  %v1107_v44 = vsel %vm5113_vm11, %v936_v18, %v1100_v34  ;;  %v1105_v59 = vsel %vm1104_vm12, %v936_v18, %v1100_v34 }
 0x56d   : > { %v953_v20 = vpop.permute.xlu0 %952  ;;  %v1111_v56 = vrot.slane %v1110_v37, 2  ;;  %v1114_v39 = vrot.slane %v1113_v38, 3  ;;  %v1108_v51 = vrot.slane %v1107_v44, 1  ;;  %v1136_v63 = vperm.slane %v1105_v59, 0 }
 0x56e   : > { %v958_v58 = vsel %vm5114_vm2, 0.0, %v953_v20  ;;  %v1101_v13 = vrot.slane %v4073_v21, 3 }
 0x56f   : > { %1172 = vrot.lane.b32.xlu0 %v958_v58, %s3691_s26  ;;  %v1138_v42 = vperm.slane %v1111_v56, 0  ;;  %v1139_v43 = vperm.slane %v1114_v39, 0  ;;  %v1137_v0 = vperm.slane %v1108_v51, 0  ;;  %v1388_v51 = vmul.u32 4, %v3965_v49 }
 0x570   : > { %v1116_v58 = vsel %vm5113_vm11, %v4073_v21, %v1101_v13  ;;  %v1115_v34 = vsel %vm1104_vm12, %v4073_v21, %v1101_v13 }
 0x571   : > { %v1117_v37 = vrot.slane %v1116_v58, 1 }
 0x572   : > { %1098 = vrot.lane.b32.xlu2 %v4073_v21, %s3687_s29 }
 0x575   : > { %v944_v16 = vpop.permute.xlu0 %943 }
 0x576   : > { %v959_v22 = vsel %vm5114_vm2, %v944_v16, %v955_v19 }
 0x577   : > { %662 = vrot.lane.b32.xlu0 %v3930_v8, %s3687_s29  ;;  %v740_v8 = vsel %vm5115_vm3, %v4085_v33, 0.0 }
 0x57d   : > { %v1023_v24 = vpop.permute.xlu0 %1022 }
 0x57e   : > { %v1038_v28 = vsel %vm5114_vm2, %v1023_v24, %v1034_v26  ;;  %v1118_v24 = vsel %vm5112_vm9, %v4073_v21, %v1101_v13  ;;  %v1120_v26 = vsel %vm5111_vm10, %v4073_v21, %v1101_v13 }
 0x57f   : > { %1174 = vrot.lane.b32.xlu0 %v959_v22, %s3691_s26  ;;  %v1119_v56 = vrot.slane %v1118_v24, 2  ;;  %v1121_v39 = vrot.slane %v1120_v26, 3 }
 0x587   : > { %1178 = vrot.lane.b32.xlu0 %v1038_v28, %s3691_s26 }
 0x58f   : > { %1050 = vrot.lane.b32.xlu0 %v1046_v53, %s3693_s28  ;;  %s2757_s28 = scalar_lea.sflag [#allocation4], %s3896_s30 }
 0x59b   : > { %741 = vadd.xlane.f32.xlu2 %v740_v8 }
 0x5c4   : > { %v1097_v41 = vpop.permute.xlu2 %1096 }
 0x5c5   : > { %v1102_v46 = vrot.slane %v1097_v41, 3 }
 0x5c7   : > { %v1123_v60 = vsel %vm5113_vm11, %v1097_v41, %v1102_v46  ;;  %v1122_v9 = vsel %vm1104_vm12, %v1097_v41, %v1102_v46  ;;  %v1125_v8 = vsel %vm5112_vm9, %v1097_v41, %v1102_v46  ;;  %v1127_v44 = vsel %vm5111_vm10, %v1097_v41, %v1102_v46 }
 0x5c8   : > { %v1124_v2 = vrot.slane %v1123_v60, 1  ;;  %v1144_v20 = vperm.slane %v1122_v9, 0  ;;  %v1128_v60 = vrot.slane %v1127_v44, 3 }
 0x5ca   : > { %v1145_v14 = vperm.slane %v1124_v2, 0  ;;  %v1192_v31 = vmul.f32 %v4089_v36, %v1144_v20 }
 0x5cc   : > { %v4096_v4 = vpop.permute.xlu2 %1098  ;;  %v1193_v22 = vmul.f32 %v4089_v36, %v1145_v14 }
 0x5cd   : > { %v4101_v12 = vrot.slane %v4096_v4, 3 }
 0x5cf   : > { %v1130_v19 = vsel %vm5113_vm11, %v4096_v4, %v4101_v12 }
 0x5d0   : > { %v1131_v38 = vrot.slane %v1130_v19, 1 }
 0x5d2   : > { %v1149_v59 = vperm.slane %v1131_v38, 0 }
 0x5e1   : > { %v1173_v45 = vpop.permute.xlu0 %1172 }
 0x5e2   : > { %v1186_v47 = vmul.f32 %v1173_v45, %v1138_v42  ;;  %v1187_v48 = vmul.f32 %v1173_v45, %v1139_v43  ;;  %v1184_v5 = vmul.f32 %v1173_v45, %v1136_v63  ;;  %v1185_v6 = vmul.f32 %v1173_v45, %v1137_v0 }
 0x5e3   : > { %v1129_v42 = vsel %vm1104_vm12, %v4096_v4, %v4101_v12  ;;  %v1209_v43 = vpack.c.bf16 %v1193_v22, %v1193_v22 }
 0x5e4   : > { %v1202_v52 = vpack.c.bf16 %v1186_v47, %v1186_v47  ;;  %v1203_v53 = vpack.c.bf16 %v1187_v48, %v1187_v48  ;;  %v1200_v15 = vpack.c.bf16 %v1184_v5, %v1184_v5  ;;  %v1201_v17 = vpack.c.bf16 %v1185_v6, %v1185_v6 }
 0x5e5   : > { %v1126_v47 = vrot.slane %v1125_v8, 2  ;;  %v1208_v48 = vpack.c.bf16 %v1192_v31, %v1192_v31  ;;  %v1148_v21 = vperm.slane %v1129_v42, 0  ;;  %v1309_v0 = vunpack.c.l.b16 %v1209_v43 }
 0x5e6   : > { %v1226_v61 = vunpack.c.l.b16 %v1202_v52  ;;  %v1227_v62 = vunpack.c.l.b16 %v1203_v53  ;;  %v1224_v28 = vunpack.c.l.b16 %v1200_v15  ;;  %v1225_v30 = vunpack.c.l.b16 %v1201_v17 }
 0x5e7   : > { %v1140_v52 = vperm.slane %v1115_v34, 0  ;;  %v1141_v53 = vperm.slane %v1117_v37, 0  ;;  %v1308_v46 = vunpack.c.l.b16 %v1208_v48  ;;  %v1146_v5 = vperm.slane %v1126_v47, 0 }
 0x5e8   : > { %v1229_v1 = vpack.c.b16 %v1227_v62, %v1226_v61  ;;  %v1228_v45 = vpack.c.b16 %v1225_v30, %v1224_v28  ;;  %v1142_v61 = vperm.slane %v1119_v56, 0  ;;  %v1143_v62 = vperm.slane %v1121_v39, 0 }
 0x5e9   : > { %v663_v3 = vpop.permute.xlu0 %662  ;;  %v1389_v6 = vadd.s32 %v1388_v51, %v3970_v50  ;;  %v1312_v14 = vpack.c.b16 %v1309_v0, %v1308_v46  ;;  %v1147_v15 = vperm.slane %v1128_v60, 0  ;;  %v1134_v31 = vsel %vm5111_vm10, %v4096_v4, %v4101_v12 }
 0x5ea   : > { %v666_v7 = vpack.c.bf16 %v663_v3, %v663_v3  ;;  %1232 = vrot.lane.b32.xlu2 %v1229_v1, %s3690_s21  ;;  %v1194_v34 = vmul.f32 %v4089_v36, %v1146_v5  ;;  %v1135_v44 = vrot.slane %v1134_v31, 3 }
 0x5eb   : > { %v1401_v17 = vrot.slane %v1389_v6, 6  ;;  %v1195_v39 = vmul.f32 %v4089_v36, %v1147_v15  ;;  %v3184_v15 = vpop.permute.xlu1 %3183 }
 0x5ec   : > { %v801_v11 = vunpack.c.l.b16 %v666_v7 }
 0x5ed   : > { %v1403_v22 = vsel %vm1402_vm13, %v1389_v6, %v1401_v17  ;;  %v1211_v51 = vpack.c.bf16 %v1195_v39, %v1195_v39 }
 0x5ee   : > { %v802_v18 = vpack.c.b16 %v801_v11, %v801_v11  ;;  %v1413_v30 = vperm.slane %v1403_v22, 1  ;;  %v1406_v5 = vperm.slane %v1403_v22, 0 }
 0x5f0   : > { %803 = vrot.lane.b32.xlu0 %v802_v18, %s3689_s14  ;;  %s5290_s14 = sld [smem:[#allocation31_spill]] }
 0x5f1   : > { %v1175_v16 = vpop.permute.xlu0 %1174 }
 0x5f2   : > { %v1188_v1 = vmul.f32 %v1175_v16, %v1140_v52  ;;  %v1189_v2 = vmul.f32 %v1175_v16, %v1141_v53  ;;  %v1190_v7 = vmul.f32 %v1175_v16, %v1142_v61  ;;  %v1191_v9 = vmul.f32 %v1175_v16, %v1143_v62  ;;  %1418 = vperm.xlu2 %3188, %v1413_v30  }
 0x5f3   : > { %v1132_v16 = vsel %vm5112_vm9, %v4096_v4, %v4101_v12  ;;  %v1210_v12 = vpack.c.bf16 %v1194_v34, %v1194_v34  ;;  %v1151_v53 = vperm.slane %v1135_v44, 0  ;;  %v1311_v62 = vunpack.c.l.b16 %v1211_v51 }
 0x5f4   : > { %v1204_v18 = vpack.c.bf16 %v1188_v1, %v1188_v1  ;;  %v1205_v20 = vpack.c.bf16 %v1189_v2, %v1189_v2  ;;  %v1206_v24 = vpack.c.bf16 %v1190_v7, %v1190_v7  ;;  %v1207_v26 = vpack.c.bf16 %v1191_v9, %v1191_v9 }
 0x5f5   : > { %v1133_v43 = vrot.slane %v1132_v16, 2  ;;  %v1310_v61 = vunpack.c.l.b16 %v1210_v12 }
 0x5f6   : > { %v1266_v38 = vunpack.c.l.b16 %v1204_v18  ;;  %v1267_v56 = vunpack.c.l.b16 %v1205_v20  ;;  %v1269_v47 = vunpack.c.l.b16 %v1207_v26  ;;  %v3186_v18 = vunpack.i.h.bf16 %v3184_v15 }
 0x5f7   : > { %v1150_v52 = vperm.slane %v1133_v43, 0  ;;  %v1313_v2 = vpack.c.b16 %v1311_v62, %v1310_v61  ;;  %v3185_v20 = vunpack.i.l.bf16 %v3184_v15 }
 0x5f8   : > { %1230 = vrot.lane.b32.xlu0 %v1228_v45, %s3690_s21  ;;  %v1268_v45 = vunpack.c.l.b16 %v1206_v24  ;;  %v1270_v4 = vpack.c.b16 %v1267_v56, %v1266_v38  ;;  %v2980_v56 = vadd.s32 4294967295, %v3965_v49 }
 0x5f9   : > { %v1179_v63 = vpop.permute.xlu0 %1178 }
 0x5fa   : > { %v1196_v3 = vmul.f32 %v1179_v63, %v1148_v21  ;;  %v1197_v41 = vmul.f32 %v1179_v63, %v1149_v59  ;;  %v1271_v21 = vpack.c.b16 %v1269_v47, %v1268_v45  ;;  %v1420_v59 = vperm.slane %v1403_v22, 2 }
 0x5fb   : > { %v1198_v60 = vmul.f32 %v1179_v63, %v1150_v52  ;;  %v1199_v36 = vmul.f32 %v1179_v63, %v1151_v53  ;;  %v1427_v63 = vperm.slane %v1403_v22, 3  ;;  %vm1391_vm6 = vcmp.ge.s32.totalorder %v2980_v56, 0 }
 0x5fc   : > { %v1212_v11 = vpack.c.bf16 %v1196_v3, %v1196_v3  ;;  %v1213_v13 = vpack.c.bf16 %v1197_v41, %v1197_v41  ;;  %1425 = vperm.xlu2 %3188, %v1420_v59  }
 0x5fd   : > { %v1214_v0 = vpack.c.bf16 %v1198_v60, %v1198_v60  ;;  %v1215_v1 = vpack.c.bf16 %v1199_v36, %v1199_v36  ;;  %v1084_v36 = vld.sshfl [vmem:[#allocation1] sm:$0xff pattern:$0x75316420] }
 0x5fe   : > { %v1350_v58 = vunpack.c.l.b16 %v1212_v11  ;;  %v1351_v19 = vunpack.c.l.b16 %v1213_v13  ;;  %v3195_v62 = vpack.i.bf16 %v4051_v57, %v1084_v36 }
 0x5ff   : > { %v1352_v3 = vunpack.c.l.b16 %v1214_v0  ;;  %v1353_v41 = vunpack.c.l.b16 %v1215_v1  ;;  %v3696_v1 = vmov 0  }
 0x600   : > { %1314 = vrot.lane.b32.xlu0 %v1312_v14, %s3690_s21  ;;  %v1354_v28 = vpack.c.b16 %v1351_v19, %v1350_v58 }
 0x601   : > { %v1051_v8 = vpop.permute.xlu0 %1050  ;;  %v1355_v46 = vpack.c.b16 %v1353_v41, %v1352_v3  ;;  %v3190_v41 = vpack.i.bf16 %v4025_v32, %v4030_v40 }
 0x602   : > { %v1056_v37 = vsel %vm5114_vm2, 0.0, %v1051_v8  ;;  %1356 = vrot.lane.b32.xlu1 %v1354_v28, %s3690_s21 }
 0x603   : > { %v1218_v42 = vpack.c.bf16 %v1056_v37, %v1056_v37 }
 0x605   : > { %v1325_v48 = vsel %vm5115_vm3, %v1218_v42, 0  ;;  %v1392_v42 = vmul.u32 4, %v2980_v56 }
 0x606   : > { %1334 = vmatpush.bf16.xpose.msrb.mxu2 %v1325_v48 }
 0x607   : > { %v1393_v44 = vadd.s32 %v1392_v42, %v3970_v50 }
 0x608   : > { %1272 = vrot.lane.b32.xlu0 %v1270_v4, %s3690_s21 }
 0x609   : > { %v1394_v48 = vsel %vm1391_vm6, %v1393_v44, 0 }
 0x60a   : > { %1274 = vrot.lane.b32.xlu1 %v1271_v21, %s3690_s21 }
 0x60e   : > { %v742_v7 = vpop.xlane.xlu2 %741 }
 0x60f   : > { %3218 = vrcp.f32 %v742_v7  ;;  %v769_v17 = vand.u32 2147483648, %v742_v7  ;;  %vm763_vm15 = vweird.f32 %v742_v7  ;;  %v767_v58 = vand.u32 2147483647, %v742_v7 }
 0x610   : > { %1316 = vrot.lane.b32.xlu0 %v1313_v2, %s3690_s21 }
 0x611   : > { %v770_v22 = vor.u32 1.1754944e-38, %v769_v17  ;;  %vm768_vm5 = vcmp.eq.f32.partialorder %v767_v58, 8.507059e+37 }
 0x612   : > { %1397 = vrot.lane.b32.xlu1 %v1389_v6, %s3694_s23 }
 0x615   : > { %v3219_v9 = vpop.eup %3218 }
 0x616   : > { %v759_v11 = vmul.f32 %v3219_v9, %v742_v7  ;;  %vm764_vm14 = vweird.f32 %v3219_v9 }
 0x617   : > { %vm765_vm4 = vmor %vm763_vm15, %vm764_vm14 }
 0x618   : > { %1358 = vrot.lane.b32.xlu0 %v1355_v46, %s3690_s21  ;;  %v760_v13 = vsub.f32 1.0, %v759_v11  ;;  %s2767_s21 = scalar_lea.hbm %s5290_s14, %s3015_s11 }
 0x619   : > { %s2771_s4 = sshll.u32 %s2767_s21, 4  ;;  %s2772_s4 = int_to_ptr.hbm [resolvable:$true] %s2771_s4 }
 0x61a   : > { %v761_v14 = vmul.f32 %v3219_v9, %v760_v13  ;;  %s3598_s23 = sshra.s32 %s2772_s4, 4  ;;  %s3599_s23 = int_to_ptr.hbm [resolvable:$true] %s3598_s23 }
 0x61b   : > { %s3600_s24 = scalar_lea.hbm %s3599_s23, 8  ;;  %p3605_p12 = scmp.lt.s32.totalorder %s3599_s23, %s5290_s14 }
 0x61c   : > { %v762_v6 = vadd.f32 %v3219_v9, %v761_v14  ;;  %p3601_p1 = scmp.ne.s32.totalorder %s3599_s23, %s3600_s24 }
 0x61e   : > { %v766_v19 = vsel %vm765_vm4, %v3219_v9, %v762_v6  ;;  %p3602_p3 = pnand %p3601_p1, %p3865_p13 }
 0x61f   : > { %v771_v24 = vsel %vm768_vm5, %v770_v22, %v766_v19 }
 0x620   : > { %1411 = vperm.xlu0 %3187, %v1406_v5   ;;  %v772_v28 = vmul.f32 %v4085_v33, %v771_v24  ;;  %p3603_p5 = pneg %p3602_p3 }
 0x622   : > { %v774_v8 = vpack.c.bf16 %v772_v28, %v772_v28 }
 0x628   : > { %1432 = vperm.xlu0 %3187, %v1427_v63  }
 0x630   : > { %1014 = vrot.lane.b32.xlu0 %v4016_v25, %s3686_s6  ;;  %v1057_v25 = vsel %vm5114_vm2, %v3185_v20, %v3186_v18 }
 0x631   : > { %v1219_v26 = vpack.c.bf16 %v1057_v25, %v1057_v25 }
 0x633   : > { %v1367_v31 = vsel %vm5115_vm3, %v1219_v26, 0 }
 0x644   : > { %v1233_v33 = vpop.permute.xlu2 %1232 }
 0x64c   : > { %v4157_v45 = vpop.permute.xlu2 %1418 }
 0x64d   : > { %v1440_v25 = vperm.slane %v4157_v45, 2  ;;  %v1438_v28 = vperm.slane %v4157_v45, 0  ;;  %v1441_v42 = vperm.slane %v4157_v45, 3 }
 0x656   : > { %v4165_v59 = vpop.permute.xlu2 %1425 }
 0x657   : > { %v1445_v60 = vperm.slane %v4165_v59, 3 }
 0x662   : > { %v804_v30 = vpop.permute.xlu0 %803 }
 0x663   : > { %v809_v16 = vsel %vm5114_vm2, %v804_v30, 0  ;;  %v1439_v30 = vperm.slane %v4157_v45, 1 }
 0x664   : > { %818 = vmatpush.bf16.msrb.mxu0 %v809_v16 }
 0x667   : > { %2968 = vmatmul.msk.bf16.vlgmr.msrb.gmra.mxu0 %vm5115_vm3, %v774_v8 }
 0x668   : > { %1376 = vmatpush.bf16.xpose.msra.mxu0 %v1367_v31 }
 0x66a   : > { %v1231_v34 = vpop.permute.xlu0 %1230 }
 0x66b   : > { %2972 = vmatmul.msk.bf16.vlgmr.msrb.gmra.mxu3 %vm5115_vm3, %v1231_v34 }
 0x672   : > { %v1315_v37 = vpop.permute.xlu0 %1314 }
 0x673   : > { %2976 = vmatmul.msk.bf16.vlgmr.msrb.gmra.mxu2 %vm5115_vm3, %v1315_v37 }
 0x674   : > { %v1357_v38 = vpop.permute.xlu1 %1356 }
 0x677   : > { %2978 = vmatmul.msk.bf16.vlgmr.msra.gmra.mxu0 %vm5115_vm3, %v1357_v38  ;;  %v1442_v38 = vperm.slane %v4165_v59, 0 }
 0x67a   : > { %v1273_v39 = vpop.permute.xlu0 %1272 }
 0x67b   : > { %2973 = vmatmul.msk.bf16.gmra.mxu3 %vm5115_vm3, %v1233_v33  ;;  %2974 = vmatmul.msk.bf16.vlgmr.msra.gmra.mxu1 %vm5115_vm3, %v1273_v39 }
 0x67c   : > { %v1275_v43 = vpop.permute.xlu1 %1274 }
 0x682   : > { %v1317_v47 = vpop.permute.xlu0 %1316 }
 0x683   : > { %2977 = vmatmul.msk.bf16.gmra.mxu2 %vm5115_vm3, %v1317_v47 }
 0x684   : > { %v1398_v49 = vpop.permute.xlu1 %1397 }
 0x685   : > { %v1400_v4 = vsel %vm1399_vm7, %v1394_v48, %v1398_v49 }
 0x686   : > { %v1404_v12 = vrot.slane %v1400_v4, 6 }
 0x688   : > { %v4161_v51 = vsel %vm1402_vm13, %v1400_v4, %v1404_v12  ;;  %v1443_v12 = vperm.slane %v4165_v59, 1 }
 0x689   : > { %v1483_v52 = vperm.slane %v4161_v51, 2  ;;  %v1469_v53 = vperm.slane %v4161_v51, 0  ;;  %v4171_v61 = vrot.slane %v4161_v51, 2  ;;  %v1476_v0 = vperm.slane %v4161_v51, 1 }
 0x68a   : > { %v1359_v21 = vpop.permute.xlu0 %1358  ;;  %v1490_v3 = vperm.slane %v4161_v51, 3  ;;  %v1450_v26 = vrot.slane %v4161_v51, 1  ;;  %v4239_v36 = vrot.slane %v4161_v51, 3 }
 0x68b   : > { %2975 = vmatmul.msk.bf16.gmra.mxu1 %vm5115_vm3, %v1275_v43  ;;  %1488 = vperm.xlu2 %3188, %v1483_v52   ;;  %vm1464_vm8 = vcmp.lt.s32.totalorder %v1445_v60, %v4171_v61  ;;  %v1498_v5 = vperm.slane %v4171_v61, 0 }
 0x68c   : > { %1474 = vperm.xlu1 %3189, %v1469_v53   ;;  %2979 = vmatmul.msk.bf16.gmra.mxu0 %vm5115_vm3, %v1359_v21  ;;  %v1515_v2 = vsel %vm1464_vm8, 1, %v3696_v1  ;;  %vm1459_vm6 = vcmp.lt.s32.totalorder %v1440_v25, %v1450_v26  ;;  %vm1458_vm7 = vcmp.lt.s32.totalorder %v1439_v30, %v1450_v26  ;;  %vm1457_vm8 = vcmp.lt.s32.totalorder %v1438_v28, %v1450_v26 }
 0x68d   : > { %v1531_v63 = vperm.slane %v1515_v2, 0  ;;  %v1510_v44 = vsel %vm1459_vm6, 1, %v3696_v1  ;;  %v1509_v49 = vsel %vm1458_vm7, 1, %v3696_v1  ;;  %v1508_v4 = vsel %vm1457_vm8, 1, %v3696_v1 }
 0x68e   : > { %v1526_v60 = vperm.slane %v1510_v44, 0  ;;  %v1525_v2 = vperm.slane %v1509_v49, 0  ;;  %vm4256_vm8 = vcmp.lt.s32.totalorder %v1441_v42, %v1450_v26 }
 0x68f   : > { %vm4189_vm13 = vcmp.eq.s32.totalorder %v1531_v63, 1 }
 0x690   : > { %vm1542_vm9 = vcmp.eq.s32.totalorder %v1526_v60, 1 }
 0x692   : > { %v1412_v14 = vpop.permute.xlu0 %1411 }
 0x693   : > { %3196 = vrot.lane.b32.xlu2 %v3195_v62, %s3695_s3  ;;  %v1434_v17 = vperm.slane %v1412_v14, 0  ;;  %v1436_v58 = vperm.slane %v1412_v14, 2  ;;  %v1435_v19 = vperm.slane %v1412_v14, 1  ;;  %v1437_v16 = vperm.slane %v1412_v14, 3 }
 0x694   : > { %1481 = vperm.xlu1 %3189, %v1476_v0   ;;  %v1497_v0 = vperm.slane %v1450_v26, 0 }
 0x695   : > { %vm1453_vm15 = vcmp.lt.s32.totalorder %v1434_v17, %v4161_v51  ;;  %vm1455_vm4 = vcmp.lt.s32.totalorder %v1436_v58, %v4161_v51  ;;  %vm1454_vm5 = vcmp.lt.s32.totalorder %v1435_v19, %v4161_v51  ;;  %vm1456_vm0 = vcmp.lt.s32.totalorder %v1437_v16, %v4161_v51 }
 0x696   : > { %v1504_v24 = vsel %vm1453_vm15, 1, %v3696_v1  ;;  %v1506_v37 = vsel %vm1455_vm4, 1, %v3696_v1  ;;  %v1505_v39 = vsel %vm1454_vm5, 1, %v3696_v1  ;;  %vm4234_vm5 = vcmp.lt.s32.totalorder %v1442_v38, %v4171_v61 }
 0x697   : > { %v1520_v31 = vperm.slane %v1504_v24, 0  ;;  %v1522_v48 = vperm.slane %v1506_v37, 0  ;;  %v1521_v45 = vperm.slane %v1505_v39, 0  ;;  %v1511_v24 = vsel %vm4256_vm8, 1, %v3696_v1 }
 0x699   : > { %vm1536_vm1 = vcmp.eq.s32.totalorder %v1520_v31, 1 }
 0x69a   : > { %v4214_v8 = vpop.permute.xlu0 %1432 }
 0x69b   : > { %v1446_v47 = vperm.slane %v4214_v8, 0  ;;  %v1447_v58 = vperm.slane %v4214_v8, 1  ;;  %v1448_v26 = vperm.slane %v4214_v8, 2 }
 0x69c   : > { %1495 = vperm.xlu1 %3189, %v1490_v3   ;;  %v1524_v3 = vperm.slane %v1508_v4, 0  ;;  %v1527_v4 = vperm.slane %v1511_v24, 0 }
 0x6a4   : > { %3191 = vrot.lane.b32.xlu1 %v3190_v41, %s3686_s6 }
 0x6e4   : > { %v4182_v57 = vpop.f32.mrf.mxu0 }
 0x6e5   : > { %v1489_v46 = vpop.permute.xlu2 %1488 }
 0x6e6   : > { %vm4185_vm12 = vcmp.lt.s32.totalorder %v1498_v5, %v1489_v46 }
 0x6ec   : > { %v822_v32 = vpop.f32.mrf.mxu0 }
 0x6ed   : > { %v4197_v40 = vpop.permute.xlu2 %3196 }
 0x6ee   : > { %v3198_v11 = vunpack.i.l.bf16 %v4197_v40  ;;  %v1252_v13 = vpop.f32.mrf.mxu3 }
 0x6f0   : > { %v1094_v15 = vsel %vm5114_vm2, 0.0, %v3198_v11 }
 0x6f1   : > { %v2382_v6 = vpack.c.bf16 %v1094_v15, %v1094_v15  ;;  %v1512_v15 = vsel %vm4234_vm5, 1, %v3696_v1 }
 0x6f3   : > { %v2474_v18 = vsel %vm5114_vm2, %v2382_v6, 0  ;;  %vm1541_vm2 = vcmp.eq.s32.totalorder %v1525_v2, 1  ;;  %v1444_v2 = vperm.slane %v4165_v59, 2 }
 0x6f4   : > { %2483 = vmatpush.bf16.msra.mxu2 %v2474_v18  ;;  %v4243_v41 = vpop.f32.mrf.mxu0 }
 0x6f6   : > { %v4202_v20 = vpop.f32.mrf.mxu3  ;;  %v1336_v44 = vpop.f32.mrf.mxu2 }
 0x6f8   : > { %v4205_v22 = vpop.f32.mrf.mxu1 }
 0x6fe   : > { %v1475_v34 = vpop.permute.xlu1 %1474  ;;  %v1257_v33 = vpop.f32.mrf.mxu3 }
 0x6ff   : > { %vm4218_vm15 = vcmp.lt.s32.totalorder %v1469_v53, %v1475_v34  ;;  %v1507_v53 = vsel %vm1456_vm0, 1, %v3696_v1  ;;  %vm1465_vm0 = vcmp.lt.s32.totalorder %v1446_v47, %v4239_v36  ;;  %v1528_v47 = vperm.slane %v1512_v15, 0 }
 0x700   : > { %v1296_v43 = vpop.f32.mrf.mxu1  ;;  %vm1560_vm4 = vmor %vm1536_vm1, %vm4218_vm15  ;;  %vm4245_vm1 = vcmp.eq.s32.totalorder %v1522_v48, 1  ;;  %v1523_v63 = vperm.slane %v1507_v53, 0  ;;  %v1516_v18 = vsel %vm1465_vm0, 1, %v3696_v1 }
 0x701   : > { %v1576_v52 = vsel %vm1560_vm4, -1000000.0, %v1252_v13  ;;  %vm4260_vm4 = vcmp.eq.s32.totalorder %v1521_v45, 1  ;;  %v1532_v34 = vperm.slane %v1516_v18, 0  ;;  %v1015_v18 = vpop.permute.xlu0 %1014 }
 0x702   : > { %vm1592_vm6 = vcmp.eq.f32.partialorder %v1576_v52, 0.0  ;;  %vm1539_vm7 = vcmp.eq.s32.totalorder %v1523_v63, 1 }
 0x703   : > { %v4241_v62 = vsel %vm1592_vm6, -1000000.0, %v1576_v52  ;;  %vm4265_vm6 = vcmp.lt.s32.totalorder %v1443_v12, %v4171_v61  ;;  %v4326_v12 = vpop.f32.mrf.mxu0 }
 0x704   : > { %v1624_v5 = vsel %vm5115_vm3, %v4241_v62, -inf  ;;  %vm4282_vm3 = vcmp.eq.s32.totalorder %v1524_v3, 1  ;;  %v1513_v52 = vsel %vm4265_vm6, 1, %v3696_v1 }
 0x705   : > { %1625 = vmax.xlane.f32.xlu0 %v1624_v5  ;;  %v1529_v3 = vperm.slane %v1513_v52, 0 }
 0x706   : > { %v1482_v51 = vpop.permute.xlu1 %1481  ;;  %v1259_v19 = vpop.f32.mrf.mxu3 }
 0x707   : > { %vm4269_vm10 = vcmp.lt.s32.totalorder %v1497_v0, %v1482_v51 }
 0x708   : > { %v1299_v6 = vpop.f32.mrf.mxu1  ;;  %vm1566_vm14 = vmor %vm1542_vm9, %vm4269_vm10 }
 0x709   : > { %v1582_v25 = vsel %vm1566_vm14, -1000000.0, %v1299_v6  ;;  %vm1565_vm11 = vmor %vm1541_vm2, %vm4269_vm10 }
 0x70a   : > { %vm5151_vm9 = vmor %vm4245_vm1, %vm4218_vm15  ;;  %vm1598_vm5 = vcmp.eq.f32.partialorder %v1582_v25, 0.0  ;;  %v1581_v30 = vsel %vm1565_vm11, -1000000.0, %v1296_v43  ;;  %vm5152_vm11 = vcmask 64512   ;;  %v1499_v43 = vperm.slane %v4239_v36, 0 }
 0x70b   : > { %v1578_v28 = vsel %vm5151_vm9, -1000000.0, %v1257_v33  ;;  %vm1564_vm14 = vmor %vm4282_vm3, %vm4269_vm10  ;;  %vm1597_vm0 = vcmp.eq.f32.partialorder %v1581_v30, 0.0  ;;  %v4306_v31 = vsel %vm1598_vm5, -1000000.0, %v1582_v25  ;;  %vm1467_vm9 = vcmp.lt.s32.totalorder %v1448_v26, %v4239_v36 }
 0x70c   : > { %vm1563_vm2 = vmor %vm1539_vm7, %vm4218_vm15  ;;  %v1580_v16 = vsel %vm1564_vm14, -1000000.0, %v4205_v22  ;;  %v4308_v38 = vsel %vm1597_vm0, -1000000.0, %v1581_v30  ;;  %v1642_v33 = vsel %vm5152_vm11, %v4306_v31, -inf  ;;  %vm1594_vm5 = vcmp.eq.f32.partialorder %v1578_v28, 0.0 }
 0x70d   : > { %v1579_v37 = vsel %vm1563_vm2, -1000000.0, %v1259_v19  ;;  %vm1596_vm1 = vcmp.eq.f32.partialorder %v1580_v16, 0.0  ;;  %vm5153_vm8 = vmmov %vm5152_vm11  ;;  %1643 = vmax.xlane.f32.xlu0 %v1642_v33  ;;  %vm4337_vm0 = vcmp.eq.s32.totalorder %v1532_v34, 1  ;;  %v1518_v45 = vsel %vm1467_vm9, 1, %v3696_v1 }
 0x70e   : > { %v1639_v39 = vsel %vm5153_vm8, %v4308_v38, -inf  ;;  %v4314_v42 = vsel %vm1596_vm1, -1000000.0, %v1580_v16  ;;  %vm5154_vm3 = vmor %vm4260_vm4, %vm4218_vm15  ;;  %v1496_v49 = vpop.permute.xlu1 %1495  ;;  %vm1595_vm14 = vcmp.eq.f32.partialorder %v1579_v37, 0.0  ;;  %vm1466_vm15 = vcmp.lt.s32.totalorder %v1447_v58, %v4239_v36  ;;  %v1338_v58 = vpop.f32.mrf.mxu2 }
 0x70f   : > { %v1577_v22 = vsel %vm5154_vm3, -1000000.0, %v4202_v20  ;;  %1640 = vmax.xlane.f32.xlu1 %v1639_v39  ;;  %vm5155_vm7 = vmmov %vm5153_vm8  ;;  %vm4328_vm2 = vcmp.lt.s32.totalorder %v1499_v43, %v1496_v49  ;;  %v1449_v20 = vperm.slane %v4214_v8, 3  ;;  %vm1544_vm11 = vcmp.eq.s32.totalorder %v1528_v47, 1 }
 0x710   : > { %v1636_v48 = vsel %vm5155_vm7, %v4314_v42, -inf  ;;  %vm1593_vm4 = vcmp.eq.f32.partialorder %v1577_v22, 0.0  ;;  %vm1572_vm1 = vmor %vm4337_vm0, %vm4328_vm2  ;;  %v1301_v21 = vpop.f32.mrf.mxu1  ;;  %v4346_v60 = vsel %vm1594_vm5, -1000000.0, %v1578_v28  ;;  %v4348_v8 = vsel %vm1595_vm14, -1000000.0, %v1579_v37 }
 0x711   : > { %1637 = vmax.xlane.f32.xlu2 %v1636_v48  ;;  %v1517_v0 = vsel %vm1466_vm15, 1, %v3696_v1  ;;  %vm1568_vm6 = vmor %vm1544_vm11, %vm4185_vm12  ;;  %vm1543_vm8 = vcmp.eq.s32.totalorder %v1527_v4, 1  ;;  %v4354_v46 = vsel %vm1593_vm4, -1000000.0, %v1577_v22  ;;  %vm4359_vm7 = vcmp.lt.s32.totalorder %v1449_v20, %v4239_v36  ;;  %v1383_v36 = vpop.f32.mrf.mxu0 }
 0x712   : > { %v1584_v5 = vsel %vm1568_vm6, -1000000.0, %v1336_v44  ;;  %vm1567_vm3 = vmor %vm1543_vm8, %vm4269_vm10  ;;  %v1588_v51 = vsel %vm1572_vm1, -1000000.0, %v4243_v41  ;;  %v1534_v32 = vperm.slane %v1518_v45, 0  ;;  %vm5162_vm9 = vcmask 64512  }
 0x713   : > { %v1583_v59 = vsel %vm1567_vm3, -1000000.0, %v1301_v21  ;;  %v1630_v11 = vsel %vm5162_vm9, %v4346_v60, -inf  ;;  %vm5163_vm5 = vmmov %vm5162_vm9  ;;  %v1533_v15 = vperm.slane %v1517_v0, 0  ;;  %vm1600_vm10 = vcmp.eq.f32.partialorder %v1584_v5, 0.0 }
 0x714   : > { %v1633_v13 = vsel %vm5163_vm5, %v4348_v8, -inf  ;;  %vm5164_vm14 = vmmov %vm5163_vm5  ;;  %vm1604_vm15 = vcmp.eq.f32.partialorder %v1588_v51, 0.0  ;;  %vm4371_vm4 = vcmp.lt.s32.totalorder %v1444_v2, %v4171_v61  ;;  %vm1599_vm0 = vcmp.eq.f32.partialorder %v1583_v59, 0.0 }
 0x715   : > { %v1627_v14 = vsel %vm5164_vm14, %v4354_v46, -inf  ;;  %1634 = vmax.xlane.f32.xlu0 %v1633_v13  ;;  %v1519_v25 = vsel %vm4359_vm7, 1, %v3696_v1  ;;  %vm4378_vm1 = vcmp.eq.s32.totalorder %v1534_v32, 1  ;;  %vm1545_vm11 = vcmp.eq.s32.totalorder %v1529_v3, 1 }
 0x716   : > { %v3192_v6 = vpop.permute.xlu1 %3191  ;;  %vm5169_vm6 = vcmask 1043456   ;;  %vm4384_vm3 = vcmp.eq.s32.totalorder %v1533_v15, 1  ;;  %vm1574_vm9 = vmor %vm4378_vm1, %vm4328_vm2  ;;  %v4393_v34 = vsel %vm1600_vm10, -1000000.0, %v1584_v5  ;;  %v4395_v37 = vsel %vm1604_vm15, -1000000.0, %v1588_v51  ;;  %v1341_v45 = vpop.f32.mrf.mxu2 }
 0x717   : > { %1631 = vmax.xlane.f32.xlu1 %v1630_v11  ;;  %v3194_v17 = vunpack.i.h.bf16 %v3192_v6  ;;  %v3193_v41 = vunpack.i.l.bf16 %v3192_v6  ;;  %vm5170_vm8 = vmmov %vm5169_vm6  ;;  %v1514_v33 = vsel %vm4371_vm4, 1, %v3696_v1  ;;  %v1535_v39 = vperm.slane %v1519_v25, 0 }
 0x718   : > { %vm1573_vm7 = vmor %vm4384_vm3, %vm4328_vm2  ;;  %v4407_v43 = vsel %vm1599_vm0, -1000000.0, %v1583_v59  ;;  %v1590_v48 = vsel %vm1574_vm9, -1000000.0, %v1383_v36  ;;  %vm5175_vm15 = vcmask 64512   ;;  %v1530_v52 = vperm.slane %v1514_v33, 0 }
 0x719   : > { %1628 = vmax.xlane.f32.xlu2 %v1627_v14  ;;  %v1018_v26 = vsel %vm5169_vm6, 0.0, %v3193_v41  ;;  %v1019_v28 = vsel %vm5170_vm8, %v3194_v17, %v1015_v18  ;;  %vm1569_vm5 = vmor %vm1545_vm11, %vm4185_vm12  ;;  %v1648_v49 = vsel %vm5175_vm15, %v4393_v34, -inf  ;;  %v1589_v1 = vsel %vm1573_vm7, -1000000.0, %v4326_v12  ;;  %v1385_v53 = vpop.f32.mrf.mxu0 }
 0x71a   : > { %v2380_v61 = vpack.c.bf16 %v1018_v26, %v1018_v26  ;;  %v2381_v16 = vpack.c.bf16 %v1019_v28, %v1019_v28  ;;  %v1585_v22 = vsel %vm1569_vm5, -1000000.0, %v1338_v58  ;;  %vm5173_vm14 = vmmov %vm5169_vm6  ;;  %vm1606_vm11 = vcmp.eq.f32.partialorder %v1590_v48, 0.0 }
 0x71b   : > { %vm5174_vm10 = vmmov %vm5169_vm6  ;;  %vm1601_vm0 = vcmp.eq.f32.partialorder %v1585_v22, 0.0  ;;  %vm1551_vm6 = vcmp.eq.s32.totalorder %v1535_v39, 1  ;;  %vm1605_vm8 = vcmp.eq.f32.partialorder %v1589_v1, 0.0  ;;  %v4420_v21 = vsel %vm1606_vm11, -1000000.0, %v1590_v48 }
 0x71c   : > { %v2404_v44 = vsel %vm5173_vm14, %v2380_v61, 0  ;;  %v2439_v47 = vsel %vm5174_vm10, %v2381_v16, 0  ;;  %vm5176_vm1 = vmmov %vm5175_vm15  ;;  %v4422_v0 = vsel %vm1601_vm0, -1000000.0, %v1585_v22  ;;  %vm1546_vm9 = vcmp.eq.s32.totalorder %v1530_v52, 1 }
 0x71d   : > { %2413 = vmatpush.bf16.msra.mxu3 %v2404_v44  ;;  %2448 = vmatpush.bf16.msrb.mxu1 %v2439_v47  ;;  %v1660_v4 = vsel %vm5176_vm1, %v4395_v37, -inf  ;;  %vm5177_vm4 = vmmov %vm5176_vm1  ;;  %v4424_v12 = vsel %vm1605_vm8, -1000000.0, %v1589_v1 }
 0x71e   : > { %v1645_v20 = vsel %vm5177_vm4, %v4407_v43, -inf  ;;  %1661 = vmax.xlane.f32.xlu0 %v1660_v4  ;;  %vm1575_vm3 = vmor %vm1551_vm6, %vm4328_vm2 }
 0x71f   : > { %1649 = vmax.xlane.f32.xlu1 %v1648_v49  ;;  %vm1570_vm7 = vmor %vm1546_vm9, %vm4185_vm12  ;;  %v1591_v2 = vsel %vm1575_vm3, -1000000.0, %v1385_v53 }
 0x720   : > { %v1586_v3 = vsel %vm1570_vm7, -1000000.0, %v1341_v45  ;;  %vm5178_vm5 = vmmov %vm5176_vm1  ;;  %vm1607_vm10 = vcmp.eq.f32.partialorder %v1591_v2, 0.0 }
 0x721   : > { %1646 = vmax.xlane.f32.xlu2 %v1645_v20  ;;  %v1666_v5 = vsel %vm5178_vm5, %v4420_v21, -inf  ;;  %vm5179_vm14 = vmmov %vm5176_vm1  ;;  %vm1602_vm15 = vcmp.eq.f32.partialorder %v1586_v3, 0.0  ;;  %v4434_v51 = vsel %vm1607_vm10, -1000000.0, %v1591_v2  ;;  %v1343_v20 = vpop.f32.mrf.mxu2 }
 0x722   : > { %v1651_v56 = vsel %vm5179_vm14, %v4422_v0, -inf  ;;  %vm5180_vm2 = vmmov %vm5176_vm1  ;;  %v4436_v32 = vsel %vm1602_vm15, -1000000.0, %v1586_v3  ;;  %v1669_v59 = vsel %vm5176_vm1, %v4434_v51, -inf }
 0x723   : > { %v1663_v63 = vsel %vm5180_vm2, %v4424_v12, -inf  ;;  %vm5181_vm4 = vmmov %vm5176_vm1 }
 0x724   : > { %v1654_v11 = vsel %vm5181_vm4, %v4436_v32, -inf  ;;  %vm5182_vm0 = vmor %vm4189_vm13, %vm4185_vm12 }
 0x725   : > { %vm5183_vm12 = vmmov %vm5176_vm1 }
 0x726   : > { %1652 = vmax.xlane.f32.xlu0 %v1651_v56  ;;  %vm5184_vm13 = vmmov %vm5176_vm1 }
 0x727   : > { %1667 = vmax.xlane.f32.xlu1 %v1666_v5  ;;  %vm5185_vm6 = vmmov %vm5176_vm1 }
 0x728   : > { %vm5186_vm8 = vmmov %vm5176_vm1 }
 0x729   : > { %1664 = vmax.xlane.f32.xlu2 %v1663_v63  ;;  %vm5187_vm3 = vmmov %vm5176_vm1 }
 0x72a   : > { %vm5188_vm9 = vmmov %vm5176_vm1 }
 0x72b   : > { %vm5189_vm7 = vmmov %vm5176_vm1 }
 0x72c   : > { %vm5190_vm5 = vmmov %vm5176_vm1 }
 0x72d   : > { %vm5191_vm14 = vmmov %vm5176_vm1 }
 0x72e   : > { %1670 = vmax.xlane.f32.xlu0 %v1669_v59  ;;  %vm5192_vm2 = vmmov %vm5176_vm1 }
 0x72f   : > { %vm5193_vm10 = vmmov %vm5176_vm1 }
 0x730   : > { %vm5194_vm15 = vmmov %vm5176_vm1 }
 0x731   : > { %1655 = vmax.xlane.f32.xlu2 %v1654_v11  ;;  %vm5195_vm4 = vmmov %vm5176_vm1 }
 0x778   : > { %v1626_v13 = vpop.xlane.xlu0 %1625 }
 0x779   : > { %v1672_v15 = vrot.slane %v1626_v13, 4 }
 0x77b   : > { %v1673_v14 = vmax.f32 %v1626_v13, %v1672_v15  ;;  %v1587_v13 = vsel %vm5182_vm0, -1000000.0, %v1343_v20  ;;  %vm5196_vm0 = vmmov %vm5176_vm1 }
 0x77c   : > { %vm1603_vm11 = vcmp.eq.f32.partialorder %v1587_v13, 0.0 }
 0x77d   : > { %v1674_v6 = vrot.slane %v1673_v14, 2 }
 0x77f   : > { %v1675_v36 = vmax.f32 %v1673_v14, %v1674_v6 }
 0x780   : > { %v1644_v41 = vpop.xlane.xlu0 %1643 }
 0x781   : > { %v1676_v18 = vrot.slane %v1675_v36, 1  ;;  %v1708_v25 = vrot.slane %v1644_v41, 4 }
 0x782   : > { %v1641_v17 = vpop.xlane.xlu1 %1640 }
 0x783   : > { %v1702_v58 = vrot.slane %v1641_v17, 4  ;;  %v1677_v26 = vmax.f32 %v1675_v36, %v1676_v18  ;;  %v1709_v30 = vmax.f32 %v1644_v41, %v1708_v25 }
 0x784   : > { %v1638_v19 = vpop.xlane.xlu2 %1637 }
 0x785   : > { %v1696_v24 = vrot.slane %v1638_v19, 4  ;;  %v1703_v28 = vmax.f32 %v1641_v17, %v1702_v58  ;;  %v1768_v16 = vsub.f32 %v4241_v62, %v1677_v26  ;;  %v1710_v39 = vrot.slane %v1709_v30, 2 }
 0x787   : > { %v1697_v61 = vmax.f32 %v1638_v19, %v1696_v24  ;;  %v1704_v33 = vrot.slane %v1703_v28, 2  ;;  %v1711_v47 = vmax.f32 %v1709_v30, %v1710_v39  ;;  %v1784_v48 = vmul.f32 1.442695, %v1768_v16 }
 0x788   : > { %v1635_v1 = vpop.xlane.xlu0 %1634 }
 0x789   : > { %v1698_v22 = vrot.slane %v1697_v61, 2  ;;  %v1705_v44 = vmax.f32 %v1703_v28, %v1704_v33  ;;  %v1712_v53 = vrot.slane %v1711_v47, 1  ;;  %v1690_v3 = vrot.slane %v1635_v1, 4 }
 0x78a   : > { %v1632_v4 = vpop.xlane.xlu1 %1631  ;;  %3220 = vpow2.f32 %v1784_v48 }
 0x78b   : > { %v1699_v49 = vmax.f32 %v1697_v61, %v1698_v22  ;;  %v1706_v52 = vrot.slane %v1705_v44, 1  ;;  %v1684_v2 = vrot.slane %v1632_v4, 4  ;;  %v1713_v62 = vmax.f32 %v1711_v47, %v1712_v53 }
 0x78c   : > { %v1629_v45 = vpop.xlane.xlu2 %1628  ;;  %v1691_v11 = vmax.f32 %v1635_v1, %v1690_v3 }
 0x78d   : > { %v1700_v5 = vrot.slane %v1699_v49, 1  ;;  %v1678_v56 = vrot.slane %v1629_v45, 4  ;;  %v1707_v63 = vmax.f32 %v1705_v44, %v1706_v52  ;;  %v1685_v59 = vmax.f32 %v1632_v4, %v1684_v2 }
 0x78e   : > { %v1774_v36 = vsub.f32 %v4306_v31, %v1713_v62  ;;  %v1692_v41 = vrot.slane %v1691_v11, 2 }
 0x78f   : > { %v1701_v15 = vmax.f32 %v1699_v49, %v1700_v5  ;;  %v1679_v14 = vmax.f32 %v1629_v45, %v1678_v56  ;;  %v1773_v6 = vsub.f32 %v4308_v38, %v1707_v63  ;;  %v1686_v17 = vrot.slane %v1685_v59, 2 }
 0x790   : > { %v1693_v25 = vmax.f32 %v1691_v11, %v1692_v41  ;;  %v4451_v26 = vpop.eup %3220  ;;  %v1796_v61 = vmul.f32 1.442695, %v1774_v36  ;;  %v4459_v63 = vsel %vm1603_vm11, -1000000.0, %v1587_v13  ;;  %vm5197_vm11 = vmmov %vm5196_vm0 }
 0x791   : > { %v1772_v18 = vsub.f32 %v4314_v42, %v1701_v15  ;;  %v1680_v58 = vrot.slane %v1679_v14, 2  ;;  %v1687_v19 = vmax.f32 %v1685_v59, %v1686_v17  ;;  %v1794_v24 = vmul.f32 1.442695, %v1773_v6  ;;  %v1662_v28 = vpop.xlane.xlu0 %1661 }
 0x792   : > { %v1650_v9 = vpop.xlane.xlu1 %1649  ;;  %v1694_v38 = vrot.slane %v1693_v25, 1  ;;  %v1816_v39 = vsel %vm5183_vm12, %v4451_v26, 0.0  ;;  %v1744_v44 = vrot.slane %v1662_v28, 4 }
 0x793   : > { %v1681_v7 = vmax.f32 %v1679_v14, %v1680_v58  ;;  %v1792_v30 = vmul.f32 1.442695, %v1772_v18  ;;  %v1688_v16 = vrot.slane %v1687_v19, 1  ;;  %v1720_v31 = vrot.slane %v1650_v9, 4  ;;  %1817 = vadd.xlane.f32.xlu2 %v1816_v39 }
 0x794   : > { %v1647_v33 = vpop.xlane.xlu2 %1646  ;;  %v1695_v48 = vmax.f32 %v1693_v25, %v1694_v38  ;;  %v1745_v20 = vmax.f32 %v1662_v28, %v1744_v44 }
 0x795   : > { %v1682_v42 = vrot.slane %v1681_v7, 1  ;;  %v1714_v22 = vrot.slane %v1647_v33, 4  ;;  %3222 = vpow2.f32 %v1792_v30  ;;  %v1689_v47 = vmax.f32 %v1687_v19, %v1688_v16 }
 0x796   : > { %v1721_v49 = vmax.f32 %v1650_v9, %v1720_v31  ;;  %3224 = vpow2.f32 %v1794_v24  ;;  %v1771_v53 = vsub.f32 %v4348_v8, %v1695_v48  ;;  %v1746_v5 = vrot.slane %v1745_v20, 2 }
 0x797   : > { %v1683_v4 = vmax.f32 %v1681_v7, %v1682_v42  ;;  %v1715_v1 = vmax.f32 %v1647_v33, %v1714_v22  ;;  %3226 = vpow2.f32 %v1796_v61  ;;  %v1770_v52 = vsub.f32 %v4346_v60, %v1689_v47 }
 0x798   : > { %v1722_v45 = vrot.slane %v1721_v49, 2  ;;  %v1747_v15 = vmax.f32 %v1745_v20, %v1746_v5  ;;  %v1790_v36 = vmul.f32 1.442695, %v1771_v53 }
 0x799   : > { %v1769_v2 = vsub.f32 %v4354_v46, %v1683_v4  ;;  %v1716_v3 = vrot.slane %v1715_v1, 2  ;;  %v1788_v62 = vmul.f32 1.442695, %v1770_v52  ;;  %v1653_v6 = vpop.xlane.xlu0 %1652 }
 0x79a   : > { %v1723_v56 = vmax.f32 %v1721_v49, %v1722_v45  ;;  %v1668_v14 = vpop.xlane.xlu1 %1667  ;;  %v1726_v58 = vrot.slane %v1653_v6, 4  ;;  %v1748_v25 = vrot.slane %v1747_v15, 1  ;;  %v1657_v49 = vsel %vm5187_vm3, %v4459_v63, -inf }
 0x79b   : > { %v4461_v59 = vpop.eup %3222  ;;  %v1717_v11 = vmax.f32 %v1715_v1, %v1716_v3  ;;  %v1786_v60 = vmul.f32 1.442695, %v1769_v2  ;;  %v1756_v46 = vrot.slane %v1668_v14, 4  ;;  %3228 = vpow2.f32 %v1788_v62 }
 0x79c   : > { %v4463_v17 = vpop.eup %3224  ;;  %v1724_v8 = vrot.slane %v1723_v56, 1  ;;  %v1665_v41 = vpop.xlane.xlu2 %1664  ;;  %v1828_v18 = vsel %vm5184_vm13, %v4461_v59, 0.0  ;;  %v1727_v30 = vmax.f32 %v1653_v6, %v1726_v58  ;;  %v1749_v38 = vmax.f32 %v1747_v15, %v1748_v25 }
 0x79d   : > { %v4467_v13 = vpop.eup %3226  ;;  %v1718_v19 = vrot.slane %v1717_v11, 1  ;;  %v1750_v24 = vrot.slane %v1665_v41, 4  ;;  %1829 = vadd.xlane.f32.xlu1 %v1828_v18  ;;  %v1831_v7 = vsel %vm5185_vm6, %v4463_v17, 0.0  ;;  %v1757_v28 = vmax.f32 %v1668_v14, %v1756_v46 }
 0x79e   : > { %v1725_v9 = vmax.f32 %v1723_v56, %v1724_v8  ;;  %1832 = vadd.xlane.f32.xlu0 %v1831_v7  ;;  %v1834_v61 = vsel %vm5186_vm8, %v4467_v13, 0.0  ;;  %v1728_v42 = vrot.slane %v1727_v30, 2  ;;  %3230 = vpow2.f32 %v1790_v36 }
 0x79f   : > { %v1719_v16 = vmax.f32 %v1717_v11, %v1718_v19  ;;  %v1751_v33 = vmax.f32 %v1665_v41, %v1750_v24  ;;  %1835 = vadd.xlane.f32.xlu2 %v1834_v61  ;;  %v1758_v39 = vrot.slane %v1757_v28, 2  ;;  %v1780_v22 = vsub.f32 %v4395_v37, %v1749_v38 }
 0x7a0   : > { %v1776_v31 = vsub.f32 %v4393_v34, %v1725_v9  ;;  %v1729_v48 = vmax.f32 %v1727_v30, %v1728_v42  ;;  %3232 = vpow2.f32 %v1786_v60 }
 0x7a1   : > { %v1752_v44 = vrot.slane %v1751_v33, 2  ;;  %v1759_v47 = vmax.f32 %v1757_v28, %v1758_v39  ;;  %v1775_v1 = vsub.f32 %v4407_v43, %v1719_v16  ;;  %v1671_v52 = vpop.xlane.xlu0 %1670  ;;  %v1808_v53 = vmul.f32 1.442695, %v1780_v22  ;;  %v4478_v5 = vpop.eup %3228 }
 0x7a2   : > { %v1800_v4 = vmul.f32 1.442695, %v1776_v31  ;;  %v1730_v34 = vrot.slane %v1729_v48, 1  ;;  %v1762_v3 = vrot.slane %v1671_v52, 4  ;;  %v1822_v43 = vsel %vm5188_vm9, %v4478_v5, 0.0 }
 0x7a3   : > { %v1753_v20 = vmax.f32 %v1751_v33, %v1752_v44  ;;  %v1760_v45 = vrot.slane %v1759_v47, 1  ;;  %v1798_v8 = vmul.f32 1.442695, %v1775_v1 }
 0x7a4   : > { %v1656_v2 = vpop.xlane.xlu2 %1655  ;;  %3234 = vpow2.f32 %v1800_v4  ;;  %v4480_v62 = vpop.eup %3230  ;;  %v1731_v15 = vmax.f32 %v1729_v48, %v1730_v34  ;;  %v1763_v14 = vmax.f32 %v1671_v52, %v1762_v3  ;;  %v3200_v3 = vpack.i.bf16 %v4018_v27, %v4022_v29 }
 0x7a5   : > { %v1754_v37 = vrot.slane %v1753_v20, 1  ;;  %v1732_v56 = vrot.slane %v1656_v2, 4  ;;  %1658 = vmax.xlane.f32.xlu1 %v1657_v49  ;;  %3236 = vpow2.f32 %v1808_v53  ;;  %v1761_v11 = vmax.f32 %v1759_v47, %v1760_v45 }
 0x7a6   : > { %1823 = vadd.xlane.f32.xlu0 %v1822_v43  ;;  %v1825_v60 = vsel %vm5189_vm7, %v4480_v62, 0.0  ;;  %v1777_v46 = vsub.f32 %v4422_v0, %v1731_v15  ;;  %v1764_v18 = vrot.slane %v1763_v14, 2  ;;  %v4488_v58 = vpop.eup %3232  ;;  %3238 = vpow2.f32 %v1798_v8 }
 0x7a7   : > { %v1755_v6 = vmax.f32 %v1753_v20, %v1754_v37  ;;  %v1733_v36 = vmax.f32 %v1656_v2, %v1732_v56  ;;  %v1782_v41 = vsub.f32 %v4420_v21, %v1761_v11  ;;  %1826 = vadd.xlane.f32.xlu2 %v1825_v60  ;;  %v1819_v21 = vsel %vm5190_vm5, %v4488_v58, 0.0  ;;  %v1087_v37 = vld.sshfl [vmem:[#allocation1 + $0x10] sm:$0xff pattern:$0x75316420] }
 0x7a8   : > { %v1765_v24 = vmax.f32 %v1763_v14, %v1764_v18  ;;  %v1802_v9 = vmul.f32 1.442695, %v1777_v46 }
 0x7a9   : > { %v1734_v19 = vrot.slane %v1733_v36, 2  ;;  %v1812_v7 = vmul.f32 1.442695, %v1782_v41  ;;  %v1781_v30 = vsub.f32 %v4424_v12, %v1755_v6 }
 0x7aa   : > { %v4490_v25 = vpop.eup %3234  ;;  %v1766_v16 = vrot.slane %v1765_v24, 1 }
 0x7ab   : > { %v4492_v28 = vpop.eup %3236  ;;  %v1735_v61 = vmax.f32 %v1733_v36, %v1734_v19  ;;  %v1840_v0 = vsel %vm5191_vm14, %v4490_v25, 0.0  ;;  %3240 = vpow2.f32 %v1812_v7  ;;  %v1810_v12 = vmul.f32 1.442695, %v1781_v30 }
 0x7ac   : > { %v1852_v33 = vsel %vm5192_vm2, %v4492_v28, 0.0  ;;  %3242 = vpow2.f32 %v1802_v9  ;;  %v1767_v31 = vmax.f32 %v1765_v24, %v1766_v16  ;;  %v4502_v22 = vpop.eup %3238 }
 0x7ad   : > { %v1736_v38 = vrot.slane %v1735_v61, 1  ;;  %1820 = vadd.xlane.f32.xlu1 %v1819_v21  ;;  %3244 = vpow2.f32 %v1810_v12  ;;  %v1837_v4 = vsel %vm5193_vm10, %v4502_v22, 0.0 }
 0x7ae   : > { %1841 = vadd.xlane.f32.xlu0 %v1840_v0  ;;  %v1783_v42 = vsub.f32 %v4434_v51, %v1767_v31 }
 0x7af   : > { %v1737_v39 = vmax.f32 %v1735_v61, %v1736_v38  ;;  %1853 = vadd.xlane.f32.xlu2 %v1852_v33 }
 0x7b0   : > { %v1814_v47 = vmul.f32 1.442695, %v1783_v42 }
 0x7b1   : > { %v4504_v44 = vpop.eup %3240  ;;  %v1778_v49 = vsub.f32 %v4436_v32, %v1737_v39 }
 0x7b2   : > { %v4506_v48 = vpop.eup %3242  ;;  %v1858_v1 = vsel %vm5194_vm15, %v4504_v44, 0.0  ;;  %3246 = vpow2.f32 %v1814_v47 }
 0x7b3   : > { %v1843_v51 = vsel %vm5176_vm1, %v4506_v48, 0.0  ;;  %v1804_v20 = vmul.f32 1.442695, %v1778_v49  ;;  %v4515_v52 = vpop.eup %3244  ;;  %vm5210_vm1 = vmmov %vm5196_vm0 }
 0x7b4   : > { %v1855_v32 = vsel %vm5195_vm4, %v4515_v52, 0.0 }
 0x7b5   : > { %1838 = vadd.xlane.f32.xlu1 %v1837_v4  ;;  %3248 = vpow2.f32 %v1804_v20 }
 0x7b6   : > { %1859 = vadd.xlane.f32.xlu0 %v1858_v1 }
 0x7b7   : > { %1844 = vadd.xlane.f32.xlu2 %v1843_v51 }
 0x7b8   : > { %v4517_v53 = vpop.eup %3246 }
 0x7b9   : > { %v1861_v45 = vsel %vm5196_vm0, %v4517_v53, 0.0 }
 0x7bb   : > { %v4523_v34 = vpop.eup %3248 }
 0x7bc   : > { %v1846_v2 = vsel %vm5197_vm11, %v4523_v34, 0.0 }
 0x7bd   : > { %1856 = vadd.xlane.f32.xlu1 %v1855_v32 }
 0x7bf   : > { %1862 = vadd.xlane.f32.xlu2 %v1861_v45 }
 0x7c5   : > { %1847 = vadd.xlane.f32.xlu1 %v1846_v2 }
 0x7d7   : > { %3201 = vrot.lane.b32.xlu2 %v3200_v3, %s3697_s25 }
 0x7de   : > { %1090 = vrot.lane.b32.xlu1 %v1087_v37, %s3695_s3 }
 0x806   : > { %v1818_v56 = vpop.xlane.xlu2 %1817 }
 0x807   : > { %v1864_v11 = vrot.slane %v1818_v56, 4 }
 0x809   : > { %v1865_v15 = vadd.f32 %v1864_v11, %v1818_v56 }
 0x80b   : > { %v1866_v43 = vrot.slane %v1865_v15, 2 }
 0x80d   : > { %v1867_v14 = vadd.f32 %v1866_v43, %v1865_v15 }
 0x80f   : > { %v1868_v36 = vrot.slane %v1867_v14, 1 }
 0x810   : > { %v1830_v6 = vpop.xlane.xlu1 %1829 }
 0x811   : > { %v1888_v60 = vrot.slane %v1830_v6, 4  ;;  %v1833_v8 = vpop.xlane.xlu0 %1832  ;;  %v4531_v18 = vadd.f32 %v1868_v36, %v1867_v14 }
 0x812   : > { %v1894_v41 = vrot.slane %v1833_v8, 4  ;;  %v1836_v46 = vpop.xlane.xlu2 %1835 }
 0x813   : > { %v1889_v27 = vadd.f32 %v1888_v60, %v1830_v6  ;;  %v1900_v29 = vrot.slane %v1836_v46, 4  ;;  %3250 = vrcp.f32 %v4531_v18  ;;  %v1969_v14 = vand.u32 2147483647, %v4531_v18 }
 0x814   : > { %v1895_v19 = vadd.f32 %v1894_v41, %v1833_v8  ;;  %vm1965_vm12 = vweird.f32 %v4531_v18 }
 0x815   : > { %v1901_v7 = vadd.f32 %v1900_v29, %v1836_v46  ;;  %v1890_v9 = vrot.slane %v1889_v27, 2  ;;  %v1971_v29 = vand.u32 2147483648, %v4531_v18  ;;  %vm4560_vm6 = vcmp.eq.f32.partialorder %v1969_v14, 8.507059e+37 }
 0x816   : > { %v1896_v24 = vrot.slane %v1895_v19, 2 }
 0x817   : > { %v1902_v61 = vrot.slane %v1901_v7, 2  ;;  %v1891_v39 = vadd.f32 %v1890_v9, %v1889_v27 }
 0x818   : > { %v1897_v30 = vadd.f32 %v1896_v24, %v1895_v19  ;;  %v1659_v16 = vpop.xlane.xlu1 %1658 }
 0x819   : > { %v1738_v21 = vrot.slane %v1659_v16, 4  ;;  %v1903_v38 = vadd.f32 %v1902_v61, %v1901_v7  ;;  %v1824_v33 = vpop.xlane.xlu0 %1823  ;;  %v4534_v31 = vpop.eup %3250  ;;  %v1892_v51 = vrot.slane %v1891_v39, 1 }
 0x81a   : > { %v1898_v0 = vrot.slane %v1897_v30, 1  ;;  %v1827_v12 = vpop.xlane.xlu2 %1826  ;;  %v1961_v49 = vmul.f32 %v4534_v31, %v4531_v18  ;;  %v1876_v37 = vrot.slane %v1824_v33, 4  ;;  %vm1966_vm13 = vweird.f32 %v4534_v31 }
 0x81b   : > { %v1739_v47 = vmax.f32 %v1659_v16, %v1738_v21  ;;  %v1904_v4 = vrot.slane %v1903_v38, 1  ;;  %v1882_v1 = vrot.slane %v1827_v12, 4  ;;  %v4544_v11 = vadd.f32 %v1892_v51, %v1891_v39  ;;  %vm4580_vm3 = vmor %vm1965_vm12, %vm1966_vm13 }
 0x81c   : > { %v4536_v42 = vadd.f32 %v1898_v0, %v1897_v30  ;;  %v1962_v3 = vsub.f32 1.0, %v1961_v49  ;;  %v1877_v41 = vadd.f32 %v1876_v37, %v1824_v33  ;;  %vm5213_vm12 = vmmov %vm5210_vm1 }
 0x81d   : > { %v4541_v20 = vadd.f32 %v1904_v4, %v1903_v38  ;;  %v1740_v32 = vrot.slane %v1739_v47, 2  ;;  %v1883_v45 = vadd.f32 %v1882_v1, %v1827_v12  ;;  %vm5214_vm13 = vmmov %vm5210_vm1 }
 0x81e   : > { %3252 = vrcp.f32 %v4536_v42  ;;  %v1963_v8 = vmul.f32 %v4534_v31, %v1962_v3  ;;  %v2044_v9 = vand.u32 2147483647, %v4536_v42  ;;  %v2046_v30 = vand.u32 2147483648, %v4536_v42 }
 0x81f   : > { %3254 = vrcp.f32 %v4541_v20  ;;  %v1884_v15 = vrot.slane %v1883_v45, 2  ;;  %v1741_v6 = vmax.f32 %v1739_v47, %v1740_v32  ;;  %v1878_v47 = vrot.slane %v1877_v41, 2 }
 0x820   : > { %v1821_v2 = vpop.xlane.xlu1 %1820  ;;  %3256 = vrcp.f32 %v4544_v11  ;;  %v1964_v12 = vadd.f32 %v4534_v31, %v1963_v8  ;;  %vm2040_vm8 = vweird.f32 %v4536_v42  ;;  %v2047_v3 = vor.u32 1.1754944e-38, %v2046_v30 }
 0x821   : > { %v1842_v56 = vpop.xlane.xlu0 %1841  ;;  %v1870_v43 = vrot.slane %v1821_v2, 4  ;;  %v1885_v46 = vadd.f32 %v1884_v15, %v1883_v45  ;;  %v1742_v38 = vrot.slane %v1741_v6, 1  ;;  %vm4584_vm9 = vcmp.eq.f32.partialorder %v2044_v9, 8.507059e+37 }
 0x822   : > { %v1912_v36 = vrot.slane %v1842_v56, 4  ;;  %v1854_v24 = vpop.xlane.xlu2 %1853  ;;  %v1968_v30 = vsel %vm4580_vm3, %v4534_v31, %v1964_v12  ;;  %vm2055_vm14 = vweird.f32 %v4541_v20 }
 0x823   : > { %v1871_v27 = vadd.f32 %v1870_v43, %v1821_v2  ;;  %v1886_v61 = vrot.slane %v1885_v46, 1  ;;  %v1936_v32 = vrot.slane %v1854_v24, 4  ;;  %v1972_v2 = vor.u32 1.1754944e-38, %v1971_v29 }
 0x824   : > { %v4547_v60 = vpop.eup %3252  ;;  %v1913_v33 = vadd.f32 %v1912_v36, %v1842_v56  ;;  %v2059_v56 = vand.u32 2147483647, %v4541_v20  ;;  %v1743_v15 = vmax.f32 %v1741_v6, %v1742_v38  ;;  %v1879_v29 = vadd.f32 %v1878_v47, %v1877_v41 }
 0x825   : > { %v2036_v19 = vmul.f32 %v4547_v60, %v4536_v42  ;;  %v4555_v7 = vpop.eup %3254  ;;  %v4567_v49 = vadd.f32 %v1886_v61, %v1885_v46  ;;  %v1872_v4 = vrot.slane %v1871_v27, 2  ;;  %v2061_v46 = vand.u32 2147483648, %v4541_v20 }
 0x826   : > { %v2051_v0 = vmul.f32 %v4555_v7, %v4541_v20  ;;  %v1914_v43 = vrot.slane %v1913_v33, 2  ;;  %v4574_v14 = vpop.eup %3256  ;;  %vm2041_vm7 = vweird.f32 %v4547_v60  ;;  %vm2056_vm5 = vweird.f32 %v4555_v7 }
 0x827   : > { %v2037_v21 = vsub.f32 1.0, %v2036_v19  ;;  %3258 = vrcp.f32 %v4567_v49  ;;  %v1937_v19 = vadd.f32 %v1936_v32, %v1854_v24  ;;  %v1873_v18 = vadd.f32 %v1872_v4, %v1871_v27  ;;  %vm4608_vm10 = vmor %vm2040_vm8, %vm2041_vm7 }
 0x828   : > { %v1839_v39 = vpop.xlane.xlu1 %1838  ;;  %v2052_v51 = vsub.f32 1.0, %v2051_v0  ;;  %vm4597_vm2 = vcmp.eq.f32.partialorder %v2059_v56, 8.507059e+37  ;;  %v1779_v24 = vsub.f32 %v4459_v63, %v1743_v15  ;;  %v1915_v31 = vadd.f32 %v1914_v43, %v1913_v33  ;;  %vm4617_vm15 = vmor %vm2055_vm14, %vm2056_vm5 }
 0x829   : > { %v2038_v1 = vmul.f32 %v4547_v60, %v2037_v21  ;;  %v1906_v45 = vrot.slane %v1839_v39, 4  ;;  %v1938_v9 = vrot.slane %v1937_v19, 2  ;;  %v1860_v38 = vpop.xlane.xlu0 %1859  ;;  %v1973_v27 = vsel %vm4560_vm6, %v1972_v2, %v1968_v30  ;;  %vm5215_vm6 = vmmov %vm5210_vm1 }
 0x82a   : > { %v2053_v37 = vmul.f32 %v4555_v7, %v2052_v51  ;;  %v1880_v20 = vrot.slane %v1879_v29, 1  ;;  %v2062_v16 = vor.u32 1.1754944e-38, %v2061_v46  ;;  %v1874_v51 = vrot.slane %v1873_v18, 1 }
 0x82b   : > { %v1907_v6 = vadd.f32 %v1906_v45, %v1839_v39  ;;  %v2039_v61 = vadd.f32 %v4547_v60, %v2038_v1  ;;  %v1845_v39 = vpop.xlane.xlu2 %1844  ;;  %v1939_v4 = vadd.f32 %v1938_v9, %v1937_v19  ;;  %v1916_v15 = vrot.slane %v1915_v31, 1 }
 0x82c   : > { %v2054_v21 = vadd.f32 %v4555_v7, %v2053_v37  ;;  %v1948_v37 = vrot.slane %v1860_v38, 4  ;;  %v1806_v36 = vmul.f32 1.442695, %v1779_v24  ;;  %v4627_v19 = vadd.f32 %v1880_v20, %v1879_v29 }
 0x82d   : > { %v1908_v0 = vrot.slane %v1907_v6, 2  ;;  %v4602_v12 = vpop.eup %3258  ;;  %v2043_v63 = vsel %vm4608_vm10, %v4547_v60, %v2039_v61  ;;  %v1940_v45 = vrot.slane %v1939_v4, 1  ;;  %v1974_v60 = vmul.f32 %v4451_v26, %v1973_v27 }
 0x82e   : > { %v2006_v42 = vmul.f32 %v4602_v12, %v4567_v49  ;;  %v2058_v32 = vsel %vm4617_vm15, %v4555_v7, %v2054_v21  ;;  %v1918_v30 = vrot.slane %v1845_v39, 4  ;;  %v2048_v61 = vsel %vm4584_vm9, %v2047_v3, %v2043_v63 }
 0x82f   : > { %v1909_v1 = vadd.f32 %v1908_v0, %v1907_v6  ;;  %v4629_v46 = vadd.f32 %v1940_v45, %v1939_v4  ;;  %v2063_v7 = vsel %vm4597_vm2, %v2062_v16, %v2058_v32  ;;  %v4637_v21 = vadd.f32 %v1874_v51, %v1873_v18 }
 0x830   : > { %v2007_v56 = vsub.f32 1.0, %v2006_v42  ;;  %v1857_v43 = vpop.xlane.xlu1 %1856  ;;  %3260 = vpow2.f32 %v1806_v36  ;;  %v1949_v29 = vadd.f32 %v1948_v37, %v1860_v38  ;;  %v2014_v0 = vand.u32 2147483647, %v4567_v49 }
 0x831   : > { %v1910_v2 = vrot.slane %v1909_v1, 1  ;;  %3262 = vrcp.f32 %v4629_v46  ;;  %v1942_v9 = vrot.slane %v1857_v43, 4  ;;  %v2016_v24 = vand.u32 2147483648, %v4567_v49 }
 0x832   : > { %v2008_v26 = vmul.f32 %v4602_v12, %v2007_v56  ;;  %v4643_v27 = vadd.f32 %v1916_v15, %v1915_v31  ;;  %v2049_v8 = vmul.f32 %v4463_v17, %v2048_v61  ;;  %v1919_v18 = vadd.f32 %v1918_v30, %v1845_v39 }
 0x833   : > { %v4631_v6 = vadd.f32 %v1910_v2, %v1909_v1  ;;  %v4650_v41 = vsel %vm5210_vm1, %v1974_v60, 0.0  ;;  %v2064_v38 = vmul.f32 %v4467_v13, %v2063_v7  ;;  %vm2011_vm4 = vweird.f32 %v4602_v12  ;;  %v4655_v31 = vpop.xlane.xlu2 %1862 }
 0x834   : > { %v2009_v47 = vadd.f32 %v4602_v12, %v2008_v26  ;;  %v1950_v20 = vrot.slane %v1949_v29, 2  ;;  %v1943_v4 = vadd.f32 %v1942_v9, %v1857_v43  ;;  %v2021_v17 = vmul.f32 %v4574_v14, %v4544_v11 }
 0x835   : > { %3264 = vrcp.f32 %v4631_v6  ;;  %vm2010_vm0 = vweird.f32 %v4567_v49  ;;  %vm4663_vm11 = vcmp.eq.f32.partialorder %v2014_v0, 8.507059e+37  ;;  %v2017_v13 = vor.u32 1.1754944e-38, %v2016_v24 }
 0x836   : > { %3266 = vrcp.f32 %v4627_v19  ;;  %v4660_v1 = vpop.eup %3260  ;;  %v4671_v33 = vsel %vm5213_vm12, %v2049_v8, 0.0  ;;  %v1920_v16 = vrot.slane %v1919_v18, 2  ;;  %v2022_v51 = vsub.f32 1.0, %v2021_v17  ;;  %vm4682_vm8 = vmor %vm2010_vm0, %vm2011_vm4 }
 0x837   : > { %3268 = vrcp.f32 %v4637_v21  ;;  %v4668_v63 = vpop.eup %3262  ;;  %v1849_v42 = vsel %vm5214_vm13, %v4660_v1, 0.0  ;;  %v4678_v49 = vsel %vm5215_vm6, %v2064_v38, 0.0  ;;  %v2149_v37 = vand.u32 2147483647, %v4629_v46  ;;  %vm5222_vm0 = vmmov %vm5210_vm1 }
 0x838   : > { %3270 = vrcp.f32 %v4643_v27  ;;  %v2141_v2 = vmul.f32 %v4668_v63, %v4629_v46  ;;  %v2151_v60 = vand.u32 2147483648, %v4629_v46  ;;  %1850 = vadd.xlane.f32.xlu0 %v1849_v42  ;;  %v2013_v15 = vsel %vm4682_vm8, %v4602_v12, %v2009_v47 }
 0x839   : > { %v1951_v36 = vadd.f32 %v1950_v20, %v1949_v29  ;;  %v1944_v30 = vrot.slane %v1943_v4, 2  ;;  %vm2145_vm3 = vweird.f32 %v4629_v46  ;;  %v2023_v26 = vmul.f32 %v4574_v14, %v2022_v51  ;;  %v1848_v29 = vpop.xlane.xlu1 %1847 }
 0x83a   : > { %v2142_v7 = vsub.f32 1.0, %v2141_v2  ;;  %vm2026_vm9 = vweird.f32 %v4574_v14  ;;  %v2029_v9 = vand.u32 2147483647, %v4544_v11  ;;  %v1921_v24 = vadd.f32 %v1920_v16, %v1919_v18 }
 0x83b   : > { %v4675_v32 = vpop.eup %3264  ;;  %v2031_v12 = vand.u32 2147483648, %v4544_v11  ;;  %v2278_v8 = vrot.slane %v4671_v33, 4  ;;  %v2018_v47 = vsel %vm4663_vm11, %v2017_v13, %v2013_v15  ;;  %v2024_v17 = vadd.f32 %v4574_v14, %v2023_v26  ;;  %v4715_v0 = vpop.permute.xlu2 %3201 }
 0x83c   : > { %v4690_v56 = vpop.eup %3266  ;;  %v2066_v43 = vmul.f32 %v4675_v32, %v4631_v6  ;;  %v2143_v20 = vmul.f32 %v4668_v63, %v2142_v7  ;;  %vm2025_vm7 = vweird.f32 %v4544_v11  ;;  %v1945_v51 = vadd.f32 %v1944_v30, %v1943_v4 }
 0x83d   : > { %v4697_v61 = vpop.eup %3268  ;;  %vm2027_vm5 = vmor %vm2025_vm7, %vm2026_vm9  ;;  %v2032_v18 = vor.u32 1.1754944e-38, %v2031_v12  ;;  %v1954_v16 = vrot.slane %v4655_v31, 4  ;;  %v1952_v45 = vrot.slane %v1951_v36, 1  ;;  %vm2030_vm14 = vcmp.eq.f32.partialorder %v2029_v9, 8.507059e+37 }
 0x83e   : > { %v4706_v38 = vpop.eup %3270  ;;  %v2067_v42 = vsub.f32 1.0, %v2066_v43  ;;  %v2028_v2 = vsel %vm2027_vm5, %v4574_v14, %v2024_v17  ;;  %v1924_v3 = vrot.slane %v1848_v29, 4  ;;  %v2019_v39 = vmul.f32 %v4480_v62, %v2018_v47 }
 0x83f   : > { %vm2070_vm2 = vweird.f32 %v4631_v6  ;;  %v2076_v13 = vand.u32 2147483648, %v4631_v6  ;;  %v2033_v11 = vsel %vm2030_vm14, %v2032_v18, %v2028_v2  ;;  %v2279_v4 = vadd.f32 %v2278_v8, %v4671_v33 }
 0x840   : > { %v2144_v15 = vadd.f32 %v4668_v63, %v2143_v20  ;;  %vm2146_vm10 = vweird.f32 %v4668_v63  ;;  %v2034_v43 = vmul.f32 %v4461_v59, %v2033_v11  ;;  %v1925_v14 = vadd.f32 %v1924_v3, %v1848_v29 }
 0x841   : > { %v2068_v30 = vmul.f32 %v4675_v32, %v2067_v42  ;;  %v1946_v7 = vrot.slane %v1945_v51, 1  ;;  %v1955_v26 = vadd.f32 %v1954_v16, %v4655_v31  ;;  %v3203_v62 = vunpack.i.l.bf16 %v4715_v0  ;;  %vm4736_vm4 = vmor %vm2145_vm3, %vm2146_vm10 }
 0x842   : > { %vm4727_vm15 = vcmp.eq.f32.partialorder %v2149_v37, 8.507059e+37  ;;  %v4731_v12 = vadd.f32 %v1952_v45, %v1951_v36  ;;  %v1922_v8 = vrot.slane %v1921_v24, 1  ;;  %v2212_v47 = vsel %vm5210_vm1, %v2034_v43, 0.0  ;;  %vm5230_vm10 = vmmov %vm5222_vm0 }
 0x843   : > { %v2152_v3 = vor.u32 1.1754944e-38, %v2151_v60  ;;  %v4740_v29 = vor.u32 1.1754944e-38, %v2076_v13  ;;  %2213 = vadd.xlane.f32.xlu2 %v2212_v47  ;;  %v2280_v31 = vrot.slane %v2279_v4, 2  ;;  %v1926_v37 = vrot.slane %v1925_v14, 2 }
 0x844   : > { %v4743_v20 = vsel %vm5222_vm0, %v2019_v39, 0.0  ;;  %v2148_v36 = vsel %vm4736_vm4, %v4668_v63, %v2144_v15  ;;  %vm5223_vm11 = vcmask 1043456   ;;  %v1991_v46 = vmul.f32 %v4690_v56, %v4627_v19 }
 0x845   : > { %v999_v17 = vsel %vm5223_vm11, 0.0, %v3203_v62  ;;  %v4752_v42 = vadd.f32 %v4675_v32, %v2068_v30  ;;  %vm2071_vm12 = vweird.f32 %v4675_v32  ;;  %v4755_v60 = vadd.f32 %v1946_v7, %v1945_v51  ;;  %vm5226_vm8 = vmmov %vm5223_vm11 }
 0x846   : > { %v1956_v18 = vrot.slane %v1955_v26, 2  ;;  %3272 = vrcp.f32 %v4731_v12  ;;  %v4758_v16 = vadd.f32 %v1922_v8, %v1921_v24  ;;  %v2360_v45 = vpack.c.bf16 %v999_v17, %v999_v17  ;;  %vm4764_vm13 = vmor %vm2070_vm2, %vm2071_vm12 }
 0x847   : > { %v1992_v2 = vsub.f32 1.0, %v1991_v46  ;;  %v2153_v63 = vsel %vm4727_vm15, %v2152_v3, %v2148_v36  ;;  %v2272_v39 = vrot.slane %v2212_v47, 4  ;;  %v2281_v13 = vadd.f32 %v2280_v31, %v2279_v4  ;;  %vm5232_vm12 = vmmov %vm5226_vm8 }
 0x848   : > { %v1927_v11 = vadd.f32 %v1926_v37, %v1925_v14  ;;  %vm1996_vm6 = vweird.f32 %v4690_v56  ;;  %v1999_v24 = vand.u32 2147483647, %v4627_v19  ;;  %v2001_v43 = vand.u32 2147483648, %v4627_v19 }
 0x849   : > { %v1993_v51 = vmul.f32 %v4690_v56, %v1992_v2  ;;  %v2073_v4 = vsel %vm4764_vm13, %v4675_v32, %v4752_v42  ;;  %3274 = vrcp.f32 %v4755_v60  ;;  %v4777_v14 = vadd.f32 %v1956_v18, %v1955_v26 }
 0x84a   : > { %v2552_v30 = vsel %vm5226_vm8, %v2360_v45, 0  ;;  %v4781_v7 = vmul.f32 %v4492_v28, %v2153_v63  ;;  %vm1995_vm3 = vweird.f32 %v4627_v19  ;;  %v1976_v9 = vmul.f32 %v4697_v61, %v4637_v21 }
 0x84b   : > { %v1994_v62 = vadd.f32 %v4690_v56, %v1993_v51  ;;  %2561 = vmatpush.bf16.msrb.mxu3 %v2552_v30  ;;  %v2273_v8 = vadd.f32 %v2272_v39, %v2212_v47  ;;  %v2282_v59 = vrot.slane %v2281_v13, 1  ;;  %v1928_v3 = vrot.slane %v1927_v11, 1  ;;  %vm1997_vm9 = vmor %vm1995_vm3, %vm1996_vm6 }
 0x84c   : > { %v2002_v26 = vor.u32 1.1754944e-38, %v2001_v43  ;;  %v4789_v31 = vpop.eup %3272  ;;  %vm2000_vm7 = vcmp.eq.f32.partialorder %v1999_v24, 8.507059e+37  ;;  %v1977_v37 = vsub.f32 1.0, %v1976_v9  ;;  %v1984_v36 = vand.u32 2147483647, %v4637_v21  ;;  %995 = vrot.lane.b32.xlu0 %v4012_v23, %s3697_s25  ;;  %vm5233_vm6 = vmmov %vm5230_vm10 }
 0x84d   : > { %v1998_v28 = vsel %vm1997_vm9, %v4690_v56, %v1994_v62  ;;  %v1958_v19 = vrot.slane %v4777_v14, 1  ;;  %v1986_v17 = vand.u32 2147483648, %v4637_v21  ;;  %v2248_v46 = vrot.slane %v4650_v41, 4  ;;  %vm5234_vm3 = vmmov %vm5233_vm6 }
 0x84e   : > { %v2003_v47 = vsel %vm2000_vm7, %v2002_v26, %v1998_v28  ;;  %v1978_v45 = vmul.f32 %v4697_v61, %v1977_v37  ;;  %vm1981_vm5 = vweird.f32 %v4697_v61  ;;  %v2081_v56 = vmul.f32 %v4706_v38, %v4643_v27  ;;  %vm5235_vm7 = vmmov %vm5232_vm12 }
 0x84f   : > { %v2004_v18 = vmul.f32 %v4478_v5, %v2003_v47  ;;  %v4803_v2 = vpop.eup %3274  ;;  %v5227_v23 = vand.u32 2147483647, %v4631_v6  ;;  %v2274_v39 = vrot.slane %v2273_v8, 2  ;;  %v4811_v51 = vadd.f32 %v1928_v3, %v1927_v11 }
 0x850   : > { %vm1980_vm2 = vweird.f32 %v4637_v21  ;;  %v2249_v5 = vadd.f32 %v2248_v46, %v4650_v41  ;;  %v1979_v43 = vadd.f32 %v4697_v61, %v1978_v45  ;;  %vm1985_vm15 = vcmp.eq.f32.partialorder %v1984_v36, 8.507059e+37  ;;  %v1091_v28 = vpop.permute.xlu1 %1090 }
 0x851   : > { %vm4807_vm14 = vcmp.eq.f32.partialorder %v5227_v23, 8.507059e+37  ;;  %v2206_v24 = vsel %vm5230_vm10, %v2004_v18, 0.0  ;;  %v2082_v30 = vsub.f32 1.0, %v2081_v56  ;;  %vm1982_vm1 = vmor %vm1980_vm2, %vm1981_vm5  ;;  %v1987_v6 = vor.u32 1.1754944e-38, %v1986_v17 }
 0x852   : > { %2207 = vadd.xlane.f32.xlu2 %v2206_v24  ;;  %v2260_v62 = vrot.slane %v2206_v24, 4  ;;  %v2250_v9 = vrot.slane %v2249_v5, 2  ;;  %vm2086_vm4 = vweird.f32 %v4706_v38  ;;  %v1983_v11 = vsel %vm1982_vm1, %v4697_v61, %v1979_v43  ;;  %vm5236_vm5 = vmmov %vm5234_vm3 }
 0x853   : > { %v2083_v3 = vmul.f32 %v4706_v38, %v2082_v30  ;;  %v2089_v21 = vand.u32 2147483647, %v4643_v27  ;;  %v2091_v26 = vand.u32 2147483648, %v4643_v27  ;;  %v4822_v37 = vadd.f32 %v2282_v59, %v2281_v13  ;;  %vm5237_vm10 = vmmov %vm5234_vm3 }
 0x854   : > { %v2261_v36 = vadd.f32 %v2260_v62, %v2206_v24  ;;  %v1988_v47 = vsel %vm1985_vm15, %v1987_v6, %v1983_v11  ;;  %v2251_v46 = vadd.f32 %v2250_v9, %v2249_v5  ;;  %v2275_v18 = vadd.f32 %v2274_v39, %v2273_v8 }
 0x855   : > { %v1989_v17 = vmul.f32 %v4488_v58, %v1988_v47  ;;  %v2084_v45 = vadd.f32 %v4706_v38, %v2083_v3  ;;  %vm2085_vm0 = vweird.f32 %v4643_v27  ;;  %3276 = vrcp.f32 %v4811_v51 }
 0x856   : > { %v2262_v61 = vrot.slane %v2261_v36, 2  ;;  %vm2087_vm11 = vmor %vm2085_vm0, %vm2086_vm4  ;;  %v2092_v56 = vor.u32 1.1754944e-38, %v2091_v26  ;;  %v5231_v13 = vunpack.i.h.bf16 %v4197_v40  ;;  %vm2090_vm8 = vcmp.eq.f32.partialorder %v2089_v21, 8.507059e+37 }
 0x857   : > { %v2203_v23 = vsel %vm5233_vm6, %v1989_v17, 0.0  ;;  %v2088_v8 = vsel %vm2087_vm11, %v4706_v38, %v2084_v45  ;;  %v2156_v58 = vmul.f32 %v4803_v2, %v4755_v60  ;;  %v2252_v39 = vrot.slane %v2251_v46, 1 }
 0x858   : > { %v1095_v59 = vsel %vm5232_vm12, %v5231_v13, %v1091_v28  ;;  %v2263_v27 = vadd.f32 %v2262_v61, %v2261_v36  ;;  %2204 = vadd.xlane.f32.xlu1 %v2203_v23  ;;  %v2254_v5 = vrot.slane %v2203_v23, 4  ;;  %v2093_v24 = vsel %vm2090_vm8, %v2092_v56, %v2088_v8  ;;  %vm5241_vm12 = vmmov %vm5234_vm3 }
 0x859   : > { %v2078_v40 = vsel %vm4807_vm14, %v4740_v29, %v2073_v4  ;;  %v2276_v43 = vrot.slane %v2275_v18, 1  ;;  %v2383_v38 = vpack.c.bf16 %v1095_v59, %v1095_v59  ;;  %v2157_v30 = vsub.f32 1.0, %v2156_v58  ;;  %vm5243_vm8 = vmmov %vm5234_vm3 }
 0x85a   : > { %v2255_v62 = vadd.f32 %v2254_v5, %v2203_v23  ;;  %v2094_v6 = vmul.f32 %v4490_v25, %v2093_v24  ;;  %v2164_v9 = vand.u32 2147483647, %v4755_v60  ;;  %v2166_v11 = vand.u32 2147483648, %v4755_v60 }
 0x85b   : > { %v4850_v15 = vsel %vm5234_vm3, %v4781_v7, 0.0  ;;  %v2264_v3 = vrot.slane %v2263_v27, 1  ;;  %v2158_v32 = vmul.f32 %v4803_v2, %v2157_v30  ;;  %vm2161_vm13 = vweird.f32 %v4803_v2  ;;  %v4854_v29 = vpop.eup %3276 }
 0x85c   : > { %v2369_v42 = vpack.c.bf16 %v4822_v37, %v4822_v37  ;;  %v4861_v25 = vadd.f32 %v1958_v19, %v4777_v14  ;;  %v2253_v4 = vadd.f32 %v2252_v39, %v2251_v46  ;;  %v2256_v63 = vrot.slane %v2255_v62, 2 }
 0x85d   : > { %v2277_v21 = vadd.f32 %v2276_v43, %v2275_v18  ;;  %v2159_v7 = vadd.f32 %v4803_v2, %v2158_v32  ;;  %vm2160_vm9 = vweird.f32 %v4755_v60  ;;  %v2509_v26 = vsel %vm5235_vm7, %v2383_v38, 0 }
 0x85e   : > { %v2257_v28 = vadd.f32 %v2256_v63, %v2255_v62  ;;  %v4867_v36 = vsel %vm5236_vm5, %v2094_v6, 0.0  ;;  %vm2162_vm14 = vmor %vm2160_vm9, %vm2161_vm13  ;;  %vm2165_vm2 = vcmp.eq.f32.partialorder %v2164_v9, 8.507059e+37  ;;  %v2167_v37 = vor.u32 1.1754944e-38, %v2166_v11  ;;  %2518 = vmatpush.bf16.msrb.mxu0 %v2509_v26 }
 0x85f   : > { %v2265_v47 = vadd.f32 %v2264_v3, %v2263_v27  ;;  %v2163_v14 = vsel %vm2162_vm14, %v4803_v2, %v2159_v7  ;;  %v2266_v19 = vrot.slane %v4743_v20, 4  ;;  %v2111_v46 = vmul.f32 %v4854_v29, %v4811_v51 }
 0x860   : > { %v2079_v60 = vmul.f32 %v4502_v22, %v2078_v40  ;;  %v2364_v18 = vpack.c.bf16 %v2253_v4, %v2253_v4  ;;  %v2258_v17 = vrot.slane %v2257_v28, 1  ;;  %2225 = vadd.xlane.f32.xlu1 %v4867_v36  ;;  %v2168_v45 = vsel %vm2165_vm2, %v2167_v37, %v2163_v14  ;;  %vm5246_vm2 = vmmov %vm5243_vm8 }
 0x861   : > { %3278 = vrcp.f32 %v4861_v25  ;;  %v2169_v61 = vmul.f32 %v4515_v52, %v2168_v45  ;;  %v2267_v56 = vadd.f32 %v2266_v19, %v4743_v20  ;;  %v2112_v13 = vsub.f32 1.0, %v2111_v46 }
 0x862   : > { %v2368_v2 = vpack.c.bf16 %v2277_v21, %v2277_v21  ;;  %v2424_v59 = vperm.slane %v2369_v42, 0  ;;  %v2259_v23 = vadd.f32 %v2258_v17, %v2257_v28  ;;  %v2320_v8 = vrot.slane %v4850_v15, 4 }
 0x863   : > { %v2366_v58 = vpack.c.bf16 %v2265_v47, %v2265_v47  ;;  %v2239_v22 = vsel %vm5237_vm10, %v2169_v61, 0.0  ;;  %v2268_v27 = vrot.slane %v2267_v56, 2  ;;  %v2113_v39 = vmul.f32 %v4854_v29, %v2112_v13 }
 0x864   : > { %v2388_v5 = vperm.slane %v2364_v18, 0  ;;  %v2365_v24 = vpack.c.bf16 %v2259_v23, %v2259_v23  ;;  %v2326_v40 = vrot.slane %v2239_v22, 4  ;;  %vm2116_vm15 = vweird.f32 %v4854_v29 }
 0x865   : > { %v2269_v52 = vadd.f32 %v2268_v27, %v2267_v56  ;;  %v2114_v43 = vadd.f32 %v4854_v29, %v2113_v39  ;;  %vm2115_vm1 = vweird.f32 %v4811_v51  ;;  %v2119_v38 = vand.u32 2147483647, %v4811_v51 }
 0x866   : > { %v2423_v30 = vperm.slane %v2368_v2, 0  ;;  %v2389_v62 = vperm.slane %v2365_v24, 0  ;;  %v2327_v6 = vadd.f32 %v2326_v40, %v2239_v22  ;;  %vm4885_vm4 = vmor %vm2115_vm1, %vm2116_vm15  ;;  %v2121_v11 = vand.u32 2147483648, %v4811_v51 }
 0x867   : > { %v4890_v3 = vpop.eup %3278  ;;  %v2390_v32 = vperm.slane %v2366_v58, 0  ;;  %v2321_v42 = vadd.f32 %v2320_v8, %v4850_v15  ;;  %v2270_v4 = vrot.slane %v2269_v52, 1  ;;  %v2118_v63 = vsel %vm4885_vm4, %v4854_v29, %v2114_v43  ;;  %vm5247_vm15 = vmmov %vm5246_vm2 }
 0x868   : > { %v2392_v21 = vunpack.c.l.b16 %v2388_v5  ;;  %v2393_v7 = vunpack.c.l.b16 %v2389_v62  ;;  %v2328_v26 = vrot.slane %v2327_v6, 2  ;;  %2240 = vadd.xlane.f32.xlu1 %v2239_v22  ;;  %v2122_v28 = vor.u32 1.1754944e-38, %v2121_v11 }
 0x869   : > { %v2284_v37 = vrot.slane %v4678_v49, 4  ;;  %v2271_v47 = vadd.f32 %v2270_v4, %v2269_v52  ;;  %vm2120_vm0 = vcmp.eq.f32.partialorder %v2119_v38, 8.507059e+37  ;;  %v2171_v51 = vmul.f32 %v4789_v31, %v4731_v12 }
 0x86a   : > { %3280 = vrcp.f32 %v4758_v16  ;;  %v2428_v14 = vunpack.c.l.b16 %v2424_v59  ;;  %vm5240_vm11 = vcmask 1041409   ;;  %v2123_v46 = vsel %vm2120_vm0, %v2122_v28, %v2118_v63 }
 0x86b   : > { %v2396_v19 = vsel %vm5240_vm11, %v2393_v7, %v2392_v21  ;;  %v2427_v18 = vunpack.c.l.b16 %v2423_v30  ;;  %v2394_v29 = vunpack.c.l.b16 %v2390_v32  ;;  %v2367_v17 = vpack.c.bf16 %v2271_v47, %v2271_v47  ;;  %vm5244_vm13 = vmmov %vm5240_vm11 }
 0x86c   : > { %v2124_v45 = vmul.f32 %v4523_v34, %v2123_v46  ;;  %v4903_v61 = vsel %vm5241_vm12, %v2079_v60, 0.0  ;;  %v2322_v56 = vrot.slane %v2321_v42, 2  ;;  %v2329_v13 = vadd.f32 %v2328_v26, %v2327_v6  ;;  %vm5248_vm12 = vmmov %vm5246_vm2 }
 0x86d   : > { %v2172_v2 = vsub.f32 1.0, %v2171_v51  ;;  %v2391_v23 = vperm.slane %v2367_v17, 0  ;;  %vm5242_vm6 = vcmask 1042434   ;;  %v2181_v59 = vand.u32 2147483648, %v4731_v12 }
 0x86e   : > { %v2397_v8 = vsel %vm5242_vm6, %v2394_v29, %v2396_v19  ;;  %v2230_v58 = vsel %vm5243_vm8, %v2124_v45, 0.0  ;;  %vm2176_vm3 = vweird.f32 %v4789_v31  ;;  %v2179_v34 = vand.u32 2147483647, %v4731_v12 }
 0x86f   : > { %2231 = vadd.xlane.f32.xlu2 %v2230_v58  ;;  %v2173_v22 = vmul.f32 %v4789_v31, %v2172_v2  ;;  %v2285_v60 = vadd.f32 %v2284_v37, %v4678_v49  ;;  %v4913_v27 = vsel %vm5244_vm13, %v2428_v14, %v2427_v18  ;;  %v2296_v39 = vrot.slane %v4867_v36, 4 }
 0x870   : > { %v2395_v5 = vunpack.c.l.b16 %v2391_v23  ;;  %v2290_v24 = vrot.slane %v4903_v61, 4  ;;  %v4917_v40 = vpop.eup %3280  ;;  %v2323_v52 = vadd.f32 %v2322_v56, %v2321_v42  ;;  %vm2175_vm9 = vweird.f32 %v4731_v12 }
 0x871   : > { %v2174_v43 = vadd.f32 %v4789_v31, %v2173_v22  ;;  %v2286_v38 = vrot.slane %v2285_v60, 2  ;;  %vm5245_vm7 = vcmask 1043459   ;;  %vm2177_vm5 = vmor %vm2175_vm9, %vm2176_vm3  ;;  %v2182_v62 = vor.u32 1.1754944e-38, %v2181_v59 }
 0x872   : > { %v2398_v30 = vsel %vm5245_vm7, %v2395_v5, %v2397_v8  ;;  %v2291_v6 = vadd.f32 %v2290_v24, %v4903_v61  ;;  %v2186_v9 = vmul.f32 %v4890_v3, %v4861_v25  ;;  %v2330_v11 = vrot.slane %v2329_v13, 1  ;;  %vm5252_vm13 = vmmov %vm5245_vm7 }
 0x873   : > { %v2399_v32 = vpack.c.b16 %v2398_v30, %v2398_v30  ;;  %v2178_v4 = vsel %vm2177_vm5, %v4789_v31, %v2174_v43  ;;  %vm2180_vm14 = vcmp.eq.f32.partialorder %v2179_v34, 8.507059e+37  ;;  %v2287_v63 = vadd.f32 %v2286_v38, %v2285_v60  ;;  %vm5253_vm7 = vmmov %vm5246_vm2 }
 0x874   : > { %v2183_v42 = vsel %vm2180_vm14, %v2182_v62, %v2178_v4  ;;  %v2292_v21 = vrot.slane %v2291_v6, 2  ;;  %v2187_v7 = vsub.f32 1.0, %v2186_v9  ;;  %v2324_v12 = vrot.slane %v2323_v52, 1  ;;  %vm5254_vm5 = vmmov %vm5246_vm2 }
 0x875   : > { %2981 = vmatmul.msk.bf16.vlgmr.msra.gmra.mxu3 %vm5246_vm2, %v2399_v32  ;;  %v2308_v26 = vrot.slane %v2230_v58, 4  ;;  %v2184_v28 = vmul.f32 %v4504_v44, %v2183_v42  ;;  %vm2191_vm10 = vweird.f32 %v4890_v3  ;;  %v2288_v37 = vrot.slane %v2287_v63, 1 }
 0x876   : > { %v2293_v47 = vadd.f32 %v2292_v21, %v2291_v6  ;;  %v2188_v51 = vmul.f32 %v4890_v3, %v2187_v7  ;;  %v2194_v14 = vand.u32 2147483647, %v4861_v25  ;;  %v2331_v31 = vadd.f32 %v2330_v11, %v2329_v13  ;;  %2201 = vadd.xlane.f32.xlu0 %v4650_v41 }
 0x877   : > { %v2242_v19 = vsel %vm5247_vm15, %v2184_v28, 0.0  ;;  %vm2190_vm1 = vweird.f32 %v4861_v25  ;;  %v2196_v46 = vand.u32 2147483648, %v4861_v25  ;;  %v2289_v29 = vadd.f32 %v2288_v37, %v2287_v63  ;;  %vm5258_vm15 = vmmov %vm5254_vm5 }
 0x878   : > { %2243 = vadd.xlane.f32.xlu1 %v2242_v19  ;;  %v2332_v18 = vrot.slane %v2242_v19, 4  ;;  %v2294_v17 = vrot.slane %v2293_v47, 1  ;;  %v2189_v44 = vadd.f32 %v4890_v3, %v2188_v51  ;;  %v2309_v45 = vadd.f32 %v2308_v26, %v2230_v58  ;;  %vm2192_vm4 = vmor %vm2190_vm1, %vm2191_vm10 }
 0x879   : > { %vm2195_vm0 = vcmp.eq.f32.partialorder %v2194_v14, 8.507059e+37  ;;  %v2197_v56 = vor.u32 1.1754944e-38, %v2196_v46  ;;  %v2096_v13 = vmul.f32 %v4917_v40, %v4758_v16  ;;  %v2370_v25 = vpack.c.bf16 %v2289_v29, %v2289_v29  ;;  %vm5257_vm10 = vmmov %vm5252_vm13 }
 0x87a   : > { %v2333_v2 = vadd.f32 %v2332_v18, %v2242_v19  ;;  %v2295_v23 = vadd.f32 %v2294_v17, %v2293_v47  ;;  %v2193_v8 = vsel %vm2192_vm4, %v4890_v3, %v2189_v44  ;;  %v2297_v59 = vadd.f32 %v2296_v39, %v4867_v36 }
 0x87b   : > { %v2325_v22 = vadd.f32 %v2324_v12, %v2323_v52  ;;  %v2198_v34 = vsel %vm2195_vm0, %v2197_v56, %v2193_v8  ;;  %v2097_v60 = vsub.f32 1.0, %v2096_v13  ;;  %v2425_v5 = vperm.slane %v2370_v25, 0 }
 0x87c   : > { %v2334_v41 = vrot.slane %v2333_v2, 2  ;;  %v2371_v58 = vpack.c.bf16 %v2295_v23, %v2295_v23  ;;  %v2199_v24 = vmul.f32 %v4517_v53, %v2198_v34  ;;  %v2377_v43 = vpack.c.bf16 %v2331_v31, %v2331_v31 }
 0x87d   : > { %v2310_v38 = vrot.slane %v2309_v45, 2  ;;  %v2098_v30 = vmul.f32 %v4917_v40, %v2097_v60  ;;  %vm2101_vm11 = vweird.f32 %v4917_v40  ;;  %v2429_v9 = vunpack.c.l.b16 %v2425_v5 }
 0x87e   : > { %v2335_v62 = vadd.f32 %v2334_v41, %v2333_v2  ;;  %v2426_v6 = vperm.slane %v2371_v58, 0  ;;  %v2245_v3 = vsel %vm5248_vm12, %v2199_v24, 0.0  ;;  %vm2100_vm6 = vweird.f32 %v4758_v16  ;;  %2216 = vadd.xlane.f32.xlu0 %v4671_v33 }
 0x87f   : > { %v2338_v36 = vrot.slane %v2245_v3, 4  ;;  %v2099_v39 = vadd.f32 %v4917_v40, %v2098_v30  ;;  %v2104_v52 = vand.u32 2147483647, %v4758_v16  ;;  %v2298_v11 = vrot.slane %v2297_v59, 2  ;;  %vm4950_vm8 = vmor %vm2100_vm6, %vm2101_vm11 }
 0x880   : > { %v2336_v53 = vrot.slane %v2335_v62, 1  ;;  %v2430_v32 = vunpack.c.l.b16 %v2426_v6  ;;  %2246 = vadd.xlane.f32.xlu1 %v2245_v3  ;;  %v2106_v42 = vand.u32 2147483648, %v4758_v16  ;;  %v2376_v63 = vpack.c.bf16 %v2325_v22, %v2325_v22 }
 0x881   : > { %vm5251_vm3 = vcmask 1042434   ;;  %v2339_v7 = vadd.f32 %v2338_v36, %v2245_v3  ;;  %v2103_v12 = vsel %vm4950_vm8, %v4917_v40, %v2099_v39  ;;  %v2494_v26 = vperm.slane %v2377_v43, 0 }
 0x882   : > { %v2432_v21 = vsel %vm5251_vm3, %v2429_v9, %v4913_v27  ;;  %v2337_v28 = vadd.f32 %v2336_v53, %v2335_v62  ;;  %v2107_v33 = vor.u32 1.1754944e-38, %v2106_v42  ;;  %v2311_v47 = vadd.f32 %v2310_v38, %v2309_v45  ;;  %vm5256_vm2 = vmmov %vm5251_vm3 }
 0x883   : > { %v2433_v37 = vsel %vm5252_vm13, %v2430_v32, %v2432_v21  ;;  %v2340_v14 = vrot.slane %v2339_v7, 2  ;;  %vm2105_vm9 = vcmp.eq.f32.partialorder %v2104_v52, 8.507059e+37  ;;  %v2299_v31 = vadd.f32 %v2298_v11, %v2297_v59  ;;  %vm5260_vm4 = vmmov %vm5256_vm2 }
 0x884   : > { %v2434_v51 = vpack.c.b16 %v2433_v37, %v2433_v37  ;;  %v2378_v16 = vpack.c.bf16 %v2337_v28, %v2337_v28  ;;  %v2108_v19 = vsel %vm2105_vm9, %v2107_v33, %v2103_v12  ;;  %v2493_v46 = vperm.slane %v2376_v63, 0  ;;  %vm5263_vm13 = vmmov %vm5254_vm5 }
 0x885   : > { %v2341_v27 = vadd.f32 %v2340_v14, %v2339_v7  ;;  %v3205_v18 = vpack.i.bf16 %v4045_v54, %v4048_v55  ;;  %v2109_v40 = vmul.f32 %v4506_v48, %v2108_v19  ;;  %v2498_v29 = vunpack.c.l.b16 %v2494_v26  ;;  %vm5264_vm9 = vmmov %vm5257_vm10 }
 0x886   : > { %2982 = vmatmul.msk.bf16.vlgmr.msrb.gmra.mxu1 %vm5253_vm7, %v2434_v51  ;;  %v2312_v17 = vrot.slane %v2311_v47, 1  ;;  %v2300_v56 = vrot.slane %v2299_v31, 1  ;;  %v2495_v13 = vperm.slane %v2378_v16, 0  ;;  %2219 = vadd.xlane.f32.xlu0 %v4678_v49  ;;  %v2497_v23 = vunpack.c.l.b16 %v2493_v46  ;;  %vm5265_vm7 = vmmov %vm5254_vm5 }
 0x887   : > { %v2342_v44 = vrot.slane %v2341_v27, 1  ;;  %3206 = vrot.lane.b32.xlu2 %v3205_v18, %s3698_s12  ;;  %v2227_v45 = vsel %vm5254_vm5, %v2109_v40, 0.0  ;;  %vm5255_vm14 = vcmask 1041409   ;;  %v3204_v26 = vunpack.i.h.bf16 %v4715_v0 }
 0x888   : > { %v2302_v2 = vrot.slane %v2227_v45, 4  ;;  %v2501_v54 = vsel %vm5255_vm14, %v2498_v29, %v2497_v23  ;;  %v2313_v55 = vadd.f32 %v2312_v17, %v2311_v47  ;;  %v2301_v59 = vadd.f32 %v2300_v56, %v2299_v31  ;;  %vm5259_vm1 = vmmov %vm5255_vm14 }
 0x889   : > { %v2343_v25 = vadd.f32 %v2342_v44, %v2341_v27  ;;  %v2499_v22 = vunpack.c.l.b16 %v2495_v13  ;;  %vm5261_vm0 = vcmask 1043456  }
 0x88a   : > { %v2303_v8 = vadd.f32 %v2302_v2, %v2227_v45  ;;  %v2374_v5 = vpack.c.bf16 %v2313_v55, %v2313_v55  ;;  %v2372_v43 = vpack.c.bf16 %v2301_v59, %v2301_v59  ;;  %vm5262_vm11 = vmmov %vm5261_vm0 }
 0x88b   : > { %v2379_v48 = vpack.c.bf16 %v2343_v25, %v2343_v25  ;;  %v2502_v41 = vsel %vm5256_vm2, %v2499_v22, %v2501_v54  ;;  %vm5266_vm5 = vmmov %vm5261_vm0 }
 0x88c   : > { %v2304_v34 = vrot.slane %v2303_v8, 2  ;;  %v2460_v6 = vperm.slane %v2374_v5, 0  ;;  %v2458_v9 = vperm.slane %v2372_v43, 0  ;;  %vm5267_vm14 = vmmov %vm5261_vm0 }
 0x88d   : > { %v2496_v60 = vperm.slane %v2379_v48, 0  ;;  %vm5268_vm2 = vmmov %vm5259_vm1 }
 0x88e   : > { %v2305_v58 = vadd.f32 %v2304_v34, %v2303_v8  ;;  %2222 = vadd.xlane.f32.xlu0 %v4903_v61  ;;  %v2464_v39 = vunpack.c.l.b16 %v2460_v6  ;;  %v2462_v52 = vunpack.c.l.b16 %v2458_v9 }
 0x88f   : > { %v2500_v24 = vunpack.c.l.b16 %v2496_v60 }
 0x890   : > { %v2306_v49 = vrot.slane %v2305_v58, 1 }
 0x891   : > { %v2503_v38 = vsel %vm5257_vm10, %v2500_v24, %v2502_v41  ;;  %vm5269_vm10 = vmmov %vm5260_vm4 }
 0x892   : > { %v2504_v30 = vpack.c.b16 %v2503_v38, %v2503_v38  ;;  %v2307_v62 = vadd.f32 %v2306_v49, %v2305_v58 }
 0x894   : > { %2984 = vmatmul.msk.bf16.vlgmr.msrb.gmra.mxu0 %vm5258_vm15, %v2504_v30  ;;  %v2373_v3 = vpack.c.bf16 %v2307_v62, %v2307_v62  ;;  %vm5270_vm15 = vmmov %vm5261_vm0 }
 0x896   : > { %v2459_v36 = vperm.slane %v2373_v3, 0  ;;  %2210 = vadd.xlane.f32.xlu0 %v4743_v20 }
 0x898   : > { %v2463_v11 = vunpack.c.l.b16 %v2459_v36 }
 0x899   : > { %1071 = vrot.lane.b32.xlu1 %v4028_v35, %s3698_s12 }
 0x89a   : > { %v2466_v61 = vsel %vm5259_vm1, %v2463_v11, %v2462_v52  ;;  %vm5271_vm1 = vmmov %vm5264_vm9 }
 0x89b   : > { %v2467_v53 = vsel %vm5260_vm4, %v2464_v39, %v2466_v61  ;;  %vm5272_vm4 = vmmov %vm5261_vm0 }
 0x89e   : > { %2228 = vadd.xlane.f32.xlu0 %v2227_v45 }
 0x8ab   : > { %v1851_v32 = vpop.xlane.xlu0 %1850 }
 0x8ac   : > { %v1930_v4 = vrot.slane %v1851_v32, 4 }
 0x8ae   : > { %v1931_v42 = vadd.f32 %v1930_v4, %v1851_v32 }
 0x8b0   : > { %v1932_v63 = vrot.slane %v1931_v42, 2 }
 0x8b2   : > { %v1933_v21 = vadd.f32 %v1932_v63, %v1931_v42 }
 0x8b4   : > { %v1934_v7 = vrot.slane %v1933_v21, 1 }
 0x8b6   : > { %v1935_v12 = vadd.f32 %v1934_v7, %v1933_v21  ;;  %v2214_v29 = vpop.xlane.xlu2 %2213 }
 0x8b7   : > { %v2348_v6 = vpack.c.bf16 %v2214_v29, %v2214_v29 }
 0x8b8   : > { %3282 = vrcp.f32 %v1935_v12  ;;  %v2136_v14 = vand.u32 2147483648, %v1935_v12  ;;  %v2134_v16 = vand.u32 2147483647, %v1935_v12  ;;  %vm2130_vm6 = vweird.f32 %v1935_v12 }
 0x8b9   : > { %v2571_v39 = vunpack.c.l.b16 %v2348_v6 }
 0x8ba   : > { %v2137_v46 = vor.u32 1.1754944e-38, %v2136_v14  ;;  %vm2135_vm3 = vcmp.eq.f32.partialorder %v2134_v16, 8.507059e+37 }
 0x8bb   : > { %v2990_v21 = vunpack.i.l.s16 %v2571_v39 }
 0x8be   : > { %v3283_v20 = vpop.eup %3282  ;;  %v996_v28 = vpop.permute.xlu0 %995 }
 0x8bf   : > { %v1000_v37 = vsel %vm5261_vm0, %v3204_v26, %v996_v28  ;;  %v2126_v33 = vmul.f32 %v3283_v20, %v1935_v12  ;;  %vm2131_vm12 = vweird.f32 %v3283_v20  ;;  %vm5273_vm0 = vmmov %vm5265_vm7 }
 0x8c0   : > { %v2361_v35 = vpack.c.bf16 %v1000_v37, %v1000_v37  ;;  %vm2132_vm8 = vmor %vm2130_vm6, %vm2131_vm12 }
 0x8c1   : > { %v2127_v51 = vsub.f32 1.0, %v2126_v33  ;;  %v2583_v33 = vperm.slane %v2990_v21, %v3970_v50  ;;  %vm5275_vm12 = vmmov %vm5269_vm10 }
 0x8c2   : > { %v2595_v47 = vsel %vm5262_vm11, %v2361_v35, 0  ;;  %vm5274_vm11 = vmmov %vm5268_vm2 }
 0x8c3   : > { %2604 = vmatpush.bf16.msra.mxu1 %v2595_v47  ;;  %v2128_v31 = vmul.f32 %v3283_v20, %v2127_v51  ;;  %vm5276_vm6 = vmmov %vm5271_vm1 }
 0x8c5   : > { %v2129_v19 = vadd.f32 %v3283_v20, %v2128_v31  ;;  %v2208_v2 = vpop.xlane.xlu2 %2207 }
 0x8c6   : > { %v2346_v26 = vpack.c.bf16 %v2208_v2, %v2208_v2 }
 0x8c7   : > { %v2133_v27 = vsel %vm2132_vm8, %v3283_v20, %v2129_v19  ;;  %vm5277_vm8 = vmmov %vm5273_vm0 }
 0x8c8   : > { %v2138_v0 = vsel %vm2135_vm3, %v2137_v46, %v2133_v27  ;;  %v2530_v14 = vunpack.c.l.b16 %v2346_v26  ;;  %vm5278_vm3 = vmmov %vm5268_vm2 }
 0x8c9   : > { %v2139_v18 = vmul.f32 %v4660_v1, %v2138_v0 }
 0x8cb   : > { %v2233_v40 = vsel %vm5263_vm13, %v2139_v18, 0.0  ;;  %v2205_v25 = vpop.xlane.xlu1 %2204  ;;  %vm5279_vm13 = vmmov %vm5269_vm10 }
 0x8cc   : > { %2234 = vadd.xlane.f32.xlu0 %v2233_v40  ;;  %v2314_v17 = vrot.slane %v2233_v40, 4  ;;  %v2345_v61 = vpack.c.bf16 %v2205_v25, %v2205_v25 }
 0x8ce   : > { %v2315_v44 = vadd.f32 %v2314_v17, %v2233_v40  ;;  %v2529_v20 = vunpack.c.l.b16 %v2345_v61 }
 0x8d0   : > { %v2316_v45 = vrot.slane %v2315_v44, 2  ;;  %v2986_v31 = vunpack.i.l.s16 %v2529_v20 }
 0x8d2   : > { %v2317_v56 = vadd.f32 %v2316_v45, %v2315_v44 }
 0x8d3   : > { %v4987_v22 = vpop.xlane.xlu1 %2225 }
 0x8d4   : > { %v2318_v13 = vrot.slane %v2317_v56, 1  ;;  %2237 = vadd.xlane.f32.xlu0 %v4850_v15  ;;  %v2352_v25 = vpack.c.bf16 %v4987_v22, %v4987_v22 }
 0x8d6   : > { %v2319_v23 = vadd.f32 %v2318_v13, %v2317_v56  ;;  %v2987_v56 = vunpack.i.l.s16 %v2530_v14 }
 0x8d8   : > { %v2375_v8 = vpack.c.bf16 %v2319_v23, %v2319_v23  ;;  %v2541_v23 = vperm.slane %v2986_v31, %v3970_v50 }
 0x8da   : > { %v2461_v54 = vperm.slane %v2375_v8, 0 }
 0x8db   : > { %v4991_v5 = vpop.xlane.xlu1 %2240 }
 0x8dc   : > { %v2465_v55 = vunpack.c.l.b16 %v2461_v54  ;;  %v2357_v21 = vpack.c.bf16 %v4991_v5, %v4991_v5 }
 0x8de   : > { %v2468_v1 = vsel %vm5264_vm9, %v2465_v55, %v2467_v53  ;;  %vm5280_vm9 = vmmov %vm5271_vm1 }
 0x8df   : > { %v2469_v59 = vpack.c.b16 %v2468_v1, %v2468_v1 }
 0x8e1   : > { %2983 = vmatmul.msk.bf16.vlgmr.msra.gmra.mxu2 %vm5265_vm7, %v2469_v59  ;;  %vm5281_vm7 = vmmov %vm5273_vm0 }
 0x8e2   : > { %v4984_v48 = vpop.xlane.xlu2 %2231 }
 0x8e3   : > { %v2354_v54 = vpack.c.bf16 %v4984_v48, %v4984_v48 }
 0x8e5   : > { %v2616_v22 = vunpack.c.l.b16 %v2354_v54 }
 0x8e9   : > { %v2202_v41 = vpop.xlane.xlu0 %2201 }
 0x8ea   : > { %v3207_v34 = vpop.permute.xlu2 %3206  ;;  %v2344_v52 = vpack.c.bf16 %v2202_v41, %v2202_v41  ;;  %v2614_v41 = vunpack.c.l.b16 %v2352_v25 }
 0x8eb   : > { %v3208_v60 = vunpack.i.l.bf16 %v3207_v34  ;;  %v4996_v38 = vpop.xlane.xlu1 %2243  ;;  %v3209_v16 = vunpack.i.h.bf16 %v3207_v34  ;;  %v2542_v34 = vperm.slane %v2987_v56, %v3970_v50 }
 0x8ec   : > { %v2528_v7 = vunpack.c.l.b16 %v2344_v52 }
 0x8ed   : > { %v1075_v15 = vsel %vm5266_vm5, 0.0, %v3208_v60  ;;  %vm5282_vm5 = vmmov %vm5268_vm2 }
 0x8ee   : > { %v2362_v58 = vpack.c.bf16 %v1075_v15, %v1075_v15  ;;  %v2985_v47 = vunpack.i.l.s16 %v2528_v7 }
 0x8f0   : > { %v2638_v24 = vsel %vm5267_vm14, %v2362_v58, 0  ;;  %v2540_v29 = vperm.slane %v2985_v47, %v3970_v50  ;;  %vm5283_vm14 = vmmov %vm5269_vm10 }
 0x8f1   : > { %2647 = vmatpush.bf16.msrb.mxu2 %v2638_v24  ;;  %v2217_v43 = vpop.xlane.xlu0 %2216 }
 0x8f2   : > { %v2349_v30 = vpack.c.bf16 %v2217_v43, %v2217_v43  ;;  %v2544_v1 = vsel %vm5274_vm11, %v2541_v23, %v2540_v29 }
 0x8f3   : > { %v5000_v4 = vpop.xlane.xlu1 %2246  ;;  %v2545_v58 = vsel %vm5275_vm12, %v2542_v34, %v2544_v1 }
 0x8f4   : > { %v2572_v3 = vunpack.c.l.b16 %v2349_v30  ;;  %v2359_v26 = vpack.c.bf16 %v5000_v4, %v5000_v4 }
 0x8f6   : > { %v2991_v32 = vunpack.i.l.s16 %v2572_v3  ;;  %v2660_v47 = vunpack.c.l.b16 %v2359_v26 }
 0x8f8   : > { %v4994_v49 = vpop.f32.mrf.mxu3  ;;  %v2584_v28 = vperm.slane %v2991_v32, %v3970_v50 }
 0x8f9   : > { %v2220_v62 = vpop.xlane.xlu0 %2219 }
 0x8fa   : > { %v2350_v9 = vpack.c.bf16 %v2220_v62, %v2220_v62  ;;  %v2587_v46 = vsel %vm5268_vm2, %v2584_v28, %v2583_v33  ;;  %v2995_v62 = vunpack.i.l.s16 %v2614_v41  ;;  %v2658_v28 = vunpack.c.l.b16 %v2357_v21  ;;  %vm5284_vm2 = vmmov %vm5271_vm1 }
 0x8fc   : > { %v2573_v36 = vunpack.c.l.b16 %v2350_v9  ;;  %v2997_v9 = vunpack.i.l.s16 %v2616_v22  ;;  %v2626_v39 = vperm.slane %v2995_v62, %v3970_v50 }
 0x8fe   : > { %v2992_v42 = vunpack.i.l.s16 %v2573_v36 }
 0x900   : > { %v2417_v11 = vpop.f32.mrf.mxu3  ;;  %v2585_v35 = vperm.slane %v2992_v42, %v3970_v50 }
 0x901   : > { %v2223_v63 = vpop.xlane.xlu0 %2222  ;;  %v2628_v11 = vperm.slane %v2997_v9, %v3970_v50 }
 0x902   : > { %v2351_v12 = vpack.c.bf16 %v2223_v63, %v2223_v63  ;;  %v2588_v18 = vsel %vm5269_vm10, %v2585_v35, %v2587_v46  ;;  %vm5285_vm10 = vmmov %vm5273_vm0 }
 0x903   : > { %v4998_v53 = vpop.f32.mrf.mxu1 }
 0x904   : > { %v2574_v37 = vunpack.c.l.b16 %v2351_v12  ;;  %v2358_v12 = vpack.c.bf16 %v4996_v38, %v4996_v38  ;;  %v3003_v38 = vunpack.i.l.s16 %v2660_v47 }
 0x906   : > { %v2993_v51 = vunpack.i.l.s16 %v2574_v37  ;;  %v2659_v35 = vunpack.c.l.b16 %v2358_v12 }
 0x908   : > { %v2586_v27 = vperm.slane %v2993_v51, %v3970_v50 }
 0x909   : > { %v2211_v40 = vpop.xlane.xlu0 %2210 }
 0x90a   : > { %v2589_v44 = vsel %vm5271_vm1, %v2586_v27, %v2588_v18  ;;  %v2347_v45 = vpack.c.bf16 %v2211_v40, %v2211_v40  ;;  %v2672_v18 = vperm.slane %v3003_v38, %v3970_v50  ;;  %vm5287_vm1 = vmmov %vm5273_vm0 }
 0x90b   : > { %v2452_v19 = vpop.f32.mrf.mxu1  ;;  %v1072_v0 = vpop.permute.xlu1 %1071  ;;  %v2590_v2 = vpack.c.b16 %v2589_v44, %v2589_v44 }
 0x90c   : > { %v1076_v17 = vsel %vm5270_vm15, %v3209_v16, %v1072_v0  ;;  %v2531_v8 = vunpack.c.l.b16 %v2347_v45  ;;  %v3001_v16 = vunpack.i.l.s16 %v2658_v28  ;;  %v3002_v19 = vunpack.i.l.s16 %v2659_v35  ;;  %vm5286_vm15 = vmmov %vm5273_vm0 }
 0x90d   : > { %v2363_v13 = vpack.c.bf16 %v1076_v17, %v1076_v17  ;;  %2994 = vmatmul.msk.bf16.vlgmr.msra.gmra.mxu1 %vm5273_vm0, %v2590_v2  ;;  %vm5289_vm0 = vcmask 261120  }
 0x90e   : > { %v2988_v59 = vunpack.i.l.s16 %v2531_v8  ;;  %v2670_v4 = vperm.slane %v3001_v16, %v3970_v50  ;;  %v2671_v0 = vperm.slane %v3002_v19, %v3970_v50  ;;  %vm5291_vm11 = vmmov %vm5289_vm0 }
 0x90f   : > { %v2681_v55 = vsel %vm5272_vm4, %v2363_v13, 0  ;;  %vm5288_vm4 = vcmask 130048  }
 0x910   : > { %2690 = vmatpush.bf16.msra.mxu0 %v2681_v55  ;;  %v2543_v15 = vperm.slane %v2988_v59, %v3970_v50 }
 0x911   : > { %v5020_v60 = vpop.f32.mrf.mxu0  ;;  %v2229_v24 = vpop.xlane.xlu0 %2228 }
 0x912   : > { %v2546_v48 = vsel %vm5276_vm6, %v2543_v15, %v2545_v58  ;;  %v2353_v43 = vpack.c.bf16 %v2229_v24, %v2229_v24 }
 0x913   : > { %v2547_v30 = vpack.c.b16 %v2546_v48, %v2546_v48 }
 0x914   : > { %v2615_v6 = vunpack.c.l.b16 %v2353_v43 }
 0x915   : > { %2989 = vmatmul.msk.bf16.vlgmr.msrb.gmra.mxu3 %vm5277_vm8, %v2547_v30 }
 0x916   : > { %v2996_v3 = vunpack.i.l.s16 %v2615_v6 }
 0x918   : > { %v2627_v52 = vperm.slane %v2996_v3, %v3970_v50 }
 0x919   : > { %v2522_v36 = vpop.f32.mrf.mxu0 }
 0x91a   : > { %v2630_v61 = vsel %vm5278_vm3, %v2627_v52, %v2626_v39 }
 0x91b   : > { %v2631_v32 = vsel %vm5279_vm13, %v2628_v11, %v2630_v61 }
 0x93f   : > { %v2235_v42 = vpop.xlane.xlu0 %2234 }
 0x940   : > { %v2355_v63 = vpack.c.bf16 %v2235_v42, %v2235_v42 }
 0x942   : > { %v2617_v7 = vunpack.c.l.b16 %v2355_v63 }
 0x944   : > { %v2998_v20 = vunpack.i.l.s16 %v2617_v7 }
 0x946   : > { %v2629_v37 = vperm.slane %v2998_v20, %v3970_v50 }
 0x947   : > { %v2238_v33 = vpop.xlane.xlu0 %2237 }
 0x948   : > { %v2632_v51 = vsel %vm5280_vm9, %v2629_v37, %v2631_v32  ;;  %v2356_v14 = vpack.c.bf16 %v2238_v33, %v2238_v33 }
 0x949   : > { %v2633_v31 = vpack.c.b16 %v2632_v51, %v2632_v51 }
 0x94a   : > { %v2657_v5 = vunpack.c.l.b16 %v2356_v14 }
 0x94b   : > { %2999 = vmatmul.msk.bf16.vlgmr.msrb.gmra.mxu2 %vm5281_vm7, %v2633_v31 }
 0x94c   : > { %v3000_v46 = vunpack.i.l.s16 %v2657_v5 }
 0x94e   : > { %v2669_v27 = vperm.slane %v3000_v46, %v3970_v50 }
 0x950   : > { %v2673_v40 = vsel %vm5282_vm5, %v2670_v4, %v2669_v27 }
 0x951   : > { %v2674_v29 = vsel %vm5283_vm14, %v2671_v0, %v2673_v40 }
 0x952   : > { %v2675_v17 = vsel %vm5284_vm2, %v2672_v18, %v2674_v29 }
 0x953   : > { %v2676_v44 = vpack.c.b16 %v2675_v17, %v2675_v17 }
 0x955   : > { %3004 = vmatmul.msk.bf16.vlgmr.msra.gmra.mxu0 %vm5285_vm10, %v2676_v44 }
 0x964   : > { %v2485_v45 = vpop.f32.mrf.mxu2 }
 0x96c   : > { %v2487_v56 = vpop.f32.mrf.mxu2 }
 0x98a   : > { %v2606_v13 = vpop.f32.mrf.mxu1 }
 0x98b   : > { %v2607_v2 = vadd.f32 %v2606_v13, %v4998_v53  ;;  %v3020_v53 = vld [vmem:[#allocation7] sm:$0xff] }
 0x98d   : > { %2700 = vst [vmem:[#allocation1 + $0x1] ss:$2 sm:$0xff] %v2607_v2 }
 0x992   : > { %v2608_v23 = vpop.f32.mrf.mxu1 }
 0x998   : > { %v2563_v25 = vpop.f32.mrf.mxu3 }
 0x999   : > { %v2564_v8 = vadd.f32 %v2563_v25, %v4994_v49  ;;  %v3021_v49 = vld [vmem:[#allocation7 + $0x8] sm:$0xff] }
 0x99a   : > { %2748 = vmatpush.bf16.msra.mxu3 %v3021_v49 }
 0x99b   : > { %2698 = vst [vmem:[#allocation1] ss:$2 sm:$0xff] %v2564_v8 }
 0x99e   : > { %2749 = vmatpush.bf16.msra.mxu3 %v3020_v53 }
 0x9a0   : > { %v2565_v50 = vpop.f32.mrf.mxu3 }
 0x9a2   : > { %v2701_v1 = vld.sshfl [vmem:[#allocation1] sm:$0xff pattern:$0x75316420] }
 0x9ce   : > { %v2649_v54 = vpop.f32.mrf.mxu2 }
 0x9cf   : > { %v2650_v55 = vadd.f32 %v2649_v54, %v2485_v45 }
 0x9d1   : > { %2705 = vst [vmem:[#allocation1] ss:$2 sm:$0xff] %v2650_v55 }
 0x9d2   : > { %v2692_v59 = vpop.f32.mrf.mxu0 }
 0x9d3   : > { %v2693_v34 = vadd.f32 %v2692_v59, %v5020_v60 }
 0x9d5   : > { %2707 = vst [vmem:[#allocation1 + $0x1] ss:$2 sm:$0xff] %v2693_v34 }
 0x9d6   : > { %v2651_v41 = vpop.f32.mrf.mxu2 }
 0x9da   : > { %v2694_v15 = vpop.f32.mrf.mxu0 }
 0x9dc   : > { %v2708_v22 = vld.sshfl [vmem:[#allocation1] sm:$0xff pattern:$0x75316420] }
 0x9dd   : > { %2709 = vrot.lane.b32.xlu2 %v2708_v22, %s3695_s3 }
 0x9e5   : > { %825 = vrot.lane.b32.xlu2 %v4182_v57, %s3695_s3  ;;  %v3211_v57 = vld [vmem:[#allocation8] ss:$0 sm:$0xff] }
 0xa37   : > { %v2710_v58 = vpop.permute.xlu2 %2709 }
 0xa38   : > { %v2712_v24 = vsel %vm5286_vm15, %v2701_v1, %v2710_v58 }
 0xa39   : > { %2714 = vrot.lane.b32.xlu0 %v2712_v24, %s3686_s6  ;;  %s542_s6 = scalar_lea.vmem [#allocation19], %s2943_s15  ;;  %s3604_s15 = scalar_lea.hbm %s5290_s14, 16 }
 0xa3a   : > { %s2769_s26 = sshll.u32 %s542_s6, 4  ;;  %p3606_p8 = scmp.lt.s32.totalorder %s3604_s15, %s3600_s24  ;;  %s2770_s26 = int_to_ptr.vmem [resolvable:$true] %s2769_s26 }
 0xa3c   : > { %p3607_p7 = por %p3606_p8, %p3605_p12 }
 0xa3e   : > { %p3608_p9 = pnand %p3607_p7, %p3603_p5 }
 0xa3f   : > { %v826_v60 = vpop.permute.xlu2 %825 }
 0xa40   : > { %v828_v48 = vsel %vm5287_vm1, %v4060_v10, %v826_v60 }
 0xaab   : > { %v2715_v43 = vpop.permute.xlu0 %2714 }
 0xaac   : > { %v2717_v30 = vsel %vm5288_vm4, %v828_v48, %v2715_v43 }
 0xaad   : > { %v2718_v62 = vpack.c.bf16 %v2717_v30, %v2717_v30 }
 0xaaf   : > { %3013 = vmatmul.msk.bf16.vlgmr.msra.gmra.mxu3 %vm5289_vm0, %v2718_v62 }
 0xb32   : > { %v2751_v6 = vpop.f32.mrf.mxu3 }
 0xb33   : > { %v2752_v10 = vadd.f32 %v3211_v57, %v2751_v6 }
 0xb35   : > { %2755 = vst.msk [vmem:[%s542_s6] sm:$0xff] %vm5291_vm11, %v2752_v10 }
 0xb36   : > { %3611 = shalt.err (!%p3608_p9)
}
 0xb37   : > { %3060 = dma.vmem_to_hbm [thread:$0]  (%p3865_p13), %s2770_s26, 128, %s2772_s4, %s2757_s28  }
 0xb3a   : > { %v2753_v9 = vpop.f32.mrf.mxu3 }
 0xb3b PF: > { %s2783_s30 = sand.u32 1, %s3658_s17   ;;  %p5292_p10 = scmp.ge.s32.totalorder %s3670_s20, 2 }
 0xb3c   : > { %s2784_s29 = scalar_lea.sflag [#allocation4], %s2783_s30 }
 0xb3d   : > { %p3095_p11 = pnand %p5292_p10, %p3870_p4 }
 0xb3f   : > { %p3096_p0 = pneg %p3095_p11 }
 0xb41   : > { %3653 = dma.done.wait (%p3096_p0), %s2784_s29, 128  }
 0xb42   : > { %3655 = vsyncadd (%p3096_p0), %s2784_s29, 4294967168  ;;  %p29_p2 = scmp.ge.s32.totalorder %s3845_s13, 4   ;;  %s5293_s17 = smov %s3662_s18 }
 0xb43   : > { %s5294_s18 = smov %s3666_s19  ;;  %s5295_s19 = smov %s3857_s16 }
 0xb44   : > { %s5296_s20 = smov %s3845_s13  ;;  %31 = sbr.rel (!%p29_p2) target bundleno = 16 (0x10), region = 163 }
 0xb49   :  { %2790 = vsyncpa [#allocation3], 1 }
 0xb4a   :  { %2792 = vsyncpa [#allocation3 + $0x1], 1 }
 0xb4b   :  { %2793 = vsyncpa [#allocation6], 1 }
 0xb4c   :  { %2794 = vsyncpa [#allocation9], 1 }
 0xb4d   :  { %2795 = vsyncpa [#allocation12], 1 }
 0xb4e   :  { %2796 = vsyncpa [#allocation15], 1 }
 0xb4f   :  { %2797 = vsyncpa [#allocation18], 1 }
 0xb50   :  { %2798 = vsyncpa [#allocation4], 1 }
 0xb51   :  { %2800 = vsyncpa [#allocation4 + $0x1], 1 }

</bundles_post_ra>
